<compile_context>
chip_gen: v7x
topology: tpu7x:2x2x1
jax: 0.10.0
libtpu: 0.0.40
codegen_flags: <defaults>
</compile_context>

<pallas_src>
import jax
import jax.numpy as jnp
import numpy as np
from jax.experimental import pallas as pl
from jax.experimental.pallas import tpu as pltpu

# ---- LSTNet hyper-parameters (small, deterministic) ----
B     = 2     # batch
P     = 16    # input_len
D     = 8     # input_dim
HIDR  = 16    # hidRNN
HIDC  = 16    # hidCNN
HIDS  = 8     # hidSkip
SKIP  = 2     # skip
CK    = 3     # CNN_kernel
HW    = 4     # highway_window
C_OUT = 6     # c_out
T     = P - CK + 1          # conv output length (14)
PT    = (P - CK) // SKIP    # skip-GRU sequence length (6)
OFF   = T - PT * SKIP       # skip-GRU time offset (2)
BP    = 8                   # sublane-padded batch tile (B=2 padded to 8 rows)


def lstnet_kernel(x_ref, wc_ref, bc_ref,
                  wih_ref, whh_ref, bih_ref, bhh_ref,
                  wihs_ref, whhs_ref, bihs_ref, bhhs_ref,
                  w1_ref, b1_ref, whw_ref, bhw_ref,
                  res_ref, gt_ref):
    # x_ref is time-major, batch padded to BP rows: row t*BP + b holds x[b, t, :]
    # for b < B; rows with b >= B are zero and never mix with real rows.
    x = x_ref[...]                                           # (P*BP, D) f32
    rows = P * BP

    # ---- LIN: per-(batch, channel) LayerNorm over time (eps=0, no affine) ----
    # Two independent masked sums (E[x], E[x^2]) per real batch; no mean->var
    # serial dependency.  Batch id of a row is row % BP.
    row_b = jax.lax.broadcasted_iota(jnp.int32, (rows, 1), 0) % BP
    mean_full = jnp.zeros_like(x)
    rstd_full = jnp.zeros_like(x)
    for b in range(B):
        m = row_b == b                                       # (rows, 1)
        xb = jnp.where(m, x, 0.0)
        sum1 = jnp.sum(xb, axis=0, keepdims=True)            # (1, D)
        sum2 = jnp.sum(xb * xb, axis=0, keepdims=True)       # (1, D)
        mean_b = sum1 / P
        var_b = sum2 / P - mean_b * mean_b
        mean_full = jnp.where(m, mean_b, mean_full)
        rstd_full = jnp.where(m, jax.lax.rsqrt(var_b), rstd_full)
    x_norm = (x - mean_full) * rstd_full

    # Channel select (only lanes < c_out are normalized) fused with the
    # inf/nan cleanup; the lane mask is a single (1, D) iota.
    lane = jax.lax.broadcasted_iota(jnp.int32, (1, D), 1)
    x_sel = jnp.where(lane < C_OUT, x_norm, x)
    x = jnp.where(jnp.isinf(x_sel) | jnp.isnan(x_sel), 0.0, x_sel)

    # ground truth: last time step, first c_out channels (padded rows sliced off
    # in the wrapper).
    gt_ref[...] = x[(P - 1) * BP:, :C_OUT]

    # ---- Conv2d(1, hidC, (Ck, D)) + ReLU, batched over all T output steps ----
    # Tap k operand is the contiguous, sublane-aligned row slice
    # x[k*BP : k*BP + T*BP]; accumulate-into-dot (MRB in-place accumulate on v7x).
    acc = jnp.dot(x[0:T * BP], wc_ref[0], preferred_element_type=jnp.float32)
    for k in range(1, CK):
        acc = acc + jnp.dot(x[k * BP:k * BP + T * BP], wc_ref[k],
                            preferred_element_type=jnp.float32)
    c_all = jnp.maximum(acc + bc_ref[...], 0.0)              # (T*BP, hidC)

    # ---- GRU input projections, hoisted and gate-packed (1 dot per GRU) ----
    gi = jnp.dot(c_all, wih_ref[...],
                 preferred_element_type=jnp.float32) + bih_ref[...]    # (T*BP, 3*hidR)
    gis = jnp.dot(c_all, wihs_ref[...],
                  preferred_element_type=jnp.float32) + bihs_ref[...]  # (T*BP, 3*hidS)

    whh = whh_ref[...]                                       # (hidR, 3*hidR)
    bhh = bhh_ref[...]                                       # (1, 3*hidR)
    whhs = whhs_ref[...]                                     # (hidS, 3*hidS)
    bhhs = bhhs_ref[...]                                     # (1, 3*hidS)

    # ---- main GRU over T steps: ONE h @ W dot + 2 EUP pushes per step ----
    H2 = 2 * HIDR
    h = jnp.zeros((BP, HIDR), jnp.float32)
    for t in range(T):
        lo = t * BP
        a = gi[lo:lo + BP]                                                 # (BP, 48)
        gh = jnp.dot(h, whh, preferred_element_type=jnp.float32) + bhh    # (BP, 48)
        rz = jax.nn.sigmoid(a[:, :H2] + gh[:, :H2])                       # (BP, 32)
        r = rz[:, :HIDR]
        z = rz[:, HIDR:]
        n = jnp.tanh(a[:, H2:] + r * gh[:, H2:])
        h = (1.0 - z) * n + z * h

    # ---- skip GRU: all SKIP phases fused into one (SKIP*BP, hidS) state ----
    # State row m corresponds to (phase j = m // BP, batch b = m % BP); the
    # input for step p is the contiguous, aligned gis row slice starting at
    # (OFF + p*SKIP)*BP, whose rows carry exactly that same (j, b) ordering.
    S2 = 2 * HIDS
    hs = jnp.zeros((SKIP * BP, HIDS), jnp.float32)
    for pstep in range(PT):
        lo = (OFF + pstep * SKIP) * BP
        a = gis[lo:lo + SKIP * BP]                                          # (16, 24)
        gh = jnp.dot(hs, whhs, preferred_element_type=jnp.float32) + bhhs  # (16, 24)
        rz = jax.nn.sigmoid(a[:, :S2] + gh[:, :S2])
        r = rz[:, :HIDS]
        z = rz[:, HIDS:]
        n = jnp.tanh(a[:, S2:] + r * gh[:, S2:])
        hs = (1.0 - z) * n + z * hs

    # ---- highway (AR) term: per-feature linear over the last hw time steps ----
    ar = jnp.zeros((BP, D), jnp.float32)
    for k in range(HW):
        ar = ar + x[(P - HW + k) * BP:(P - HW + k + 1) * BP] * whw_ref[0, k]

    # ---- linear1 on concat([h, hs_phase0, hs_phase1]): the concat is folded
    #      into row blocks of w1 (aligned 16/8/8-row slices), accumulate-into-dot.
    w1 = w1_ref[...]                                         # (hidR+skip*hidS, c_out)
    res = jnp.dot(h, w1[:HIDR], preferred_element_type=jnp.float32)
    for j in range(SKIP):
        lo = HIDR + j * HIDS
        res = res + jnp.dot(hs[j * BP:(j + 1) * BP], w1[lo:lo + HIDS],
                            preferred_element_type=jnp.float32)
    res = res + b1_ref[...] + (ar[:, :C_OUT] + bhw_ref[0, 0])

    res_ref[...] = res                                       # (BP, c_out)


def _lstnet_forward_impl(x_bpd, params):
    """x_bpd: (B, P, D) — same layout the PyTorch module receives."""
    # Time-major + batch padded to BP=8 rows per step: row t*BP + b.  Done
    # inside the jit so relayout + kernel + output slicing is a single dispatch.
    xt = jnp.transpose(x_bpd.astype(jnp.float32), (1, 0, 2))        # (P, B, D)
    xp = jnp.pad(xt, ((0, 0), (0, BP - B), (0, 0)))                 # (P, BP, D)
    x_flat = xp.reshape(P * BP, D)

    vmem = lambda: pl.BlockSpec(memory_space=pltpu.MemorySpace.VMEM)
    smem = lambda: pl.BlockSpec(memory_space=pltpu.MemorySpace.SMEM)

    cost = pl.CostEstimate(flops=600_000, transcendentals=10_000,
                           bytes_accessed=32_768)

    res, gt = pl.pallas_call(
        lstnet_kernel,
        out_shape=(jax.ShapeDtypeStruct((BP, C_OUT), jnp.float32),
                   jax.ShapeDtypeStruct((BP, C_OUT), jnp.float32)),
        in_specs=[vmem() for _ in range(13)] + [smem(), smem()],
        out_specs=(vmem(), vmem()),
        cost_estimate=cost,
    )(x_flat,
      params['wc'], params['bc'],
      params['wih'], params['whh'], params['bih'], params['bhh'],
      params['wihs'], params['whhs'], params['bihs'], params['bhhs'],
      params['w1'], params['b1'],
      params['whw'], params['bhw'])
    # PyTorch: res.view(-1, 1, c_out), gt of shape (B, 1, c_out)
    return res[:B].reshape(B, 1, C_OUT), gt[:B].reshape(B, 1, C_OUT)


lstnet_forward = jax.jit(_lstnet_forward_impl)


def init_params(key):
    """Deterministic synthetic parameters in PyTorch shapes, re-laid-out for the kernel."""
    ks = jax.random.split(key, 14)
    s = 0.1
    conv_w = s * jax.random.normal(ks[0], (HIDC, 1, CK, D))      # conv1.weight
    conv_b = s * jax.random.normal(ks[1], (HIDC,))               # conv1.bias
    g1_wih = s * jax.random.normal(ks[2], (3 * HIDR, HIDC))      # GRU1.weight_ih_l0
    g1_whh = s * jax.random.normal(ks[3], (3 * HIDR, HIDR))      # GRU1.weight_hh_l0
    g1_bih = s * jax.random.normal(ks[4], (3 * HIDR,))
    g1_bhh = s * jax.random.normal(ks[5], (3 * HIDR,))
    gs_wih = s * jax.random.normal(ks[6], (3 * HIDS, HIDC))      # GRUskip.weight_ih_l0
    gs_whh = s * jax.random.normal(ks[7], (3 * HIDS, HIDS))
    gs_bih = s * jax.random.normal(ks[8], (3 * HIDS,))
    gs_bhh = s * jax.random.normal(ks[9], (3 * HIDS,))
    l1_w = s * jax.random.normal(ks[10], (C_OUT, HIDR + SKIP * HIDS))  # linear1
    l1_b = s * jax.random.normal(ks[11], (C_OUT,))
    hw_w = s * jax.random.normal(ks[12], (1, HW))                # highway
    hw_b = s * jax.random.normal(ks[13], (1,))

    # PyTorch GRU gate order is [r | z | n] stacked on the output dim, so the
    # gate-packed "x @ W" layout is simply W.T (in_dim, 3*H); biases stay packed.
    return dict(
        wc=jnp.transpose(conv_w[:, 0], (1, 2, 0)),   # (Ck, D, hidC)
        bc=conv_b.reshape(1, HIDC),
        wih=g1_wih.T, whh=g1_whh.T,                  # (hidC, 3*hidR), (hidR, 3*hidR)
        bih=g1_bih.reshape(1, -1), bhh=g1_bhh.reshape(1, -1),
        wihs=gs_wih.T, whhs=gs_whh.T,                # (hidC, 3*hidS), (hidS, 3*hidS)
        bihs=gs_bih.reshape(1, -1), bhhs=gs_bhh.reshape(1, -1),
        w1=l1_w.T, b1=l1_b.reshape(1, -1),
        whw=hw_w.reshape(1, HW), bhw=hw_b.reshape(1, 1),
    )


def _gru_step_ref(xt, h, wih, whh, bih, bhh, H):
    """PyTorch-convention GRU cell, gate-packed weight layout (in, 3H)."""
    gi = xt @ wih + bih
    gh = h @ whh + bhh
    r = jax.nn.sigmoid(gi[:, :H] + gh[:, :H])
    z = jax.nn.sigmoid(gi[:, H:2 * H] + gh[:, H:2 * H])
    n = jnp.tanh(gi[:, 2 * H:] + r * gh[:, 2 * H:])
    return (1.0 - z) * n + z * h


def lstnet_reference(x_bpd, p):
    """Pure-JAX reference with the same (PyTorch) semantics, for validation."""
    x = x_bpd.astype(jnp.float32)
    xc = x[:, :, :C_OUT]
    mean = xc.mean(axis=1, keepdims=True)
    var = ((xc - mean) ** 2).mean(axis=1, keepdims=True)
    xc = (xc - mean) / jnp.sqrt(var)
    x = jnp.concatenate([xc, x[:, :, C_OUT:]], axis=-1)
    x = jnp.where(jnp.isinf(x) | jnp.isnan(x), 0.0, x)
    gt = x[:, -1:, :C_OUT]

    c = jnp.zeros((B, T, HIDC), jnp.float32)
    for k in range(CK):
        c = c + jnp.einsum('btd,dc->btc', x[:, k:k + T, :], p['wc'][k])
    c = jax.nn.relu(c + p['bc'][0])

    h = jnp.zeros((B, HIDR), jnp.float32)
    for t in range(T):
        h = _gru_step_ref(c[:, t, :], h, p['wih'], p['whh'], p['bih'], p['bhh'], HIDR)

    hs = [jnp.zeros((B, HIDS), jnp.float32) for _ in range(SKIP)]
    for pp in range(PT):
        for j in range(SKIP):
            hs[j] = _gru_step_ref(c[:, OFF + pp * SKIP + j, :], hs[j],
                                  p['wihs'], p['whhs'], p['bihs'], p['bhhs'], HIDS)

    feat = jnp.concatenate([h] + hs, axis=1)
    res = feat @ p['w1'] + p['b1']
    z = jnp.einsum('bkd,k->bd', x[:, -HW:, :], p['whw'][0]) + p['bhw'][0, 0]
    res = res + z[:, :C_OUT]
    return res.reshape(B, 1, C_OUT), gt


if __name__ == "__main__":
    key = jax.random.PRNGKey(0)
    kx, kp = jax.random.split(key)
    x = jax.random.normal(kx, (B, P, D), dtype=jnp.float32)
    params = init_params(kp)

    res, gt = lstnet_forward(x, params)
    jax.block_until_ready((res, gt))

    res_ref, gt_ref = lstnet_reference(x, params)
    assert res.shape == (B, 1, C_OUT) and gt.shape == (B, 1, C_OUT)
    np.testing.assert_allclose(np.asarray(res), np.asarray(res_ref),
                               atol=2e-3, rtol=2e-3)
    np.testing.assert_allclose(np.asarray(gt), np.asarray(gt_ref),
                               atol=2e-3, rtol=2e-3)
    print("KERNEL_OK")
</pallas_src>

<mosaic_0001>
module attributes {stable_mosaic.version = 11 : i64} {
  func.func @lstnet_kernel(%arg0: memref<128x8xf32, #tpu.memory_space<vmem>>, %arg1: memref<3x8x16xf32, #tpu.memory_space<vmem>>, %arg2: memref<1x16xf32, #tpu.memory_space<vmem>>, %arg3: memref<16x48xf32, #tpu.memory_space<vmem>>, %arg4: memref<16x48xf32, #tpu.memory_space<vmem>>, %arg5: memref<1x48xf32, #tpu.memory_space<vmem>>, %arg6: memref<1x48xf32, #tpu.memory_space<vmem>>, %arg7: memref<16x24xf32, #tpu.memory_space<vmem>>, %arg8: memref<8x24xf32, #tpu.memory_space<vmem>>, %arg9: memref<1x24xf32, #tpu.memory_space<vmem>>, %arg10: memref<1x24xf32, #tpu.memory_space<vmem>>, %arg11: memref<32x6xf32, #tpu.memory_space<vmem>>, %arg12: memref<1x6xf32, #tpu.memory_space<vmem>>, %arg13: memref<1x4xf32, #tpu.memory_space<smem>>, %arg14: memref<1x1xf32, #tpu.memory_space<smem>>, %arg15: memref<8x6xf32, #tpu.memory_space<vmem>>, %arg16: memref<8x6xf32, #tpu.memory_space<vmem>>) attributes {dimension_semantics = [], scalar_prefetch = 0 : i64, scratch_operands = 0 : i64, tpu.core_type = #tpu.core_type<tc>} {
    %c0 = arith.constant 0 : index
    %c0_0 = arith.constant 0 : index
    %0 = vector.load %arg0[%c0, %c0_0] : memref<128x8xf32, #tpu.memory_space<vmem>>, vector<128x8xf32>
    %1 = tpu.iota {dimensions = array<i32: 0>} : vector<128x1xi32>
    %c8_i32 = arith.constant 8 : i32
    %c0_i32 = arith.constant 0 : i32
    %2 = arith.cmpi eq, %c8_i32, %c0_i32 : i32
    %c1_i32 = arith.constant 1 : i32
    %3 = arith.select %2, %c1_i32, %c8_i32 : i32
    %4 = vector.broadcast %3 : i32 to vector<128x1xi32>
    %5 = arith.remsi %1, %4 : vector<128x1xi32>
    %c0_i32_1 = arith.constant 0 : i32
    %6 = vector.broadcast %c0_i32_1 : i32 to vector<128x1xi32>
    %7 = arith.cmpi ne, %5, %6 : vector<128x1xi32>
    %c0_i32_2 = arith.constant 0 : i32
    %8 = vector.broadcast %c0_i32_2 : i32 to vector<128x1xi32>
    %9 = arith.cmpi slt, %5, %8 : vector<128x1xi32>
    %c0_i32_3 = arith.constant 0 : i32
    %10 = arith.cmpi slt, %3, %c0_i32_3 : i32
    %11 = vector.broadcast %10 : i1 to vector<128x1xi1>
    %12 = vector.broadcast %11 : vector<128x1xi1> to vector<128x1xi1>
    %13 = arith.xori %9, %12 : vector<128x1xi1>
    %14 = arith.andi %13, %7 : vector<128x1xi1>
    %15 = vector.broadcast %3 : i32 to vector<128x1xi32>
    %16 = arith.addi %5, %15 : vector<128x1xi32>
    %17 = arith.select %14, %16, %5 : vector<128x1xi1>, vector<128x1xi32>
    %cst = arith.constant 0.000000e+00 : f32
    %18 = vector.broadcast %cst : f32 to vector<128x8xf32>
    %cst_4 = arith.constant 0.000000e+00 : f32
    %19 = vector.broadcast %cst_4 : f32 to vector<128x8xf32>
    %c0_i32_5 = arith.constant 0 : i32
    %20 = vector.broadcast %c0_i32_5 : i32 to vector<128x1xi32>
    %21 = arith.cmpi eq, %17, %20 : vector<128x1xi32>
    %cst_6 = arith.constant 0.000000e+00 : f32
    %22 = vector.shape_cast %21 : vector<128x1xi1> to vector<128x1xi1>
    %23 = vector.broadcast %22 : vector<128x1xi1> to vector<128x8xi1>
    %24 = vector.broadcast %cst_6 : f32 to vector<128x8xf32>
    %25 = arith.select %23, %0, %24 : vector<128x8xi1>, vector<128x8xf32>
    %cst_7 = arith.constant dense<0.000000e+00> : vector<8xf32>
    %26 = vector.multi_reduction <add>, %25, %cst_7 [0] : vector<128x8xf32> to vector<8xf32>
    %27 = vector.shape_cast %26 : vector<8xf32> to vector<1x8xf32>
    %28 = arith.mulf %25, %25 : vector<128x8xf32>
    %cst_8 = arith.constant dense<0.000000e+00> : vector<8xf32>
    %29 = vector.multi_reduction <add>, %28, %cst_8 [0] : vector<128x8xf32> to vector<8xf32>
    %30 = vector.shape_cast %29 : vector<8xf32> to vector<1x8xf32>
    %cst_9 = arith.constant 1.600000e+01 : f32
    %31 = vector.broadcast %cst_9 : f32 to vector<1x8xf32>
    %32 = arith.divf %27, %31 : vector<1x8xf32>
    %cst_10 = arith.constant 1.600000e+01 : f32
    %33 = vector.broadcast %cst_10 : f32 to vector<1x8xf32>
    %34 = arith.divf %30, %33 : vector<1x8xf32>
    %35 = arith.mulf %32, %32 : vector<1x8xf32>
    %36 = arith.subf %34, %35 : vector<1x8xf32>
    %37 = vector.shape_cast %21 : vector<128x1xi1> to vector<128x1xi1>
    %38 = vector.broadcast %37 : vector<128x1xi1> to vector<128x8xi1>
    %39 = vector.shape_cast %32 : vector<1x8xf32> to vector<1x8xf32>
    %40 = vector.broadcast %39 : vector<1x8xf32> to vector<128x8xf32>
    %41 = arith.select %38, %40, %18 : vector<128x8xi1>, vector<128x8xf32>
    %42 = math.rsqrt %36 : vector<1x8xf32>
    %43 = vector.shape_cast %21 : vector<128x1xi1> to vector<128x1xi1>
    %44 = vector.broadcast %43 : vector<128x1xi1> to vector<128x8xi1>
    %45 = vector.shape_cast %42 : vector<1x8xf32> to vector<1x8xf32>
    %46 = vector.broadcast %45 : vector<1x8xf32> to vector<128x8xf32>
    %47 = arith.select %44, %46, %19 : vector<128x8xi1>, vector<128x8xf32>
    %c1_i32_11 = arith.constant 1 : i32
    %48 = vector.broadcast %c1_i32_11 : i32 to vector<128x1xi32>
    %49 = arith.cmpi eq, %17, %48 : vector<128x1xi32>
    %cst_12 = arith.constant 0.000000e+00 : f32
    %50 = vector.shape_cast %49 : vector<128x1xi1> to vector<128x1xi1>
    %51 = vector.broadcast %50 : vector<128x1xi1> to vector<128x8xi1>
    %52 = vector.broadcast %cst_12 : f32 to vector<128x8xf32>
    %53 = arith.select %51, %0, %52 : vector<128x8xi1>, vector<128x8xf32>
    %cst_13 = arith.constant dense<0.000000e+00> : vector<8xf32>
    %54 = vector.multi_reduction <add>, %53, %cst_13 [0] : vector<128x8xf32> to vector<8xf32>
    %55 = vector.shape_cast %54 : vector<8xf32> to vector<1x8xf32>
    %56 = arith.mulf %53, %53 : vector<128x8xf32>
    %cst_14 = arith.constant dense<0.000000e+00> : vector<8xf32>
    %57 = vector.multi_reduction <add>, %56, %cst_14 [0] : vector<128x8xf32> to vector<8xf32>
    %58 = vector.shape_cast %57 : vector<8xf32> to vector<1x8xf32>
    %cst_15 = arith.constant 1.600000e+01 : f32
    %59 = vector.broadcast %cst_15 : f32 to vector<1x8xf32>
    %60 = arith.divf %55, %59 : vector<1x8xf32>
    %cst_16 = arith.constant 1.600000e+01 : f32
    %61 = vector.broadcast %cst_16 : f32 to vector<1x8xf32>
    %62 = arith.divf %58, %61 : vector<1x8xf32>
    %63 = arith.mulf %60, %60 : vector<1x8xf32>
    %64 = arith.subf %62, %63 : vector<1x8xf32>
    %65 = vector.shape_cast %49 : vector<128x1xi1> to vector<128x1xi1>
    %66 = vector.broadcast %65 : vector<128x1xi1> to vector<128x8xi1>
    %67 = vector.shape_cast %60 : vector<1x8xf32> to vector<1x8xf32>
    %68 = vector.broadcast %67 : vector<1x8xf32> to vector<128x8xf32>
    %69 = arith.select %66, %68, %41 : vector<128x8xi1>, vector<128x8xf32>
    %70 = math.rsqrt %64 : vector<1x8xf32>
    %71 = vector.shape_cast %49 : vector<128x1xi1> to vector<128x1xi1>
    %72 = vector.broadcast %71 : vector<128x1xi1> to vector<128x8xi1>
    %73 = vector.shape_cast %70 : vector<1x8xf32> to vector<1x8xf32>
    %74 = vector.broadcast %73 : vector<1x8xf32> to vector<128x8xf32>
    %75 = arith.select %72, %74, %47 : vector<128x8xi1>, vector<128x8xf32>
    %76 = arith.subf %0, %69 : vector<128x8xf32>
    %77 = arith.mulf %76, %75 : vector<128x8xf32>
    %78 = tpu.iota {dimensions = array<i32: 1>} : vector<1x8xi32>
    %c6_i32 = arith.constant 6 : i32
    %79 = vector.broadcast %c6_i32 : i32 to vector<1x8xi32>
    %80 = arith.cmpi slt, %78, %79 : vector<1x8xi32>
    %81 = vector.shape_cast %80 : vector<1x8xi1> to vector<1x8xi1>
    %82 = vector.broadcast %81 : vector<1x8xi1> to vector<128x8xi1>
    %83 = arith.select %82, %77, %0 : vector<128x8xi1>, vector<128x8xf32>
    %84 = math.absf %83 : vector<128x8xf32>
    %cst_17 = arith.constant 0x7F800000 : f32
    %85 = vector.broadcast %cst_17 : f32 to vector<128x8xf32>
    %86 = arith.cmpf oeq, %84, %85 : vector<128x8xf32>
    %87 = arith.cmpf one, %83, %83 : vector<128x8xf32>
    %88 = arith.ori %86, %87 : vector<128x8xi1>
    %cst_18 = arith.constant 0.000000e+00 : f32
    %89 = vector.broadcast %cst_18 : f32 to vector<128x8xf32>
    %90 = arith.select %88, %89, %83 : vector<128x8xi1>, vector<128x8xf32>
    %91 = vector.extract_strided_slice %90 {offsets = [120, 0], sizes = [8, 6], strides = [1, 1]} : vector<128x8xf32> to vector<8x6xf32>
    %c0_19 = arith.constant 0 : index
    %c0_20 = arith.constant 0 : index
    %92 = vector.load %arg16[%c0_19, %c0_20] : memref<8x6xf32, #tpu.memory_space<vmem>>, vector<8x6xf32>
    tpu.vector_store %arg16[%c0_19, %c0_20], %91 {strides = array<i32>} : memref<8x6xf32, #tpu.memory_space<vmem>>, vector<8x6xf32>,
    %93 = vector.extract_strided_slice %90 {offsets = [0, 0], sizes = [112, 8], strides = [1, 1]} : vector<128x8xf32> to vector<112x8xf32>
    %c0_21 = arith.constant 0 : index
    %c0_22 = arith.constant 0 : index
    %c0_23 = arith.constant 0 : index
    %94 = vector.load %arg1[%c0_21, %c0_22, %c0_23] : memref<3x8x16xf32, #tpu.memory_space<vmem>>, vector<1x8x16xf32>
    %95 = vector.shape_cast %94 : vector<1x8x16xf32> to vector<8x16xf32>
    %cst_24 = arith.constant dense<0.000000e+00> : vector<112x16xf32>
    %96 = tpu.matmul %93, %95, %cst_24 {dimension_numbers = #tpu.dot_dimension_numbers<[1], [0], [0], [1], [0, 0, 1, 1], [], []>} : vector<112x8xf32>, vector<8x16xf32>, vector<112x16xf32> -> vector<112x16xf32>
    %97 = vector.extract_strided_slice %90 {offsets = [8, 0], sizes = [112, 8], strides = [1, 1]} : vector<128x8xf32> to vector<112x8xf32>
    %c1 = arith.constant 1 : index
    %c0_25 = arith.constant 0 : index
    %c0_26 = arith.constant 0 : index
    %98 = vector.load %arg1[%c1, %c0_25, %c0_26] : memref<3x8x16xf32, #tpu.memory_space<vmem>>, vector<1x8x16xf32>
    %99 = vector.shape_cast %98 : vector<1x8x16xf32> to vector<8x16xf32>
    %cst_27 = arith.constant dense<0.000000e+00> : vector<112x16xf32>
    %100 = tpu.matmul %97, %99, %cst_27 {dimension_numbers = #tpu.dot_dimension_numbers<[1], [0], [0], [1], [0, 0, 1, 1], [], []>} : vector<112x8xf32>, vector<8x16xf32>, vector<112x16xf32> -> vector<112x16xf32>
    %101 = arith.addf %96, %100 : vector<112x16xf32>
    %102 = vector.extract_strided_slice %90 {offsets = [16, 0], sizes = [112, 8], strides = [1, 1]} : vector<128x8xf32> to vector<112x8xf32>
    %c2 = arith.constant 2 : index
    %c0_28 = arith.constant 0 : index
    %c0_29 = arith.constant 0 : index
    %103 = vector.load %arg1[%c2, %c0_28, %c0_29] : memref<3x8x16xf32, #tpu.memory_space<vmem>>, vector<1x8x16xf32>
    %104 = vector.shape_cast %103 : vector<1x8x16xf32> to vector<8x16xf32>
    %cst_30 = arith.constant dense<0.000000e+00> : vector<112x16xf32>
    %105 = tpu.matmul %102, %104, %cst_30 {dimension_numbers = #tpu.dot_dimension_numbers<[1], [0], [0], [1], [0, 0, 1, 1], [], []>} : vector<112x8xf32>, vector<8x16xf32>, vector<112x16xf32> -> vector<112x16xf32>
    %106 = arith.addf %101, %105 : vector<112x16xf32>
    %c0_31 = arith.constant 0 : index
    %c0_32 = arith.constant 0 : index
    %107 = vector.load %arg2[%c0_31, %c0_32] : memref<1x16xf32, #tpu.memory_space<vmem>>, vector<1x16xf32>
    %108 = vector.broadcast %107 : vector<1x16xf32> to vector<112x16xf32>
    %109 = arith.addf %106, %108 : vector<112x16xf32>
    %cst_33 = arith.constant 0.000000e+00 : f32
    %110 = vector.broadcast %cst_33 : f32 to vector<112x16xf32>
    %111 = arith.maximumf %109, %110 : vector<112x16xf32>
    %c0_34 = arith.constant 0 : index
    %c0_35 = arith.constant 0 : index
    %112 = vector.load %arg3[%c0_34, %c0_35] : memref<16x48xf32, #tpu.memory_space<vmem>>, vector<16x48xf32>
    %cst_36 = arith.constant dense<0.000000e+00> : vector<112x48xf32>
    %113 = tpu.matmul %111, %112, %cst_36 {dimension_numbers = #tpu.dot_dimension_numbers<[1], [0], [0], [1], [0, 0, 1, 1], [], []>} : vector<112x16xf32>, vector<16x48xf32>, vector<112x48xf32> -> vector<112x48xf32>
    %c0_37 = arith.constant 0 : index
    %c0_38 = arith.constant 0 : index
    %114 = vector.load %arg5[%c0_37, %c0_38] : memref<1x48xf32, #tpu.memory_space<vmem>>, vector<1x48xf32>
    %115 = vector.broadcast %114 : vector<1x48xf32> to vector<112x48xf32>
    %116 = arith.addf %113, %115 : vector<112x48xf32>
    %c0_39 = arith.constant 0 : index
    %c0_40 = arith.constant 0 : index
    %117 = vector.load %arg7[%c0_39, %c0_40] : memref<16x24xf32, #tpu.memory_space<vmem>>, vector<16x24xf32>
    %cst_41 = arith.constant dense<0.000000e+00> : vector<112x24xf32>
    %118 = tpu.matmul %111, %117, %cst_41 {dimension_numbers = #tpu.dot_dimension_numbers<[1], [0], [0], [1], [0, 0, 1, 1], [], []>} : vector<112x16xf32>, vector<16x24xf32>, vector<112x24xf32> -> vector<112x24xf32>
    %c0_42 = arith.constant 0 : index
    %c0_43 = arith.constant 0 : index
    %119 = vector.load %arg9[%c0_42, %c0_43] : memref<1x24xf32, #tpu.memory_space<vmem>>, vector<1x24xf32>
    %120 = vector.broadcast %119 : vector<1x24xf32> to vector<112x24xf32>
    %121 = arith.addf %118, %120 : vector<112x24xf32>
    %c0_44 = arith.constant 0 : index
    %c0_45 = arith.constant 0 : index
    %122 = vector.load %arg4[%c0_44, %c0_45] : memref<16x48xf32, #tpu.memory_space<vmem>>, vector<16x48xf32>
    %c0_46 = arith.constant 0 : index
    %c0_47 = arith.constant 0 : index
    %123 = vector.load %arg6[%c0_46, %c0_47] : memref<1x48xf32, #tpu.memory_space<vmem>>, vector<1x48xf32>
    %c0_48 = arith.constant 0 : index
    %c0_49 = arith.constant 0 : index
    %124 = vector.load %arg8[%c0_48, %c0_49] : memref<8x24xf32, #tpu.memory_space<vmem>>, vector<8x24xf32>
    %c0_50 = arith.constant 0 : index
    %c0_51 = arith.constant 0 : index
    %125 = vector.load %arg10[%c0_50, %c0_51] : memref<1x24xf32, #tpu.memory_space<vmem>>, vector<1x24xf32>
    %cst_52 = arith.constant 0.000000e+00 : f32
    %126 = vector.broadcast %cst_52 : f32 to vector<8x16xf32>
    %127 = vector.extract_strided_slice %116 {offsets = [0, 0], sizes = [8, 48], strides = [1, 1]} : vector<112x48xf32> to vector<8x48xf32>
    %cst_53 = arith.constant dense<0.000000e+00> : vector<8x48xf32>
    %128 = tpu.matmul %126, %122, %cst_53 {dimension_numbers = #tpu.dot_dimension_numbers<[1], [0], [0], [1], [0, 0, 1, 1], [], []>} : vector<8x16xf32>, vector<16x48xf32>, vector<8x48xf32> -> vector<8x48xf32>
    %129 = vector.broadcast %123 : vector<1x48xf32> to vector<8x48xf32>
    %130 = arith.addf %128, %129 : vector<8x48xf32>
    %131 = vector.extract_strided_slice %127 {offsets = [0, 0], sizes = [8, 32], strides = [1, 1]} : vector<8x48xf32> to vector<8x32xf32>
    %132 = vector.extract_strided_slice %130 {offsets = [0, 0], sizes = [8, 32], strides = [1, 1]} : vector<8x48xf32> to vector<8x32xf32>
    %133 = arith.addf %131, %132 : vector<8x32xf32>
    %134 = arith.negf %133 : vector<8x32xf32>
    %135 = math.exp %134 : vector<8x32xf32>
    %cst_54 = arith.constant 1.000000e+00 : f32
    %136 = vector.broadcast %cst_54 : f32 to vector<8x32xf32>
    %137 = arith.addf %136, %135 : vector<8x32xf32>
    %138 = arith.divf %136, %137 : vector<8x32xf32>
    %139 = vector.extract_strided_slice %138 {offsets = [0, 0], sizes = [8, 16], strides = [1, 1]} : vector<8x32xf32> to vector<8x16xf32>
    %140 = vector.extract_strided_slice %138 {offsets = [0, 16], sizes = [8, 16], strides = [1, 1]} : vector<8x32xf32> to vector<8x16xf32>
    %141 = vector.extract_strided_slice %127 {offsets = [0, 32], sizes = [8, 16], strides = [1, 1]} : vector<8x48xf32> to vector<8x16xf32>
    %142 = vector.extract_strided_slice %130 {offsets = [0, 32], sizes = [8, 16], strides = [1, 1]} : vector<8x48xf32> to vector<8x16xf32>
    %143 = arith.mulf %139, %142 : vector<8x16xf32>
    %144 = arith.addf %141, %143 : vector<8x16xf32>
    %145 = math.tanh %144 : vector<8x16xf32>
    %cst_55 = arith.constant 1.000000e+00 : f32
    %146 = vector.broadcast %cst_55 : f32 to vector<8x16xf32>
    %147 = arith.subf %146, %140 : vector<8x16xf32>
    %148 = arith.mulf %147, %145 : vector<8x16xf32>
    %149 = arith.mulf %140, %126 : vector<8x16xf32>
    %150 = arith.addf %148, %149 : vector<8x16xf32>
    %151 = vector.extract_strided_slice %116 {offsets = [8, 0], sizes = [8, 48], strides = [1, 1]} : vector<112x48xf32> to vector<8x48xf32>
    %cst_56 = arith.constant dense<0.000000e+00> : vector<8x48xf32>
    %152 = tpu.matmul %150, %122, %cst_56 {dimension_numbers = #tpu.dot_dimension_numbers<[1], [0], [0], [1], [0, 0, 1, 1], [], []>} : vector<8x16xf32>, vector<16x48xf32>, vector<8x48xf32> -> vector<8x48xf32>
    %153 = vector.broadcast %123 : vector<1x48xf32> to vector<8x48xf32>
    %154 = arith.addf %152, %153 : vector<8x48xf32>
    %155 = vector.extract_strided_slice %151 {offsets = [0, 0], sizes = [8, 32], strides = [1, 1]} : vector<8x48xf32> to vector<8x32xf32>
    %156 = vector.extract_strided_slice %154 {offsets = [0, 0], sizes = [8, 32], strides = [1, 1]} : vector<8x48xf32> to vector<8x32xf32>
    %157 = arith.addf %155, %156 : vector<8x32xf32>
    %158 = arith.negf %157 : vector<8x32xf32>
    %159 = math.exp %158 : vector<8x32xf32>
    %cst_57 = arith.constant 1.000000e+00 : f32
    %160 = vector.broadcast %cst_57 : f32 to vector<8x32xf32>
    %161 = arith.addf %160, %159 : vector<8x32xf32>
    %162 = arith.divf %160, %161 : vector<8x32xf32>
    %163 = vector.extract_strided_slice %162 {offsets = [0, 0], sizes = [8, 16], strides = [1, 1]} : vector<8x32xf32> to vector<8x16xf32>
    %164 = vector.extract_strided_slice %162 {offsets = [0, 16], sizes = [8, 16], strides = [1, 1]} : vector<8x32xf32> to vector<8x16xf32>
    %165 = vector.extract_strided_slice %151 {offsets = [0, 32], sizes = [8, 16], strides = [1, 1]} : vector<8x48xf32> to vector<8x16xf32>
    %166 = vector.extract_strided_slice %154 {offsets = [0, 32], sizes = [8, 16], strides = [1, 1]} : vector<8x48xf32> to vector<8x16xf32>
    %167 = arith.mulf %163, %166 : vector<8x16xf32>
    %168 = arith.addf %165, %167 : vector<8x16xf32>
    %169 = math.tanh %168 : vector<8x16xf32>
    %cst_58 = arith.constant 1.000000e+00 : f32
    %170 = vector.broadcast %cst_58 : f32 to vector<8x16xf32>
    %171 = arith.subf %170, %164 : vector<8x16xf32>
    %172 = arith.mulf %171, %169 : vector<8x16xf32>
    %173 = arith.mulf %164, %150 : vector<8x16xf32>
    %174 = arith.addf %172, %173 : vector<8x16xf32>
    %175 = vector.extract_strided_slice %116 {offsets = [16, 0], sizes = [8, 48], strides = [1, 1]} : vector<112x48xf32> to vector<8x48xf32>
    %cst_59 = arith.constant dense<0.000000e+00> : vector<8x48xf32>
    %176 = tpu.matmul %174, %122, %cst_59 {dimension_numbers = #tpu.dot_dimension_numbers<[1], [0], [0], [1], [0, 0, 1, 1], [], []>} : vector<8x16xf32>, vector<16x48xf32>, vector<8x48xf32> -> vector<8x48xf32>
    %177 = vector.broadcast %123 : vector<1x48xf32> to vector<8x48xf32>
    %178 = arith.addf %176, %177 : vector<8x48xf32>
    %179 = vector.extract_strided_slice %175 {offsets = [0, 0], sizes = [8, 32], strides = [1, 1]} : vector<8x48xf32> to vector<8x32xf32>
    %180 = vector.extract_strided_slice %178 {offsets = [0, 0], sizes = [8, 32], strides = [1, 1]} : vector<8x48xf32> to vector<8x32xf32>
    %181 = arith.addf %179, %180 : vector<8x32xf32>
    %182 = arith.negf %181 : vector<8x32xf32>
    %183 = math.exp %182 : vector<8x32xf32>
    %cst_60 = arith.constant 1.000000e+00 : f32
    %184 = vector.broadcast %cst_60 : f32 to vector<8x32xf32>
    %185 = arith.addf %184, %183 : vector<8x32xf32>
    %186 = arith.divf %184, %185 : vector<8x32xf32>
    %187 = vector.extract_strided_slice %186 {offsets = [0, 0], sizes = [8, 16], strides = [1, 1]} : vector<8x32xf32> to vector<8x16xf32>
    %188 = vector.extract_strided_slice %186 {offsets = [0, 16], sizes = [8, 16], strides = [1, 1]} : vector<8x32xf32> to vector<8x16xf32>
    %189 = vector.extract_strided_slice %175 {offsets = [0, 32], sizes = [8, 16], strides = [1, 1]} : vector<8x48xf32> to vector<8x16xf32>
    %190 = vector.extract_strided_slice %178 {offsets = [0, 32], sizes = [8, 16], strides = [1, 1]} : vector<8x48xf32> to vector<8x16xf32>
    %191 = arith.mulf %187, %190 : vector<8x16xf32>
    %192 = arith.addf %189, %191 : vector<8x16xf32>
    %193 = math.tanh %192 : vector<8x16xf32>
    %cst_61 = arith.constant 1.000000e+00 : f32
    %194 = vector.broadcast %cst_61 : f32 to vector<8x16xf32>
    %195 = arith.subf %194, %188 : vector<8x16xf32>
    %196 = arith.mulf %195, %193 : vector<8x16xf32>
    %197 = arith.mulf %188, %174 : vector<8x16xf32>
    %198 = arith.addf %196, %197 : vector<8x16xf32>
    %199 = vector.extract_strided_slice %116 {offsets = [24, 0], sizes = [8, 48], strides = [1, 1]} : vector<112x48xf32> to vector<8x48xf32>
    %cst_62 = arith.constant dense<0.000000e+00> : vector<8x48xf32>
    %200 = tpu.matmul %198, %122, %cst_62 {dimension_numbers = #tpu.dot_dimension_numbers<[1], [0], [0], [1], [0, 0, 1, 1], [], []>} : vector<8x16xf32>, vector<16x48xf32>, vector<8x48xf32> -> vector<8x48xf32>
    %201 = vector.broadcast %123 : vector<1x48xf32> to vector<8x48xf32>
    %202 = arith.addf %200, %201 : vector<8x48xf32>
    %203 = vector.extract_strided_slice %199 {offsets = [0, 0], sizes = [8, 32], strides = [1, 1]} : vector<8x48xf32> to vector<8x32xf32>
    %204 = vector.extract_strided_slice %202 {offsets = [0, 0], sizes = [8, 32], strides = [1, 1]} : vector<8x48xf32> to vector<8x32xf32>
    %205 = arith.addf %203, %204 : vector<8x32xf32>
    %206 = arith.negf %205 : vector<8x32xf32>
    %207 = math.exp %206 : vector<8x32xf32>
    %cst_63 = arith.constant 1.000000e+00 : f32
    %208 = vector.broadcast %cst_63 : f32 to vector<8x32xf32>
    %209 = arith.addf %208, %207 : vector<8x32xf32>
    %210 = arith.divf %208, %209 : vector<8x32xf32>
    %211 = vector.extract_strided_slice %210 {offsets = [0, 0], sizes = [8, 16], strides = [1, 1]} : vector<8x32xf32> to vector<8x16xf32>
    %212 = vector.extract_strided_slice %210 {offsets = [0, 16], sizes = [8, 16], strides = [1, 1]} : vector<8x32xf32> to vector<8x16xf32>
    %213 = vector.extract_strided_slice %199 {offsets = [0, 32], sizes = [8, 16], strides = [1, 1]} : vector<8x48xf32> to vector<8x16xf32>
    %214 = vector.extract_strided_slice %202 {offsets = [0, 32], sizes = [8, 16], strides = [1, 1]} : vector<8x48xf32> to vector<8x16xf32>
    %215 = arith.mulf %211, %214 : vector<8x16xf32>
    %216 = arith.addf %213, %215 : vector<8x16xf32>
    %217 = math.tanh %216 : vector<8x16xf32>
    %cst_64 = arith.constant 1.000000e+00 : f32
    %218 = vector.broadcast %cst_64 : f32 to vector<8x16xf32>
    %219 = arith.subf %218, %212 : vector<8x16xf32>
    %220 = arith.mulf %219, %217 : vector<8x16xf32>
    %221 = arith.mulf %212, %198 : vector<8x16xf32>
    %222 = arith.addf %220, %221 : vector<8x16xf32>
    %223 = vector.extract_strided_slice %116 {offsets = [32, 0], sizes = [8, 48], strides = [1, 1]} : vector<112x48xf32> to vector<8x48xf32>
    %cst_65 = arith.constant dense<0.000000e+00> : vector<8x48xf32>
    %224 = tpu.matmul %222, %122, %cst_65 {dimension_numbers = #tpu.dot_dimension_numbers<[1], [0], [0], [1], [0, 0, 1, 1], [], []>} : vector<8x16xf32>, vector<16x48xf32>, vector<8x48xf32> -> vector<8x48xf32>
    %225 = vector.broadcast %123 : vector<1x48xf32> to vector<8x48xf32>
    %226 = arith.addf %224, %225 : vector<8x48xf32>
    %227 = vector.extract_strided_slice %223 {offsets = [0, 0], sizes = [8, 32], strides = [1, 1]} : vector<8x48xf32> to vector<8x32xf32>
    %228 = vector.extract_strided_slice %226 {offsets = [0, 0], sizes = [8, 32], strides = [1, 1]} : vector<8x48xf32> to vector<8x32xf32>
    %229 = arith.addf %227, %228 : vector<8x32xf32>
    %230 = arith.negf %229 : vector<8x32xf32>
    %231 = math.exp %230 : vector<8x32xf32>
    %cst_66 = arith.constant 1.000000e+00 : f32
    %232 = vector.broadcast %cst_66 : f32 to vector<8x32xf32>
    %233 = arith.addf %232, %231 : vector<8x32xf32>
    %234 = arith.divf %232, %233 : vector<8x32xf32>
    %235 = vector.extract_strided_slice %234 {offsets = [0, 0], sizes = [8, 16], strides = [1, 1]} : vector<8x32xf32> to vector<8x16xf32>
    %236 = vector.extract_strided_slice %234 {offsets = [0, 16], sizes = [8, 16], strides = [1, 1]} : vector<8x32xf32> to vector<8x16xf32>
    %237 = vector.extract_strided_slice %223 {offsets = [0, 32], sizes = [8, 16], strides = [1, 1]} : vector<8x48xf32> to vector<8x16xf32>
    %238 = vector.extract_strided_slice %226 {offsets = [0, 32], sizes = [8, 16], strides = [1, 1]} : vector<8x48xf32> to vector<8x16xf32>
    %239 = arith.mulf %235, %238 : vector<8x16xf32>
    %240 = arith.addf %237, %239 : vector<8x16xf32>
    %241 = math.tanh %240 : vector<8x16xf32>
    %cst_67 = arith.constant 1.000000e+00 : f32
    %242 = vector.broadcast %cst_67 : f32 to vector<8x16xf32>
    %243 = arith.subf %242, %236 : vector<8x16xf32>
    %244 = arith.mulf %243, %241 : vector<8x16xf32>
    %245 = arith.mulf %236, %222 : vector<8x16xf32>
    %246 = arith.addf %244, %245 : vector<8x16xf32>
    %247 = vector.extract_strided_slice %116 {offsets = [40, 0], sizes = [8, 48], strides = [1, 1]} : vector<112x48xf32> to vector<8x48xf32>
    %cst_68 = arith.constant dense<0.000000e+00> : vector<8x48xf32>
    %248 = tpu.matmul %246, %122, %cst_68 {dimension_numbers = #tpu.dot_dimension_numbers<[1], [0], [0], [1], [0, 0, 1, 1], [], []>} : vector<8x16xf32>, vector<16x48xf32>, vector<8x48xf32> -> vector<8x48xf32>
    %249 = vector.broadcast %123 : vector<1x48xf32> to vector<8x48xf32>
    %250 = arith.addf %248, %249 : vector<8x48xf32>
    %251 = vector.extract_strided_slice %247 {offsets = [0, 0], sizes = [8, 32], strides = [1, 1]} : vector<8x48xf32> to vector<8x32xf32>
    %252 = vector.extract_strided_slice %250 {offsets = [0, 0], sizes = [8, 32], strides = [1, 1]} : vector<8x48xf32> to vector<8x32xf32>
    %253 = arith.addf %251, %252 : vector<8x32xf32>
    %254 = arith.negf %253 : vector<8x32xf32>
    %255 = math.exp %254 : vector<8x32xf32>
    %cst_69 = arith.constant 1.000000e+00 : f32
    %256 = vector.broadcast %cst_69 : f32 to vector<8x32xf32>
    %257 = arith.addf %256, %255 : vector<8x32xf32>
    %258 = arith.divf %256, %257 : vector<8x32xf32>
    %259 = vector.extract_strided_slice %258 {offsets = [0, 0], sizes = [8, 16], strides = [1, 1]} : vector<8x32xf32> to vector<8x16xf32>
    %260 = vector.extract_strided_slice %258 {offsets = [0, 16], sizes = [8, 16], strides = [1, 1]} : vector<8x32xf32> to vector<8x16xf32>
    %261 = vector.extract_strided_slice %247 {offsets = [0, 32], sizes = [8, 16], strides = [1, 1]} : vector<8x48xf32> to vector<8x16xf32>
    %262 = vector.extract_strided_slice %250 {offsets = [0, 32], sizes = [8, 16], strides = [1, 1]} : vector<8x48xf32> to vector<8x16xf32>
    %263 = arith.mulf %259, %262 : vector<8x16xf32>
    %264 = arith.addf %261, %263 : vector<8x16xf32>
    %265 = math.tanh %264 : vector<8x16xf32>
    %cst_70 = arith.constant 1.000000e+00 : f32
    %266 = vector.broadcast %cst_70 : f32 to vector<8x16xf32>
    %267 = arith.subf %266, %260 : vector<8x16xf32>
    %268 = arith.mulf %267, %265 : vector<8x16xf32>
    %269 = arith.mulf %260, %246 : vector<8x16xf32>
    %270 = arith.addf %268, %269 : vector<8x16xf32>
    %271 = vector.extract_strided_slice %116 {offsets = [48, 0], sizes = [8, 48], strides = [1, 1]} : vector<112x48xf32> to vector<8x48xf32>
    %cst_71 = arith.constant dense<0.000000e+00> : vector<8x48xf32>
    %272 = tpu.matmul %270, %122, %cst_71 {dimension_numbers = #tpu.dot_dimension_numbers<[1], [0], [0], [1], [0, 0, 1, 1], [], []>} : vector<8x16xf32>, vector<16x48xf32>, vector<8x48xf32> -> vector<8x48xf32>
    %273 = vector.broadcast %123 : vector<1x48xf32> to vector<8x48xf32>
    %274 = arith.addf %272, %273 : vector<8x48xf32>
    %275 = vector.extract_strided_slice %271 {offsets = [0, 0], sizes = [8, 32], strides = [1, 1]} : vector<8x48xf32> to vector<8x32xf32>
    %276 = vector.extract_strided_slice %274 {offsets = [0, 0], sizes = [8, 32], strides = [1, 1]} : vector<8x48xf32> to vector<8x32xf32>
    %277 = arith.addf %275, %276 : vector<8x32xf32>
    %278 = arith.negf %277 : vector<8x32xf32>
    %279 = math.exp %278 : vector<8x32xf32>
    %cst_72 = arith.constant 1.000000e+00 : f32
    %280 = vector.broadcast %cst_72 : f32 to vector<8x32xf32>
    %281 = arith.addf %280, %279 : vector<8x32xf32>
    %282 = arith.divf %280, %281 : vector<8x32xf32>
    %283 = vector.extract_strided_slice %282 {offsets = [0, 0], sizes = [8, 16], strides = [1, 1]} : vector<8x32xf32> to vector<8x16xf32>
    %284 = vector.extract_strided_slice %282 {offsets = [0, 16], sizes = [8, 16], strides = [1, 1]} : vector<8x32xf32> to vector<8x16xf32>
    %285 = vector.extract_strided_slice %271 {offsets = [0, 32], sizes = [8, 16], strides = [1, 1]} : vector<8x48xf32> to vector<8x16xf32>
    %286 = vector.extract_strided_slice %274 {offsets = [0, 32], sizes = [8, 16], strides = [1, 1]} : vector<8x48xf32> to vector<8x16xf32>
    %287 = arith.mulf %283, %286 : vector<8x16xf32>
    %288 = arith.addf %285, %287 : vector<8x16xf32>
    %289 = math.tanh %288 : vector<8x16xf32>
    %cst_73 = arith.constant 1.000000e+00 : f32
    %290 = vector.broadcast %cst_73 : f32 to vector<8x16xf32>
    %291 = arith.subf %290, %284 : vector<8x16xf32>
    %292 = arith.mulf %291, %289 : vector<8x16xf32>
    %293 = arith.mulf %284, %270 : vector<8x16xf32>
    %294 = arith.addf %292, %293 : vector<8x16xf32>
    %295 = vector.extract_strided_slice %116 {offsets = [56, 0], sizes = [8, 48], strides = [1, 1]} : vector<112x48xf32> to vector<8x48xf32>
    %cst_74 = arith.constant dense<0.000000e+00> : vector<8x48xf32>
    %296 = tpu.matmul %294, %122, %cst_74 {dimension_numbers = #tpu.dot_dimension_numbers<[1], [0], [0], [1], [0, 0, 1, 1], [], []>} : vector<8x16xf32>, vector<16x48xf32>, vector<8x48xf32> -> vector<8x48xf32>
    %297 = vector.broadcast %123 : vector<1x48xf32> to vector<8x48xf32>
    %298 = arith.addf %296, %297 : vector<8x48xf32>
    %299 = vector.extract_strided_slice %295 {offsets = [0, 0], sizes = [8, 32], strides = [1, 1]} : vector<8x48xf32> to vector<8x32xf32>
    %300 = vector.extract_strided_slice %298 {offsets = [0, 0], sizes = [8, 32], strides = [1, 1]} : vector<8x48xf32> to vector<8x32xf32>
    %301 = arith.addf %299, %300 : vector<8x32xf32>
    %302 = arith.negf %301 : vector<8x32xf32>
    %303 = math.exp %302 : vector<8x32xf32>
    %cst_75 = arith.constant 1.000000e+00 : f32
    %304 = vector.broadcast %cst_75 : f32 to vector<8x32xf32>
    %305 = arith.addf %304, %303 : vector<8x32xf32>
    %306 = arith.divf %304, %305 : vector<8x32xf32>
    %307 = vector.extract_strided_slice %306 {offsets = [0, 0], sizes = [8, 16], strides = [1, 1]} : vector<8x32xf32> to vector<8x16xf32>
    %308 = vector.extract_strided_slice %306 {offsets = [0, 16], sizes = [8, 16], strides = [1, 1]} : vector<8x32xf32> to vector<8x16xf32>
    %309 = vector.extract_strided_slice %295 {offsets = [0, 32], sizes = [8, 16], strides = [1, 1]} : vector<8x48xf32> to vector<8x16xf32>
    %310 = vector.extract_strided_slice %298 {offsets = [0, 32], sizes = [8, 16], strides = [1, 1]} : vector<8x48xf32> to vector<8x16xf32>
    %311 = arith.mulf %307, %310 : vector<8x16xf32>
    %312 = arith.addf %309, %311 : vector<8x16xf32>
    %313 = math.tanh %312 : vector<8x16xf32>
    %cst_76 = arith.constant 1.000000e+00 : f32
    %314 = vector.broadcast %cst_76 : f32 to vector<8x16xf32>
    %315 = arith.subf %314, %308 : vector<8x16xf32>
    %316 = arith.mulf %315, %313 : vector<8x16xf32>
    %317 = arith.mulf %308, %294 : vector<8x16xf32>
    %318 = arith.addf %316, %317 : vector<8x16xf32>
    %319 = vector.extract_strided_slice %116 {offsets = [64, 0], sizes = [8, 48], strides = [1, 1]} : vector<112x48xf32> to vector<8x48xf32>
    %cst_77 = arith.constant dense<0.000000e+00> : vector<8x48xf32>
    %320 = tpu.matmul %318, %122, %cst_77 {dimension_numbers = #tpu.dot_dimension_numbers<[1], [0], [0], [1], [0, 0, 1, 1], [], []>} : vector<8x16xf32>, vector<16x48xf32>, vector<8x48xf32> -> vector<8x48xf32>
    %321 = vector.broadcast %123 : vector<1x48xf32> to vector<8x48xf32>
    %322 = arith.addf %320, %321 : vector<8x48xf32>
    %323 = vector.extract_strided_slice %319 {offsets = [0, 0], sizes = [8, 32], strides = [1, 1]} : vector<8x48xf32> to vector<8x32xf32>
    %324 = vector.extract_strided_slice %322 {offsets = [0, 0], sizes = [8, 32], strides = [1, 1]} : vector<8x48xf32> to vector<8x32xf32>
    %325 = arith.addf %323, %324 : vector<8x32xf32>
    %326 = arith.negf %325 : vector<8x32xf32>
    %327 = math.exp %326 : vector<8x32xf32>
    %cst_78 = arith.constant 1.000000e+00 : f32
    %328 = vector.broadcast %cst_78 : f32 to vector<8x32xf32>
    %329 = arith.addf %328, %327 : vector<8x32xf32>
    %330 = arith.divf %328, %329 : vector<8x32xf32>
    %331 = vector.extract_strided_slice %330 {offsets = [0, 0], sizes = [8, 16], strides = [1, 1]} : vector<8x32xf32> to vector<8x16xf32>
    %332 = vector.extract_strided_slice %330 {offsets = [0, 16], sizes = [8, 16], strides = [1, 1]} : vector<8x32xf32> to vector<8x16xf32>
    %333 = vector.extract_strided_slice %319 {offsets = [0, 32], sizes = [8, 16], strides = [1, 1]} : vector<8x48xf32> to vector<8x16xf32>
    %334 = vector.extract_strided_slice %322 {offsets = [0, 32], sizes = [8, 16], strides = [1, 1]} : vector<8x48xf32> to vector<8x16xf32>
    %335 = arith.mulf %331, %334 : vector<8x16xf32>
    %336 = arith.addf %333, %335 : vector<8x16xf32>
    %337 = math.tanh %336 : vector<8x16xf32>
    %cst_79 = arith.constant 1.000000e+00 : f32
    %338 = vector.broadcast %cst_79 : f32 to vector<8x16xf32>
    %339 = arith.subf %338, %332 : vector<8x16xf32>
    %340 = arith.mulf %339, %337 : vector<8x16xf32>
    %341 = arith.mulf %332, %318 : vector<8x16xf32>
    %342 = arith.addf %340, %341 : vector<8x16xf32>
    %343 = vector.extract_strided_slice %116 {offsets = [72, 0], sizes = [8, 48], strides = [1, 1]} : vector<112x48xf32> to vector<8x48xf32>
    %cst_80 = arith.constant dense<0.000000e+00> : vector<8x48xf32>
    %344 = tpu.matmul %342, %122, %cst_80 {dimension_numbers = #tpu.dot_dimension_numbers<[1], [0], [0], [1], [0, 0, 1, 1], [], []>} : vector<8x16xf32>, vector<16x48xf32>, vector<8x48xf32> -> vector<8x48xf32>
    %345 = vector.broadcast %123 : vector<1x48xf32> to vector<8x48xf32>
    %346 = arith.addf %344, %345 : vector<8x48xf32>
    %347 = vector.extract_strided_slice %343 {offsets = [0, 0], sizes = [8, 32], strides = [1, 1]} : vector<8x48xf32> to vector<8x32xf32>
    %348 = vector.extract_strided_slice %346 {offsets = [0, 0], sizes = [8, 32], strides = [1, 1]} : vector<8x48xf32> to vector<8x32xf32>
    %349 = arith.addf %347, %348 : vector<8x32xf32>
    %350 = arith.negf %349 : vector<8x32xf32>
    %351 = math.exp %350 : vector<8x32xf32>
    %cst_81 = arith.constant 1.000000e+00 : f32
    %352 = vector.broadcast %cst_81 : f32 to vector<8x32xf32>
    %353 = arith.addf %352, %351 : vector<8x32xf32>
    %354 = arith.divf %352, %353 : vector<8x32xf32>
    %355 = vector.extract_strided_slice %354 {offsets = [0, 0], sizes = [8, 16], strides = [1, 1]} : vector<8x32xf32> to vector<8x16xf32>
    %356 = vector.extract_strided_slice %354 {offsets = [0, 16], sizes = [8, 16], strides = [1, 1]} : vector<8x32xf32> to vector<8x16xf32>
    %357 = vector.extract_strided_slice %343 {offsets = [0, 32], sizes = [8, 16], strides = [1, 1]} : vector<8x48xf32> to vector<8x16xf32>
    %358 = vector.extract_strided_slice %346 {offsets = [0, 32], sizes = [8, 16], strides = [1, 1]} : vector<8x48xf32> to vector<8x16xf32>
    %359 = arith.mulf %355, %358 : vector<8x16xf32>
    %360 = arith.addf %357, %359 : vector<8x16xf32>
    %361 = math.tanh %360 : vector<8x16xf32>
    %cst_82 = arith.constant 1.000000e+00 : f32
    %362 = vector.broadcast %cst_82 : f32 to vector<8x16xf32>
    %363 = arith.subf %362, %356 : vector<8x16xf32>
    %364 = arith.mulf %363, %361 : vector<8x16xf32>
    %365 = arith.mulf %356, %342 : vector<8x16xf32>
    %366 = arith.addf %364, %365 : vector<8x16xf32>
    %367 = vector.extract_strided_slice %116 {offsets = [80, 0], sizes = [8, 48], strides = [1, 1]} : vector<112x48xf32> to vector<8x48xf32>
    %cst_83 = arith.constant dense<0.000000e+00> : vector<8x48xf32>
    %368 = tpu.matmul %366, %122, %cst_83 {dimension_numbers = #tpu.dot_dimension_numbers<[1], [0], [0], [1], [0, 0, 1, 1], [], []>} : vector<8x16xf32>, vector<16x48xf32>, vector<8x48xf32> -> vector<8x48xf32>
    %369 = vector.broadcast %123 : vector<1x48xf32> to vector<8x48xf32>
    %370 = arith.addf %368, %369 : vector<8x48xf32>
    %371 = vector.extract_strided_slice %367 {offsets = [0, 0], sizes = [8, 32], strides = [1, 1]} : vector<8x48xf32> to vector<8x32xf32>
    %372 = vector.extract_strided_slice %370 {offsets = [0, 0], sizes = [8, 32], strides = [1, 1]} : vector<8x48xf32> to vector<8x32xf32>
    %373 = arith.addf %371, %372 : vector<8x32xf32>
    %374 = arith.negf %373 : vector<8x32xf32>
    %375 = math.exp %374 : vector<8x32xf32>
    %cst_84 = arith.constant 1.000000e+00 : f32
    %376 = vector.broadcast %cst_84 : f32 to vector<8x32xf32>
    %377 = arith.addf %376, %375 : vector<8x32xf32>
    %378 = arith.divf %376, %377 : vector<8x32xf32>
    %379 = vector.extract_strided_slice %378 {offsets = [0, 0], sizes = [8, 16], strides = [1, 1]} : vector<8x32xf32> to vector<8x16xf32>
    %380 = vector.extract_strided_slice %378 {offsets = [0, 16], sizes = [8, 16], strides = [1, 1]} : vector<8x32xf32> to vector<8x16xf32>
    %381 = vector.extract_strided_slice %367 {offsets = [0, 32], sizes = [8, 16], strides = [1, 1]} : vector<8x48xf32> to vector<8x16xf32>
    %382 = vector.extract_strided_slice %370 {offsets = [0, 32], sizes = [8, 16], strides = [1, 1]} : vector<8x48xf32> to vector<8x16xf32>
    %383 = arith.mulf %379, %382 : vector<8x16xf32>
    %384 = arith.addf %381, %383 : vector<8x16xf32>
    %385 = math.tanh %384 : vector<8x16xf32>
    %cst_85 = arith.constant 1.000000e+00 : f32
    %386 = vector.broadcast %cst_85 : f32 to vector<8x16xf32>
    %387 = arith.subf %386, %380 : vector<8x16xf32>
    %388 = arith.mulf %387, %385 : vector<8x16xf32>
    %389 = arith.mulf %380, %366 : vector<8x16xf32>
    %390 = arith.addf %388, %389 : vector<8x16xf32>
    %391 = vector.extract_strided_slice %116 {offsets = [88, 0], sizes = [8, 48], strides = [1, 1]} : vector<112x48xf32> to vector<8x48xf32>
    %cst_86 = arith.constant dense<0.000000e+00> : vector<8x48xf32>
    %392 = tpu.matmul %390, %122, %cst_86 {dimension_numbers = #tpu.dot_dimension_numbers<[1], [0], [0], [1], [0, 0, 1, 1], [], []>} : vector<8x16xf32>, vector<16x48xf32>, vector<8x48xf32> -> vector<8x48xf32>
    %393 = vector.broadcast %123 : vector<1x48xf32> to vector<8x48xf32>
    %394 = arith.addf %392, %393 : vector<8x48xf32>
    %395 = vector.extract_strided_slice %391 {offsets = [0, 0], sizes = [8, 32], strides = [1, 1]} : vector<8x48xf32> to vector<8x32xf32>
    %396 = vector.extract_strided_slice %394 {offsets = [0, 0], sizes = [8, 32], strides = [1, 1]} : vector<8x48xf32> to vector<8x32xf32>
    %397 = arith.addf %395, %396 : vector<8x32xf32>
    %398 = arith.negf %397 : vector<8x32xf32>
    %399 = math.exp %398 : vector<8x32xf32>
    %cst_87 = arith.constant 1.000000e+00 : f32
    %400 = vector.broadcast %cst_87 : f32 to vector<8x32xf32>
    %401 = arith.addf %400, %399 : vector<8x32xf32>
    %402 = arith.divf %400, %401 : vector<8x32xf32>
    %403 = vector.extract_strided_slice %402 {offsets = [0, 0], sizes = [8, 16], strides = [1, 1]} : vector<8x32xf32> to vector<8x16xf32>
    %404 = vector.extract_strided_slice %402 {offsets = [0, 16], sizes = [8, 16], strides = [1, 1]} : vector<8x32xf32> to vector<8x16xf32>
    %405 = vector.extract_strided_slice %391 {offsets = [0, 32], sizes = [8, 16], strides = [1, 1]} : vector<8x48xf32> to vector<8x16xf32>
    %406 = vector.extract_strided_slice %394 {offsets = [0, 32], sizes = [8, 16], strides = [1, 1]} : vector<8x48xf32> to vector<8x16xf32>
    %407 = arith.mulf %403, %406 : vector<8x16xf32>
    %408 = arith.addf %405, %407 : vector<8x16xf32>
    %409 = math.tanh %408 : vector<8x16xf32>
    %cst_88 = arith.constant 1.000000e+00 : f32
    %410 = vector.broadcast %cst_88 : f32 to vector<8x16xf32>
    %411 = arith.subf %410, %404 : vector<8x16xf32>
    %412 = arith.mulf %411, %409 : vector<8x16xf32>
    %413 = arith.mulf %404, %390 : vector<8x16xf32>
    %414 = arith.addf %412, %413 : vector<8x16xf32>
    %415 = vector.extract_strided_slice %116 {offsets = [96, 0], sizes = [8, 48], strides = [1, 1]} : vector<112x48xf32> to vector<8x48xf32>
    %cst_89 = arith.constant dense<0.000000e+00> : vector<8x48xf32>
    %416 = tpu.matmul %414, %122, %cst_89 {dimension_numbers = #tpu.dot_dimension_numbers<[1], [0], [0], [1], [0, 0, 1, 1], [], []>} : vector<8x16xf32>, vector<16x48xf32>, vector<8x48xf32> -> vector<8x48xf32>
    %417 = vector.broadcast %123 : vector<1x48xf32> to vector<8x48xf32>
    %418 = arith.addf %416, %417 : vector<8x48xf32>
    %419 = vector.extract_strided_slice %415 {offsets = [0, 0], sizes = [8, 32], strides = [1, 1]} : vector<8x48xf32> to vector<8x32xf32>
    %420 = vector.extract_strided_slice %418 {offsets = [0, 0], sizes = [8, 32], strides = [1, 1]} : vector<8x48xf32> to vector<8x32xf32>
    %421 = arith.addf %419, %420 : vector<8x32xf32>
    %422 = arith.negf %421 : vector<8x32xf32>
    %423 = math.exp %422 : vector<8x32xf32>
    %cst_90 = arith.constant 1.000000e+00 : f32
    %424 = vector.broadcast %cst_90 : f32 to vector<8x32xf32>
    %425 = arith.addf %424, %423 : vector<8x32xf32>
    %426 = arith.divf %424, %425 : vector<8x32xf32>
    %427 = vector.extract_strided_slice %426 {offsets = [0, 0], sizes = [8, 16], strides = [1, 1]} : vector<8x32xf32> to vector<8x16xf32>
    %428 = vector.extract_strided_slice %426 {offsets = [0, 16], sizes = [8, 16], strides = [1, 1]} : vector<8x32xf32> to vector<8x16xf32>
    %429 = vector.extract_strided_slice %415 {offsets = [0, 32], sizes = [8, 16], strides = [1, 1]} : vector<8x48xf32> to vector<8x16xf32>
    %430 = vector.extract_strided_slice %418 {offsets = [0, 32], sizes = [8, 16], strides = [1, 1]} : vector<8x48xf32> to vector<8x16xf32>
    %431 = arith.mulf %427, %430 : vector<8x16xf32>
    %432 = arith.addf %429, %431 : vector<8x16xf32>
    %433 = math.tanh %432 : vector<8x16xf32>
    %cst_91 = arith.constant 1.000000e+00 : f32
    %434 = vector.broadcast %cst_91 : f32 to vector<8x16xf32>
    %435 = arith.subf %434, %428 : vector<8x16xf32>
    %436 = arith.mulf %435, %433 : vector<8x16xf32>
    %437 = arith.mulf %428, %414 : vector<8x16xf32>
    %438 = arith.addf %436, %437 : vector<8x16xf32>
    %439 = vector.extract_strided_slice %116 {offsets = [104, 0], sizes = [8, 48], strides = [1, 1]} : vector<112x48xf32> to vector<8x48xf32>
    %cst_92 = arith.constant dense<0.000000e+00> : vector<8x48xf32>
    %440 = tpu.matmul %438, %122, %cst_92 {dimension_numbers = #tpu.dot_dimension_numbers<[1], [0], [0], [1], [0, 0, 1, 1], [], []>} : vector<8x16xf32>, vector<16x48xf32>, vector<8x48xf32> -> vector<8x48xf32>
    %441 = vector.broadcast %123 : vector<1x48xf32> to vector<8x48xf32>
    %442 = arith.addf %440, %441 : vector<8x48xf32>
    %443 = vector.extract_strided_slice %439 {offsets = [0, 0], sizes = [8, 32], strides = [1, 1]} : vector<8x48xf32> to vector<8x32xf32>
    %444 = vector.extract_strided_slice %442 {offsets = [0, 0], sizes = [8, 32], strides = [1, 1]} : vector<8x48xf32> to vector<8x32xf32>
    %445 = arith.addf %443, %444 : vector<8x32xf32>
    %446 = arith.negf %445 : vector<8x32xf32>
    %447 = math.exp %446 : vector<8x32xf32>
    %cst_93 = arith.constant 1.000000e+00 : f32
    %448 = vector.broadcast %cst_93 : f32 to vector<8x32xf32>
    %449 = arith.addf %448, %447 : vector<8x32xf32>
    %450 = arith.divf %448, %449 : vector<8x32xf32>
    %451 = vector.extract_strided_slice %450 {offsets = [0, 0], sizes = [8, 16], strides = [1, 1]} : vector<8x32xf32> to vector<8x16xf32>
    %452 = vector.extract_strided_slice %450 {offsets = [0, 16], sizes = [8, 16], strides = [1, 1]} : vector<8x32xf32> to vector<8x16xf32>
    %453 = vector.extract_strided_slice %439 {offsets = [0, 32], sizes = [8, 16], strides = [1, 1]} : vector<8x48xf32> to vector<8x16xf32>
    %454 = vector.extract_strided_slice %442 {offsets = [0, 32], sizes = [8, 16], strides = [1, 1]} : vector<8x48xf32> to vector<8x16xf32>
    %455 = arith.mulf %451, %454 : vector<8x16xf32>
    %456 = arith.addf %453, %455 : vector<8x16xf32>
    %457 = math.tanh %456 : vector<8x16xf32>
    %cst_94 = arith.constant 1.000000e+00 : f32
    %458 = vector.broadcast %cst_94 : f32 to vector<8x16xf32>
    %459 = arith.subf %458, %452 : vector<8x16xf32>
    %460 = arith.mulf %459, %457 : vector<8x16xf32>
    %461 = arith.mulf %452, %438 : vector<8x16xf32>
    %462 = arith.addf %460, %461 : vector<8x16xf32>
    %cst_95 = arith.constant 0.000000e+00 : f32
    %463 = vector.broadcast %cst_95 : f32 to vector<16x8xf32>
    %464 = vector.extract_strided_slice %121 {offsets = [16, 0], sizes = [16, 24], strides = [1, 1]} : vector<112x24xf32> to vector<16x24xf32>
    %cst_96 = arith.constant dense<0.000000e+00> : vector<16x24xf32>
    %465 = tpu.matmul %463, %124, %cst_96 {dimension_numbers = #tpu.dot_dimension_numbers<[1], [0], [0], [1], [0, 0, 1, 1], [], []>} : vector<16x8xf32>, vector<8x24xf32>, vector<16x24xf32> -> vector<16x24xf32>
    %466 = vector.broadcast %125 : vector<1x24xf32> to vector<16x24xf32>
    %467 = arith.addf %465, %466 : vector<16x24xf32>
    %468 = vector.extract_strided_slice %464 {offsets = [0, 0], sizes = [16, 16], strides = [1, 1]} : vector<16x24xf32> to vector<16x16xf32>
    %469 = vector.extract_strided_slice %467 {offsets = [0, 0], sizes = [16, 16], strides = [1, 1]} : vector<16x24xf32> to vector<16x16xf32>
    %470 = arith.addf %468, %469 : vector<16x16xf32>
    %471 = arith.negf %470 : vector<16x16xf32>
    %472 = math.exp %471 : vector<16x16xf32>
    %cst_97 = arith.constant 1.000000e+00 : f32
    %473 = vector.broadcast %cst_97 : f32 to vector<16x16xf32>
    %474 = arith.addf %473, %472 : vector<16x16xf32>
    %475 = arith.divf %473, %474 : vector<16x16xf32>
    %476 = vector.extract_strided_slice %475 {offsets = [0, 0], sizes = [16, 8], strides = [1, 1]} : vector<16x16xf32> to vector<16x8xf32>
    %477 = vector.extract_strided_slice %475 {offsets = [0, 8], sizes = [16, 8], strides = [1, 1]} : vector<16x16xf32> to vector<16x8xf32>
    %478 = vector.extract_strided_slice %464 {offsets = [0, 16], sizes = [16, 8], strides = [1, 1]} : vector<16x24xf32> to vector<16x8xf32>
    %479 = vector.extract_strided_slice %467 {offsets = [0, 16], sizes = [16, 8], strides = [1, 1]} : vector<16x24xf32> to vector<16x8xf32>
    %480 = arith.mulf %476, %479 : vector<16x8xf32>
    %481 = arith.addf %478, %480 : vector<16x8xf32>
    %482 = math.tanh %481 : vector<16x8xf32>
    %cst_98 = arith.constant 1.000000e+00 : f32
    %483 = vector.broadcast %cst_98 : f32 to vector<16x8xf32>
    %484 = arith.subf %483, %477 : vector<16x8xf32>
    %485 = arith.mulf %484, %482 : vector<16x8xf32>
    %486 = arith.mulf %477, %463 : vector<16x8xf32>
    %487 = arith.addf %485, %486 : vector<16x8xf32>
    %488 = vector.extract_strided_slice %121 {offsets = [32, 0], sizes = [16, 24], strides = [1, 1]} : vector<112x24xf32> to vector<16x24xf32>
    %cst_99 = arith.constant dense<0.000000e+00> : vector<16x24xf32>
    %489 = tpu.matmul %487, %124, %cst_99 {dimension_numbers = #tpu.dot_dimension_numbers<[1], [0], [0], [1], [0, 0, 1, 1], [], []>} : vector<16x8xf32>, vector<8x24xf32>, vector<16x24xf32> -> vector<16x24xf32>
    %490 = vector.broadcast %125 : vector<1x24xf32> to vector<16x24xf32>
    %491 = arith.addf %489, %490 : vector<16x24xf32>
    %492 = vector.extract_strided_slice %488 {offsets = [0, 0], sizes = [16, 16], strides = [1, 1]} : vector<16x24xf32> to vector<16x16xf32>
    %493 = vector.extract_strided_slice %491 {offsets = [0, 0], sizes = [16, 16], strides = [1, 1]} : vector<16x24xf32> to vector<16x16xf32>
    %494 = arith.addf %492, %493 : vector<16x16xf32>
    %495 = arith.negf %494 : vector<16x16xf32>
    %496 = math.exp %495 : vector<16x16xf32>
    %cst_100 = arith.constant 1.000000e+00 : f32
    %497 = vector.broadcast %cst_100 : f32 to vector<16x16xf32>
    %498 = arith.addf %497, %496 : vector<16x16xf32>
    %499 = arith.divf %497, %498 : vector<16x16xf32>
    %500 = vector.extract_strided_slice %499 {offsets = [0, 0], sizes = [16, 8], strides = [1, 1]} : vector<16x16xf32> to vector<16x8xf32>
    %501 = vector.extract_strided_slice %499 {offsets = [0, 8], sizes = [16, 8], strides = [1, 1]} : vector<16x16xf32> to vector<16x8xf32>
    %502 = vector.extract_strided_slice %488 {offsets = [0, 16], sizes = [16, 8], strides = [1, 1]} : vector<16x24xf32> to vector<16x8xf32>
    %503 = vector.extract_strided_slice %491 {offsets = [0, 16], sizes = [16, 8], strides = [1, 1]} : vector<16x24xf32> to vector<16x8xf32>
    %504 = arith.mulf %500, %503 : vector<16x8xf32>
    %505 = arith.addf %502, %504 : vector<16x8xf32>
    %506 = math.tanh %505 : vector<16x8xf32>
    %cst_101 = arith.constant 1.000000e+00 : f32
    %507 = vector.broadcast %cst_101 : f32 to vector<16x8xf32>
    %508 = arith.subf %507, %501 : vector<16x8xf32>
    %509 = arith.mulf %508, %506 : vector<16x8xf32>
    %510 = arith.mulf %501, %487 : vector<16x8xf32>
    %511 = arith.addf %509, %510 : vector<16x8xf32>
    %512 = vector.extract_strided_slice %121 {offsets = [48, 0], sizes = [16, 24], strides = [1, 1]} : vector<112x24xf32> to vector<16x24xf32>
    %cst_102 = arith.constant dense<0.000000e+00> : vector<16x24xf32>
    %513 = tpu.matmul %511, %124, %cst_102 {dimension_numbers = #tpu.dot_dimension_numbers<[1], [0], [0], [1], [0, 0, 1, 1], [], []>} : vector<16x8xf32>, vector<8x24xf32>, vector<16x24xf32> -> vector<16x24xf32>
    %514 = vector.broadcast %125 : vector<1x24xf32> to vector<16x24xf32>
    %515 = arith.addf %513, %514 : vector<16x24xf32>
    %516 = vector.extract_strided_slice %512 {offsets = [0, 0], sizes = [16, 16], strides = [1, 1]} : vector<16x24xf32> to vector<16x16xf32>
    %517 = vector.extract_strided_slice %515 {offsets = [0, 0], sizes = [16, 16], strides = [1, 1]} : vector<16x24xf32> to vector<16x16xf32>
    %518 = arith.addf %516, %517 : vector<16x16xf32>
    %519 = arith.negf %518 : vector<16x16xf32>
    %520 = math.exp %519 : vector<16x16xf32>
    %cst_103 = arith.constant 1.000000e+00 : f32
    %521 = vector.broadcast %cst_103 : f32 to vector<16x16xf32>
    %522 = arith.addf %521, %520 : vector<16x16xf32>
    %523 = arith.divf %521, %522 : vector<16x16xf32>
    %524 = vector.extract_strided_slice %523 {offsets = [0, 0], sizes = [16, 8], strides = [1, 1]} : vector<16x16xf32> to vector<16x8xf32>
    %525 = vector.extract_strided_slice %523 {offsets = [0, 8], sizes = [16, 8], strides = [1, 1]} : vector<16x16xf32> to vector<16x8xf32>
    %526 = vector.extract_strided_slice %512 {offsets = [0, 16], sizes = [16, 8], strides = [1, 1]} : vector<16x24xf32> to vector<16x8xf32>
    %527 = vector.extract_strided_slice %515 {offsets = [0, 16], sizes = [16, 8], strides = [1, 1]} : vector<16x24xf32> to vector<16x8xf32>
    %528 = arith.mulf %524, %527 : vector<16x8xf32>
    %529 = arith.addf %526, %528 : vector<16x8xf32>
    %530 = math.tanh %529 : vector<16x8xf32>
    %cst_104 = arith.constant 1.000000e+00 : f32
    %531 = vector.broadcast %cst_104 : f32 to vector<16x8xf32>
    %532 = arith.subf %531, %525 : vector<16x8xf32>
    %533 = arith.mulf %532, %530 : vector<16x8xf32>
    %534 = arith.mulf %525, %511 : vector<16x8xf32>
    %535 = arith.addf %533, %534 : vector<16x8xf32>
    %536 = vector.extract_strided_slice %121 {offsets = [64, 0], sizes = [16, 24], strides = [1, 1]} : vector<112x24xf32> to vector<16x24xf32>
    %cst_105 = arith.constant dense<0.000000e+00> : vector<16x24xf32>
    %537 = tpu.matmul %535, %124, %cst_105 {dimension_numbers = #tpu.dot_dimension_numbers<[1], [0], [0], [1], [0, 0, 1, 1], [], []>} : vector<16x8xf32>, vector<8x24xf32>, vector<16x24xf32> -> vector<16x24xf32>
    %538 = vector.broadcast %125 : vector<1x24xf32> to vector<16x24xf32>
    %539 = arith.addf %537, %538 : vector<16x24xf32>
    %540 = vector.extract_strided_slice %536 {offsets = [0, 0], sizes = [16, 16], strides = [1, 1]} : vector<16x24xf32> to vector<16x16xf32>
    %541 = vector.extract_strided_slice %539 {offsets = [0, 0], sizes = [16, 16], strides = [1, 1]} : vector<16x24xf32> to vector<16x16xf32>
    %542 = arith.addf %540, %541 : vector<16x16xf32>
    %543 = arith.negf %542 : vector<16x16xf32>
    %544 = math.exp %543 : vector<16x16xf32>
    %cst_106 = arith.constant 1.000000e+00 : f32
    %545 = vector.broadcast %cst_106 : f32 to vector<16x16xf32>
    %546 = arith.addf %545, %544 : vector<16x16xf32>
    %547 = arith.divf %545, %546 : vector<16x16xf32>
    %548 = vector.extract_strided_slice %547 {offsets = [0, 0], sizes = [16, 8], strides = [1, 1]} : vector<16x16xf32> to vector<16x8xf32>
    %549 = vector.extract_strided_slice %547 {offsets = [0, 8], sizes = [16, 8], strides = [1, 1]} : vector<16x16xf32> to vector<16x8xf32>
    %550 = vector.extract_strided_slice %536 {offsets = [0, 16], sizes = [16, 8], strides = [1, 1]} : vector<16x24xf32> to vector<16x8xf32>
    %551 = vector.extract_strided_slice %539 {offsets = [0, 16], sizes = [16, 8], strides = [1, 1]} : vector<16x24xf32> to vector<16x8xf32>
    %552 = arith.mulf %548, %551 : vector<16x8xf32>
    %553 = arith.addf %550, %552 : vector<16x8xf32>
    %554 = math.tanh %553 : vector<16x8xf32>
    %cst_107 = arith.constant 1.000000e+00 : f32
    %555 = vector.broadcast %cst_107 : f32 to vector<16x8xf32>
    %556 = arith.subf %555, %549 : vector<16x8xf32>
    %557 = arith.mulf %556, %554 : vector<16x8xf32>
    %558 = arith.mulf %549, %535 : vector<16x8xf32>
    %559 = arith.addf %557, %558 : vector<16x8xf32>
    %560 = vector.extract_strided_slice %121 {offsets = [80, 0], sizes = [16, 24], strides = [1, 1]} : vector<112x24xf32> to vector<16x24xf32>
    %cst_108 = arith.constant dense<0.000000e+00> : vector<16x24xf32>
    %561 = tpu.matmul %559, %124, %cst_108 {dimension_numbers = #tpu.dot_dimension_numbers<[1], [0], [0], [1], [0, 0, 1, 1], [], []>} : vector<16x8xf32>, vector<8x24xf32>, vector<16x24xf32> -> vector<16x24xf32>
    %562 = vector.broadcast %125 : vector<1x24xf32> to vector<16x24xf32>
    %563 = arith.addf %561, %562 : vector<16x24xf32>
    %564 = vector.extract_strided_slice %560 {offsets = [0, 0], sizes = [16, 16], strides = [1, 1]} : vector<16x24xf32> to vector<16x16xf32>
    %565 = vector.extract_strided_slice %563 {offsets = [0, 0], sizes = [16, 16], strides = [1, 1]} : vector<16x24xf32> to vector<16x16xf32>
    %566 = arith.addf %564, %565 : vector<16x16xf32>
    %567 = arith.negf %566 : vector<16x16xf32>
    %568 = math.exp %567 : vector<16x16xf32>
    %cst_109 = arith.constant 1.000000e+00 : f32
    %569 = vector.broadcast %cst_109 : f32 to vector<16x16xf32>
    %570 = arith.addf %569, %568 : vector<16x16xf32>
    %571 = arith.divf %569, %570 : vector<16x16xf32>
    %572 = vector.extract_strided_slice %571 {offsets = [0, 0], sizes = [16, 8], strides = [1, 1]} : vector<16x16xf32> to vector<16x8xf32>
    %573 = vector.extract_strided_slice %571 {offsets = [0, 8], sizes = [16, 8], strides = [1, 1]} : vector<16x16xf32> to vector<16x8xf32>
    %574 = vector.extract_strided_slice %560 {offsets = [0, 16], sizes = [16, 8], strides = [1, 1]} : vector<16x24xf32> to vector<16x8xf32>
    %575 = vector.extract_strided_slice %563 {offsets = [0, 16], sizes = [16, 8], strides = [1, 1]} : vector<16x24xf32> to vector<16x8xf32>
    %576 = arith.mulf %572, %575 : vector<16x8xf32>
    %577 = arith.addf %574, %576 : vector<16x8xf32>
    %578 = math.tanh %577 : vector<16x8xf32>
    %cst_110 = arith.constant 1.000000e+00 : f32
    %579 = vector.broadcast %cst_110 : f32 to vector<16x8xf32>
    %580 = arith.subf %579, %573 : vector<16x8xf32>
    %581 = arith.mulf %580, %578 : vector<16x8xf32>
    %582 = arith.mulf %573, %559 : vector<16x8xf32>
    %583 = arith.addf %581, %582 : vector<16x8xf32>
    %584 = vector.extract_strided_slice %121 {offsets = [96, 0], sizes = [16, 24], strides = [1, 1]} : vector<112x24xf32> to vector<16x24xf32>
    %cst_111 = arith.constant dense<0.000000e+00> : vector<16x24xf32>
    %585 = tpu.matmul %583, %124, %cst_111 {dimension_numbers = #tpu.dot_dimension_numbers<[1], [0], [0], [1], [0, 0, 1, 1], [], []>} : vector<16x8xf32>, vector<8x24xf32>, vector<16x24xf32> -> vector<16x24xf32>
    %586 = vector.broadcast %125 : vector<1x24xf32> to vector<16x24xf32>
    %587 = arith.addf %585, %586 : vector<16x24xf32>
    %588 = vector.extract_strided_slice %584 {offsets = [0, 0], sizes = [16, 16], strides = [1, 1]} : vector<16x24xf32> to vector<16x16xf32>
    %589 = vector.extract_strided_slice %587 {offsets = [0, 0], sizes = [16, 16], strides = [1, 1]} : vector<16x24xf32> to vector<16x16xf32>
    %590 = arith.addf %588, %589 : vector<16x16xf32>
    %591 = arith.negf %590 : vector<16x16xf32>
    %592 = math.exp %591 : vector<16x16xf32>
    %cst_112 = arith.constant 1.000000e+00 : f32
    %593 = vector.broadcast %cst_112 : f32 to vector<16x16xf32>
    %594 = arith.addf %593, %592 : vector<16x16xf32>
    %595 = arith.divf %593, %594 : vector<16x16xf32>
    %596 = vector.extract_strided_slice %595 {offsets = [0, 0], sizes = [16, 8], strides = [1, 1]} : vector<16x16xf32> to vector<16x8xf32>
    %597 = vector.extract_strided_slice %595 {offsets = [0, 8], sizes = [16, 8], strides = [1, 1]} : vector<16x16xf32> to vector<16x8xf32>
    %598 = vector.extract_strided_slice %584 {offsets = [0, 16], sizes = [16, 8], strides = [1, 1]} : vector<16x24xf32> to vector<16x8xf32>
    %599 = vector.extract_strided_slice %587 {offsets = [0, 16], sizes = [16, 8], strides = [1, 1]} : vector<16x24xf32> to vector<16x8xf32>
    %600 = arith.mulf %596, %599 : vector<16x8xf32>
    %601 = arith.addf %598, %600 : vector<16x8xf32>
    %602 = math.tanh %601 : vector<16x8xf32>
    %cst_113 = arith.constant 1.000000e+00 : f32
    %603 = vector.broadcast %cst_113 : f32 to vector<16x8xf32>
    %604 = arith.subf %603, %597 : vector<16x8xf32>
    %605 = arith.mulf %604, %602 : vector<16x8xf32>
    %606 = arith.mulf %597, %583 : vector<16x8xf32>
    %607 = arith.addf %605, %606 : vector<16x8xf32>
    %cst_114 = arith.constant 0.000000e+00 : f32
    %608 = vector.broadcast %cst_114 : f32 to vector<8x8xf32>
    %609 = vector.extract_strided_slice %90 {offsets = [96, 0], sizes = [8, 8], strides = [1, 1]} : vector<128x8xf32> to vector<8x8xf32>
    %c0_115 = arith.constant 0 : index
    %c0_116 = arith.constant 0 : index
    %610 = memref.load %arg13[%c0_115, %c0_116] : memref<1x4xf32, #tpu.memory_space<smem>>
    %611 = vector.broadcast %610 : f32 to vector<8x8xf32>
    %612 = arith.mulf %609, %611 : vector<8x8xf32>
    %613 = arith.addf %608, %612 : vector<8x8xf32>
    %614 = vector.extract_strided_slice %90 {offsets = [104, 0], sizes = [8, 8], strides = [1, 1]} : vector<128x8xf32> to vector<8x8xf32>
    %c0_117 = arith.constant 0 : index
    %c1_118 = arith.constant 1 : index
    %615 = memref.load %arg13[%c0_117, %c1_118] : memref<1x4xf32, #tpu.memory_space<smem>>
    %616 = vector.broadcast %615 : f32 to vector<8x8xf32>
    %617 = arith.mulf %614, %616 : vector<8x8xf32>
    %618 = arith.addf %613, %617 : vector<8x8xf32>
    %619 = vector.extract_strided_slice %90 {offsets = [112, 0], sizes = [8, 8], strides = [1, 1]} : vector<128x8xf32> to vector<8x8xf32>
    %c0_119 = arith.constant 0 : index
    %c2_120 = arith.constant 2 : index
    %620 = memref.load %arg13[%c0_119, %c2_120] : memref<1x4xf32, #tpu.memory_space<smem>>
    %621 = vector.broadcast %620 : f32 to vector<8x8xf32>
    %622 = arith.mulf %619, %621 : vector<8x8xf32>
    %623 = arith.addf %618, %622 : vector<8x8xf32>
    %624 = vector.extract_strided_slice %90 {offsets = [120, 0], sizes = [8, 8], strides = [1, 1]} : vector<128x8xf32> to vector<8x8xf32>
    %c0_121 = arith.constant 0 : index
    %c3 = arith.constant 3 : index
    %625 = memref.load %arg13[%c0_121, %c3] : memref<1x4xf32, #tpu.memory_space<smem>>
    %626 = vector.broadcast %625 : f32 to vector<8x8xf32>
    %627 = arith.mulf %624, %626 : vector<8x8xf32>
    %628 = arith.addf %623, %627 : vector<8x8xf32>
    %c0_122 = arith.constant 0 : index
    %c0_123 = arith.constant 0 : index
    %629 = vector.load %arg11[%c0_122, %c0_123] : memref<32x6xf32, #tpu.memory_space<vmem>>, vector<32x6xf32>
    %630 = vector.extract_strided_slice %629 {offsets = [0, 0], sizes = [16, 6], strides = [1, 1]} : vector<32x6xf32> to vector<16x6xf32>
    %cst_124 = arith.constant dense<0.000000e+00> : vector<8x6xf32>
    %631 = tpu.matmul %462, %630, %cst_124 {dimension_numbers = #tpu.dot_dimension_numbers<[1], [0], [0], [1], [0, 0, 1, 1], [], []>} : vector<8x16xf32>, vector<16x6xf32>, vector<8x6xf32> -> vector<8x6xf32>
    %632 = vector.extract_strided_slice %607 {offsets = [0, 0], sizes = [8, 8], strides = [1, 1]} : vector<16x8xf32> to vector<8x8xf32>
    %633 = vector.extract_strided_slice %629 {offsets = [16, 0], sizes = [8, 6], strides = [1, 1]} : vector<32x6xf32> to vector<8x6xf32>
    %cst_125 = arith.constant dense<0.000000e+00> : vector<8x6xf32>
    %634 = tpu.matmul %632, %633, %cst_125 {dimension_numbers = #tpu.dot_dimension_numbers<[1], [0], [0], [1], [0, 0, 1, 1], [], []>} : vector<8x8xf32>, vector<8x6xf32>, vector<8x6xf32> -> vector<8x6xf32>
    %635 = arith.addf %631, %634 : vector<8x6xf32>
    %636 = vector.extract_strided_slice %607 {offsets = [8, 0], sizes = [8, 8], strides = [1, 1]} : vector<16x8xf32> to vector<8x8xf32>
    %637 = vector.extract_strided_slice %629 {offsets = [24, 0], sizes = [8, 6], strides = [1, 1]} : vector<32x6xf32> to vector<8x6xf32>
    %cst_126 = arith.constant dense<0.000000e+00> : vector<8x6xf32>
    %638 = tpu.matmul %636, %637, %cst_126 {dimension_numbers = #tpu.dot_dimension_numbers<[1], [0], [0], [1], [0, 0, 1, 1], [], []>} : vector<8x8xf32>, vector<8x6xf32>, vector<8x6xf32> -> vector<8x6xf32>
    %639 = arith.addf %635, %638 : vector<8x6xf32>
    %c0_127 = arith.constant 0 : index
    %c0_128 = arith.constant 0 : index
    %640 = vector.load %arg12[%c0_127, %c0_128] : memref<1x6xf32, #tpu.memory_space<vmem>>, vector<1x6xf32>
    %641 = vector.broadcast %640 : vector<1x6xf32> to vector<8x6xf32>
    %642 = arith.addf %639, %641 : vector<8x6xf32>
    %643 = vector.extract_strided_slice %628 {offsets = [0, 0], sizes = [8, 6], strides = [1, 1]} : vector<8x8xf32> to vector<8x6xf32>
    %c0_129 = arith.constant 0 : index
    %c0_130 = arith.constant 0 : index
    %644 = memref.load %arg14[%c0_129, %c0_130] : memref<1x1xf32, #tpu.memory_space<smem>>
    %645 = vector.broadcast %644 : f32 to vector<8x6xf32>
    %646 = arith.addf %643, %645 : vector<8x6xf32>
    %647 = arith.addf %642, %646 : vector<8x6xf32>
    %c0_131 = arith.constant 0 : index
    %c0_132 = arith.constant 0 : index
    %648 = vector.load %arg15[%c0_131, %c0_132] : memref<8x6xf32, #tpu.memory_space<vmem>>, vector<8x6xf32>
    tpu.vector_store %arg15[%c0_131, %c0_132], %647 {strides = array<i32>} : memref<8x6xf32, #tpu.memory_space<vmem>>, vector<8x6xf32>,
    return
  }
}

</mosaic_0001>

<bundles_post_ra>
// kernel: _lstnet_forward_impl.1
= control target key start
LH: loop header
LB: loop body
LE: loop exit
PB: predicated region body
PF: predicated region fallthrough
CT: control target
= control target key end

     0   :  { %s6538_s0 = inlined_call_operand.vmem [shape: f32[128,8], index: 0, kind: input, shape index: {}]   ;;  %s6539_s1 = inlined_call_operand.vmem [shape: f32[3,8,16], index: 1, kind: input, shape index: {}]   ;;  %s6540_s2 = inlined_call_operand.vmem [shape: f32[1,16], index: 2, kind: input, shape index: {}]   ;;  %s6541_s3 = inlined_call_operand.vmem [shape: f32[16,48], index: 3, kind: input, shape index: {}]   ;;  %s6542_s4 = inlined_call_operand.vmem [shape: f32[16,48], index: 4, kind: input, shape index: {}]   ;;  %s6543_s5 = inlined_call_operand.vmem [shape: f32[1,48], index: 5, kind: input, shape index: {}]   ;;  %s6544_s6 = inlined_call_operand.vmem [shape: f32[1,48], index: 6, kind: input, shape index: {}]   ;;  %s6545_s7 = inlined_call_operand.vmem [shape: f32[16,24], index: 7, kind: input, shape index: {}]   ;;  %s6546_s8 = inlined_call_operand.vmem [shape: f32[8,24], index: 8, kind: input, shape index: {}]   ;;  %s6547_s9 = inlined_call_operand.vmem [shape: f32[1,24], index: 9, kind: input, shape index: {}]   ;;  %s6548_s10 = inlined_call_operand.vmem [shape: f32[1,24], index: 10, kind: input, shape index: {}]   ;;  %s6549_s11 = inlined_call_operand.vmem [shape: f32[32,6], index: 11, kind: input, shape index: {}]   ;;  %s6550_s12 = inlined_call_operand.vmem [shape: f32[1,6], index: 12, kind: input, shape index: {}]   ;;  %s6551_s13 = inlined_call_operand.vmem [shape: f32[1,4], index: 13, kind: input, shape index: {}]   ;;  %s6552_s14 = inlined_call_operand.<no memory space> [shape: f32[1,1], index: 14, kind: input, shape index: {}]   ;;  %s6553_s15 = inlined_call_operand.vmem [shape: f32[8,6], index: 15, kind: output, shape index: {0}]   ;;  %s6554_s16 = inlined_call_operand.vmem [shape: f32[8,6], index: 16, kind: output, shape index: {1}]  }
   0x1   :  { %6671 = sst [smem:[#allocation33_spill]] %s6538_s0 }
   0x2   :  { %23 = vsyncpa [#allocation4], 0  ;;  %s56_s23 = sshll.u32 %s6551_s13, 4  ;;  %s57_s23 = int_to_ptr.vmem [resolvable:$true] %s56_s23 }
   0x3   :  { %s4949_s24 = scalar_lea.vmem %s57_s23, 16  ;;  %p4954_p1 = scmp.lt.s32.totalorder %s57_s23, %s57_s23 }
   0x4   :  { %p4950_p0 = scmp.ne.s32.totalorder %s57_s23, %s4949_s24  ;;  %p4955_p2 = scmp.lt.s32.totalorder %s4949_s24, %s4949_s24 }
   0x6   :  { %p4956_p3 = por %p4955_p2, %p4954_p1 }
   0x8   :  { %p4957_p4 = pnand %p4956_p3, %p4950_p0 }
   0xa   :  { %4960 = shalt.err (!%p4957_p4)
}
   0xb   :  { %s4963_s25 = smov [#allocation3]  }
   0xc   :  { %59 = dma.vmem_to_smem %s57_s23, 16, %s4963_s25, [#allocation4]  }
   0xd   :  { %4961 = dma.done.wait [#allocation4], 16  }
   0xe   :  { %4962 = vsyncadd [#allocation4], 4294967280 }
   0xf   :  { %65 = sfence }
  0x10   :  { %v4157_v0 = vld [vmem:[%s6539_s1 + $0x8] sm:$0xff]  ;;  %v6556_v1 = vlaneseq  ;;  %v5075_v5 = vld [vmem:[%s6539_s1] sm:$0xff]  ;;  %s6673_s0 = sld [smem:[#allocation33_spill]]  ;;  %vm6642_vm0 = vcmask 64512   ;;  %v6675_v18 = vmov 0  ;;  %v6682_v29 = vmov 0 }
  0x11   :  { %4434 = vmatprep.subr.mxu0 %v4157_v0  ;;  %6672 = vst [vmem:[#allocation6_spill] sm:$0xff] %v5075_v5  ;;  %v6685_v38 = vmov 0  ;;  %v6688_v44 = vmov 0  ;;  %v6691_v50 = vmov 0  ;;  %v6694_v62 = vmov 0  ;;  %s5923_s19 = sld [smem:[#allocation3 + $0x2]] }
  0x12   :  { %4435 = vmatpush3.msra.mxu0 %v4157_v0  ;;  %v5064_v2 = vshrl.u32 %v6556_v1, 7  ;;  %v6697_v63 = vmov 0  ;;  %s5978_s20 = sld [smem:[#allocation3 + $0x3]]  ;;  %s4969_s21 = smov 112  }
  0x13   :  { %4457 = vmatprep.subr.mxu0 %v5075_v5  ;;  %s4971_s24 = smov 120  }
  0x14   :  { %v5067_v3 = vadd.s32 8, %v5064_v2  ;;  %v5070_v4 = vadd.s32 16, %v5064_v2  ;;  %v5079_v6 = vadd.s32 24, %v5064_v2  ;;  %v5082_v7 = vadd.s32 32, %v5064_v2 }
  0x15   :  { %v6573_v8 = vand.u32 7, %v5064_v2  ;;  %v5088_v11 = vadd.s32 40, %v5064_v2  ;;  %v5097_v14 = vadd.s32 48, %v5064_v2  ;;  %v5129_v21 = vadd.s32 56, %v5064_v2 }
  0x16   :  { %v6569_v9 = vand.u32 7, %v5067_v3  ;;  %v6568_v10 = vand.u32 7, %v5070_v4  ;;  %v6567_v12 = vand.u32 7, %v5079_v6  ;;  %v5094_v13 = vld [vmem:[%s6673_s0] sm:$0xff]  ;;  %v5102_v15 = vld [vmem:[%s6673_s0 + $0x8] sm:$0xff]  ;;  %v5107_v16 = vld [vmem:[%s6673_s0 + $0x10] sm:$0xff] }
  0x17   :  { %6674 = vst [vmem:[#allocation7_spill] sm:$0xff] %v5094_v13  ;;  %v6565_v17 = vand.u32 7, %v5082_v7  ;;  %vm5112_vm1 = vcmp.eq.s32.totalorder %v6573_v8, 0  ;;  %v5132_v22 = vadd.s32 64, %v5064_v2  ;;  %v5135_v23 = vadd.s32 72, %v5064_v2  ;;  %v5143_v25 = vld [vmem:[%s6673_s0 + $0x18] sm:$0xff] }
  0x18   :  { %v6676_v18 = vsel %vm5112_vm1, 4294967295, %v6675_v18  ;;  %vm5118_vm2 = vcmp.eq.s32.totalorder %v6569_v9, 0  ;;  %vm5124_vm3 = vcmp.eq.s32.totalorder %v6568_v10, 0  ;;  %v5138_v24 = vadd.s32 80, %v5064_v2  ;;  %v5171_v34 = vld [vmem:[%s6673_s0 + $0x20] sm:$0xff]  ;;  %v5197_v43 = vld [vmem:[%s6673_s0 + $0x28] sm:$0xff] }
  0x19   :  { %6677 = vst [vmem:[#allocation8_spill] sm:$0xff] %v6676_v18  ;;  %v5146_v26 = vadd.s32 88, %v5064_v2  ;;  %v5149_v27 = vadd.s32 96, %v5064_v2  ;;  %v6560_v28 = vand.u32 7, %v5088_v11  ;;  %vm5154_vm4 = vcmp.eq.s32.totalorder %v6567_v12, 0  ;;  %v5211_v48 = vld [vmem:[%s6673_s0 + $0x30] sm:$0xff] }
  0x1a   :  { %v6683_v29 = vsel %vm5154_vm4, 4294967295, %v6682_v29  ;;  %v6559_v30 = vand.u32 7, %v5097_v14  ;;  %v339_v31 = vsel %vm5112_vm1, %v5094_v13, 0.0  ;;  %v340_v32 = vsel %vm5118_vm2, %v5102_v15, 0.0  ;;  %v5235_v61 = vld [vmem:[%s6673_s0 + $0x38] sm:$0xff] }
  0x1b   :  { %6684 = vst [vmem:[#allocation9_spill] sm:$0xff] %v6683_v29  ;;  %v341_v33 = vsel %vm5124_vm3, %v5107_v16, 0.0  ;;  %v5174_v35 = vadd.s32 104, %v5064_v2  ;;  %v5177_v36 = vadd.s32 112, %v5064_v2  ;;  %v5180_v37 = vadd.s32 120, %v5064_v2 }
  0x1c   :  { %vm5184_vm5 = vcmp.eq.s32.totalorder %v6565_v17, 0  ;;  %v6557_v39 = vand.u32 7, %v5129_v21  ;;  %v6558_v40 = vand.u32 7, %v5132_v22  ;;  %v6564_v41 = vand.u32 7, %v5135_v23 }
  0x1d   :  { %v6686_v38 = vsel %vm5184_vm5, 4294967295, %v6685_v38  ;;  %v342_v42 = vsel %vm5154_vm4, %v5143_v25, 0.0  ;;  %vm5201_vm6 = vcmp.eq.s32.totalorder %v6560_v28, 0  ;;  %v356_v45 = vsel %vm6642_vm0, %v339_v31, 0.0 }
  0x1e   :  { %6687 = vst [vmem:[#allocation10_spill] sm:$0xff] %v6686_v38  ;;  %v6689_v44 = vsel %vm5201_vm6, 4294967295, %v6688_v44  ;;  %v357_v46 = vsel %vm6642_vm0, %v340_v32, 0.0  ;;  %v359_v47 = vsel %vm6642_vm0, %v341_v33, 0.0  ;;  %v6562_v49 = vand.u32 7, %v5138_v24 }
  0x1f   :  { %6690 = vst [vmem:[#allocation11_spill] sm:$0xff] %v6689_v44  ;;  %vm5216_vm7 = vcmp.eq.s32.totalorder %v6559_v30, 0  ;;  %v343_v51 = vsel %vm5184_vm5, %v5171_v34, 0.0  ;;  %v358_v52 = vadd.f32 %v357_v46, %v356_v45  ;;  %v6561_v53 = vand.u32 7, %v5146_v26  ;;  %v5256_v46 = vld [vmem:[%s6673_s0 + $0x40] sm:$0xff] }
  0x20   :  { %v6692_v50 = vsel %vm5216_vm7, 4294967295, %v6691_v50  ;;  %v6563_v54 = vand.u32 7, %v5149_v27  ;;  %v6566_v55 = vand.u32 7, %v5174_v35  ;;  %v361_v56 = vsel %vm6642_vm0, %v342_v42, 0.0 }
  0x21   :  { %6693 = vst [vmem:[#allocation12_spill] sm:$0xff] %v6692_v50  ;;  %v6572_v57 = vand.u32 7, %v5177_v36  ;;  %v6575_v58 = vand.u32 7, %v5180_v37  ;;  %v344_v59 = vsel %vm5201_vm6, %v5197_v43, 0.0  ;;  %v360_v60 = vadd.f32 %v359_v47, %v358_v52 }
  0x22   :  { %vm5239_vm8 = vcmp.eq.s32.totalorder %v6557_v39, 0  ;;  %vm5245_vm9 = vcmp.eq.s32.totalorder %v6558_v40, 0  ;;  %v345_v0 = vsel %vm5216_vm7, %v5211_v48, 0.0  ;;  %v363_v45 = vsel %vm6642_vm0, %v343_v51, 0.0 }
  0x23   :  { %v6695_v62 = vsel %vm5239_vm8, 4294967295, %v6694_v62  ;;  %v6698_v63 = vsel %vm5245_vm9, 4294967295, %v6697_v63  ;;  %v362_v47 = vadd.f32 %v361_v56, %v360_v60  ;;  %v393_v52 = vmul.f32 %v339_v31, %v339_v31 }
  0x24   :  { %6696 = vst [vmem:[#allocation13_spill] sm:$0xff] %v6695_v62  ;;  %6699 = vst [vmem:[#allocation14_spill] sm:$0xff] %v6698_v63  ;;  %v394_v1 = vmul.f32 %v340_v32, %v340_v32  ;;  %v395_v39 = vmul.f32 %v341_v33, %v341_v33  ;;  %vm5260_vm10 = vcmp.eq.s32.totalorder %v6564_v41, 0  ;;  %v6700_v40 = vmov 0 }
  0x25   :  { %v6701_v40 = vsel %vm5260_vm10, 4294967295, %v6700_v40  ;;  %vm5266_vm11 = vcmp.eq.s32.totalorder %v6562_v49, 0  ;;  %v6703_v30 = vmov 0  ;;  %vm5272_vm12 = vcmp.eq.s32.totalorder %v6561_v53, 0  ;;  %v5289_v53 = vld [vmem:[%s6673_s0 + $0x48] sm:$0xff] }
  0x26   :  { %6702 = vst [vmem:[#allocation15_spill] sm:$0xff] %v6701_v40  ;;  %v6704_v30 = vsel %vm5266_vm11, 4294967295, %v6703_v30  ;;  %v6706_v28 = vmov 0  ;;  %v365_v31 = vsel %vm6642_vm0, %v344_v59, 0.0  ;;  %vm5279_vm13 = vcmp.eq.s32.totalorder %v6563_v54, 0 }
  0x27   :  { %6705 = vst [vmem:[#allocation16_spill] sm:$0xff] %v6704_v30  ;;  %v6707_v28 = vsel %vm5272_vm12, 4294967295, %v6706_v28  ;;  %v6709_v32 = vmov 0  ;;  %v346_v33 = vsel %vm5239_vm8, %v5235_v61, 0.0  ;;  %v364_v56 = vadd.f32 %v363_v45, %v362_v47  ;;  %v5309_v45 = vld [vmem:[%s6673_s0 + $0x58] sm:$0xff] }
  0x28   :  { %6708 = vst [vmem:[#allocation17_spill] sm:$0xff] %v6707_v28  ;;  %v6710_v32 = vsel %vm5279_vm13, 4294967295, %v6709_v32  ;;  %v396_v60 = vmul.f32 %v342_v42, %v342_v42  ;;  %vm5293_vm14 = vcmp.eq.s32.totalorder %v6566_v55, 0  ;;  %v6712_v49 = vmov 0  ;;  %v5304_v42 = vld [vmem:[%s6673_s0 + $0x50] sm:$0xff]  ;;  %6715 = vst [vmem:[#allocation20_spill] sm:$0xff] %v5309_v45 }
  0x29   :  { %6711 = vst [vmem:[#allocation18_spill] sm:$0xff] %v6710_v32  ;;  %v6713_v49 = vsel %vm5293_vm14, 4294967295, %v6712_v49  ;;  %v347_v54 = vsel %vm5245_vm9, %v5256_v46, 0.0  ;;  %v367_v41 = vsel %vm6642_vm0, %v345_v0, 0.0  ;;  %v397_v17 = vmul.f32 %v343_v51, %v343_v51  ;;  %v5317_v51 = vld [vmem:[%s6673_s0 + $0x60] sm:$0xff] }
  0x2a   :  { %6714 = vst [vmem:[#allocation19_spill] sm:$0xff] %v6713_v49  ;;  %v366_v47 = vadd.f32 %v365_v31, %v364_v56  ;;  %v409_v55 = vsel %vm6642_vm0, %v393_v52, 0.0  ;;  %v410_v12 = vsel %vm6642_vm0, %v394_v1, 0.0  ;;  %v412_v10 = vsel %vm6642_vm0, %v395_v39, 0.0  ;;  %6716 = vst [vmem:[#allocation21_spill] sm:$0xff] %v5317_v51  ;;  %v5335_v52 = vld [vmem:[%s6673_s0 + $0x68] sm:$0xff] }
  0x2b   :  { %vm5321_vm15 = vcmp.eq.s32.totalorder %v6572_v57, 0  ;;  %v6717_v9 = vmov 0  ;;  %vm5327_vm1 = vcmp.eq.s32.totalorder %v6575_v58, 0  ;;  %v6720_v31 = vmov 0  ;;  %6723 = vst [vmem:[#allocation24_spill] sm:$0xff] %v5335_v52  ;;  %v5344_v58 = vld [vmem:[%s6673_s0 + $0x70] sm:$0xff] }
  0x2c   :  { %v6718_v9 = vsel %vm5321_vm15, 4294967295, %v6717_v9  ;;  %v6721_v31 = vsel %vm5327_vm1, 4294967295, %v6720_v31  ;;  %v369_v1 = vsel %vm6642_vm0, %v346_v33, 0.0  ;;  %v411_v39 = vadd.f32 %v410_v12, %v409_v55  ;;  %6724 = vst [vmem:[#allocation25_spill] sm:$0xff] %v5344_v58  ;;  %v5349_v12 = vld [vmem:[%s6673_s0 + $0x78] sm:$0xff]  ;;  %s5569_s0 = sld [smem:[#allocation3]] }
  0x2d   :  { %6719 = vst [vmem:[#allocation22_spill] sm:$0xff] %v6718_v9  ;;  %6722 = vst [vmem:[#allocation23_spill] sm:$0xff] %v6721_v31  ;;  %v348_v56 = vsel %vm5260_vm10, %v5289_v53, 0.0  ;;  %v368_v57 = vadd.f32 %v367_v41, %v366_v47  ;;  %v398_v8 = vmul.f32 %v344_v59, %v344_v59  ;;  %v414_v5 = vsel %vm6642_vm0, %v396_v60, 0.0 }
  0x2e   :  { %6725 = vst [vmem:[#allocation26_spill] sm:$0xff] %v5349_v12  ;;  %v349_v55 = vsel %vm5266_vm11, %v5304_v42, 0.0  ;;  %v350_v41 = vsel %vm5272_vm12, %v5309_v45, 0.0  ;;  %v371_v59 = vsel %vm6642_vm0, %v347_v54, 0.0  ;;  %v413_v60 = vadd.f32 %v412_v10, %v411_v39 }
  0x2f   :  { %v351_v47 = vsel %vm5279_vm13, %v5317_v51, 0.0  ;;  %v370_v18 = vadd.f32 %v369_v1, %v368_v57  ;;  %v399_v40 = vmul.f32 %v345_v0, %v345_v0  ;;  %v416_v63 = vsel %vm6642_vm0, %v397_v17, 0.0 }
  0x30   :  { %v352_v30 = vsel %vm5293_vm14, %v5335_v52, 0.0  ;;  %v373_v62 = vsel %vm6642_vm0, %v348_v56, 0.0  ;;  %v400_v50 = vmul.f32 %v346_v33, %v346_v33  ;;  %v415_v28 = vadd.f32 %v414_v5, %v413_v60 }
  0x31   :  { %v353_v10 = vsel %vm5321_vm15, %v5344_v58, 0.0  ;;  %v354_v39 = vsel %vm5327_vm1, %v5349_v12, 0.0  ;;  %v372_v57 = vadd.f32 %v371_v59, %v370_v18  ;;  %v418_v0 = vsel %vm6642_vm0, %v398_v8, 0.0 }
  0x32   :  { %v375_v17 = vsel %vm6642_vm0, %v349_v55, 0.0  ;;  %v377_v1 = vsel %vm6642_vm0, %v350_v41, 0.0  ;;  %v379_v49 = vsel %vm6642_vm0, %v351_v47, 0.0  ;;  %v417_v32 = vadd.f32 %v416_v63, %v415_v28 }
  0x33   :  { %v374_v33 = vadd.f32 %v373_v62, %v372_v57  ;;  %v381_v5 = vsel %vm6642_vm0, %v352_v30, 0.0  ;;  %v401_v60 = vmul.f32 %v347_v54, %v347_v54  ;;  %v420_v9 = vsel %vm6642_vm0, %v399_v40, 0.0 }
  0x34   :  { %v383_v44 = vsel %vm6642_vm0, %v353_v10, 0.0  ;;  %v402_v31 = vmul.f32 %v348_v56, %v348_v56  ;;  %v419_v38 = vadd.f32 %v418_v0, %v417_v32  ;;  %v422_v18 = vsel %vm6642_vm0, %v400_v50, 0.0 }
  0x35   :  { %v376_v8 = vadd.f32 %v375_v17, %v374_v33  ;;  %v6726_v59 = vand.u32 7, %v5064_v2  ;;  %v6727_v29 = vmov 0  ;;  %v6730_v28 = vand.u32 7, %v5067_v3 }
  0x36   :  { %v6731_v62 = vmov 0  ;;  %v6733_v40 = vand.u32 7, %v5070_v4  ;;  %v6734_v54 = vmov 0  ;;  %v403_v50 = vmul.f32 %v349_v55, %v349_v55 }
  0x37   :  { %vm5382_vm1 = vcmp.eq.s32.totalorder %v6726_v59, 1  ;;  %vm5388_vm15 = vcmp.eq.s32.totalorder %v6730_v28, 1  ;;  %v404_v63 = vmul.f32 %v350_v41, %v350_v41  ;;  %v405_v32 = vmul.f32 %v351_v47, %v351_v47 }
  0x38   :  { %v6728_v29 = vsel %vm5382_vm1, 4294967295, %v6727_v29  ;;  %v6732_v62 = vsel %vm5388_vm15, 4294967295, %v6731_v62  ;;  %vm5394_vm14 = vcmp.eq.s32.totalorder %v6733_v40, 1  ;;  %v421_v2 = vadd.f32 %v420_v9, %v419_v38 }
  0x39   :  { %6729 = vst [vmem:[#allocation27_spill] sm:$0xff] %v6728_v29  ;;  %v6735_v54 = vsel %vm5394_vm14, 4294967295, %v6734_v54  ;;  %v378_v56 = vadd.f32 %v377_v1, %v376_v8  ;;  %v406_v57 = vmul.f32 %v352_v30, %v352_v30  ;;  %v424_v0 = vsel %vm6642_vm0, %v401_v60, 0.0 }
  0x3a   :  { %v6736_v3 = vand.u32 7, %v5079_v6  ;;  %v6737_v17 = vmov 0  ;;  %v423_v33 = vadd.f32 %v422_v18, %v421_v2  ;;  %v532_v4 = vsel %vm5382_vm1, %v5094_v13, 0.0 }
  0x3b   :  { %v533_v55 = vsel %vm5388_vm15, %v5102_v15, 0.0  ;;  %v534_v9 = vsel %vm5394_vm14, %v5107_v16, 0.0  ;;  %v380_v30 = vadd.f32 %v379_v49, %v378_v56  ;;  %v407_v38 = vmul.f32 %v353_v10, %v353_v10 }
  0x3c   :  { %vm5401_vm13 = vcmp.eq.s32.totalorder %v6736_v3, 1  ;;  %v426_v6 = vsel %vm6642_vm0, %v402_v31, 0.0  ;;  %v6739_v41 = vand.u32 7, %v5082_v7  ;;  %v6740_v47 = vmov 0 }
  0x3d   :  { %v6738_v17 = vsel %vm5401_vm13, 4294967295, %v6737_v17  ;;  %v425_v1 = vadd.f32 %v424_v0, %v423_v33  ;;  %v428_v60 = vsel %vm6642_vm0, %v403_v50, 0.0  ;;  %v6742_v18 = vand.u32 7, %v5088_v11 }
  0x3e   :  { %vm5417_vm12 = vcmp.eq.s32.totalorder %v6739_v41, 1  ;;  %v6743_v8 = vmov 0  ;;  %v535_v49 = vsel %vm5401_vm13, %v5143_v25, 0.0  ;;  %v382_v31 = vadd.f32 %v381_v5, %v380_v30 }
  0x3f   :  { %v6741_v47 = vsel %vm5417_vm12, 4294967295, %v6740_v47  ;;  %vm5424_vm1 = vcmp.eq.s32.totalorder %v6742_v18, 1  ;;  %v548_v7 = vsel %vm6642_vm0, %v532_v4, 0.0  ;;  %v549_v10 = vsel %vm6642_vm0, %v533_v55, 0.0 }
  0x40   :  { %v6744_v8 = vsel %vm5424_vm1, 4294967295, %v6743_v8  ;;  %v551_v59 = vsel %vm6642_vm0, %v534_v9, 0.0  ;;  %v408_v28 = vmul.f32 %v354_v39, %v354_v39  ;;  %v427_v40 = vadd.f32 %v426_v6, %v425_v1 }
  0x41   :  { %v536_v11 = vsel %vm5417_vm12, %v5171_v34, 0.0  ;;  %v550_v50 = vadd.f32 %v549_v10, %v548_v7  ;;  %v384_v2 = vadd.f32 %v383_v44, %v382_v31  ;;  %v430_v56 = vsel %vm6642_vm0, %v404_v63, 0.0 }
  0x42   :  { %v6745_v0 = vand.u32 7, %v5097_v14  ;;  %v6746_v5 = vmov 0  ;;  %v553_v3 = vsel %vm6642_vm0, %v535_v49, 0.0  ;;  %v385_v33 = vsel %vm6642_vm0, %v354_v39, 0.0 }
  0x43   :  { %v429_v30 = vadd.f32 %v428_v60, %v427_v40  ;;  %v537_v6 = vsel %vm5424_vm1, %v5197_v43, 0.0  ;;  %v552_v41 = vadd.f32 %v551_v59, %v550_v50  ;;  %v432_v44 = vsel %vm6642_vm0, %v405_v32, 0.0 }
  0x44   :  { %vm5440_vm13 = vcmp.eq.s32.totalorder %v6745_v0, 1  ;;  %v434_v63 = vsel %vm6642_vm0, %v406_v57, 0.0  ;;  %v6748_v14 = vand.u32 7, %v5129_v21  ;;  %v6749_v1 = vmov 0 }
  0x45   :  { %v6747_v5 = vsel %vm5440_vm13, 4294967295, %v6746_v5  ;;  %v555_v18 = vsel %vm6642_vm0, %v536_v11, 0.0  ;;  %v431_v31 = vadd.f32 %v430_v56, %v429_v30  ;;  %v6752_v39 = vand.u32 7, %v5132_v22 }
  0x46   :  { %vm5453_vm12 = vcmp.eq.s32.totalorder %v6748_v14, 1  ;;  %v538_v32 = vsel %vm5440_vm13, %v5211_v48, 0.0  ;;  %v554_v57 = vadd.f32 %v553_v3, %v552_v41  ;;  %v386_v7 = vadd.f32 %v385_v33, %v384_v2 }
  0x47   :  { %v6750_v1 = vsel %vm5453_vm12, 4294967295, %v6749_v1  ;;  %vm5460_vm14 = vcmp.eq.s32.totalorder %v6752_v39, 1  ;;  %v436_v21 = vsel %vm6642_vm0, %v407_v38, 0.0  ;;  %v438_v10 = vsel %vm6642_vm0, %v408_v28, 0.0 }
  0x48   :  { %6751 = vst [vmem:[#allocation28_spill] sm:$0xff] %v6750_v1  ;;  %v557_v59 = vsel %vm6642_vm0, %v537_v6, 0.0  ;;  %v433_v40 = vadd.f32 %v432_v44, %v431_v31  ;;  %v6755_v50 = vand.u32 7, %v5135_v23  ;;  %v6756_v22 = vmov 0 }
  0x49   :  { %v539_v56 = vsel %vm5453_vm12, %v5235_v61, 0.0  ;;  %v556_v0 = vadd.f32 %v555_v18, %v554_v57  ;;  %v6758_v2 = vand.u32 7, %v5138_v24  ;;  %v6759_v38 = vmov 0 }
  0x4a   :  { %vm5472_vm1 = vcmp.eq.s32.totalorder %v6755_v50, 1  ;;  %v540_v28 = vsel %vm5460_vm14, %v5256_v46, 0.0  ;;  %v559_v23 = vsel %vm6642_vm0, %v538_v32, 0.0  ;;  %v585_v3 = vmul.f32 %v532_v4, %v532_v4 }
  0x4b   :  { %v6757_v22 = vsel %vm5472_vm1, 4294967295, %v6756_v22  ;;  %vm5481_vm13 = vcmp.eq.s32.totalorder %v6758_v2, 1  ;;  %v435_v33 = vadd.f32 %v434_v63, %v433_v40  ;;  %v558_v30 = vadd.f32 %v557_v59, %v556_v0 }
  0x4c   :  { %v6760_v38 = vsel %vm5481_vm13, 4294967295, %v6759_v38  ;;  %v586_v41 = vmul.f32 %v533_v55, %v533_v55  ;;  %v587_v44 = vmul.f32 %v534_v9, %v534_v9  ;;  %v387_v14 = vrot.slane %v386_v7, 4 }
  0x4d   :  { %v6761_v18 = vand.u32 7, %v5146_v26  ;;  %v6764_v31 = vand.u32 7, %v5149_v27  ;;  %v6765_v39 = vmov 0  ;;  %v561_v57 = vsel %vm6642_vm0, %v539_v56, 0.0 }
  0x4e   :  { %v437_v4 = vadd.f32 %v436_v21, %v435_v33  ;;  %v541_v55 = vsel %vm5472_vm1, %v5289_v53, 0.0  ;;  %v560_v9 = vadd.f32 %v559_v23, %v558_v30  ;;  %v588_v63 = vmul.f32 %v535_v49, %v535_v49 }
  0x4f   :  { %vm5491_vm12 = vcmp.eq.s32.totalorder %v6761_v18, 1  ;;  %vm5497_vm15 = vcmp.eq.s32.totalorder %v6764_v31, 1  ;;  %v542_v26 = vsel %vm5481_vm13, %v5304_v42, 0.0  ;;  %v563_v59 = vsel %vm6642_vm0, %v540_v28, 0.0 }
  0x50   :  { %v6766_v39 = vsel %vm5497_vm15, 4294967295, %v6765_v39  ;;  %v589_v27 = vmul.f32 %v536_v11, %v536_v11  ;;  %v601_v40 = vsel %vm6642_vm0, %v585_v3, 0.0  ;;  %v439_v50 = vadd.f32 %v438_v10, %v437_v4 }
  0x51   :  { %6767 = vst [vmem:[#allocation29_spill] sm:$0xff] %v6766_v39  ;;  %v562_v0 = vadd.f32 %v561_v57, %v560_v9  ;;  %v602_v2 = vsel %vm6642_vm0, %v586_v41, 0.0  ;;  %v604_v21 = vsel %vm6642_vm0, %v587_v44, 0.0  ;;  %v388_v33 = vadd.f32 %v387_v14, %v386_v7 }
  0x52   :  { %v543_v49 = vsel %vm5491_vm12, %v5309_v45, 0.0  ;;  %v565_v23 = vsel %vm6642_vm0, %v541_v55, 0.0  ;;  %v603_v30 = vadd.f32 %v602_v2, %v601_v40  ;;  %v440_v18 = vrot.slane %v439_v50, 4  ;;  %v6799_v45 = vld [vmem:[#allocation23_spill] sm:$0xff] }
  0x53   :  { %v564_v31 = vadd.f32 %v563_v59, %v562_v0  ;;  %v590_v13 = vmul.f32 %v537_v6, %v537_v6  ;;  %v606_v11 = vsel %vm6642_vm0, %v588_v63, 0.0  ;;  %v6768_v10 = vand.u32 7, %v5174_v35 }
  0x54   :  { %v6769_v3 = vmov 0  ;;  %v6772_v7 = vand.u32 7, %v5177_v36  ;;  %v6773_v41 = vmov 0  ;;  %v567_v44 = vsel %vm6642_vm0, %v542_v26, 0.0 }
  0x55   :  { %vm5519_vm13 = vcmp.eq.s32.totalorder %v6768_v10, 1  ;;  %v605_v14 = vadd.f32 %v604_v21, %v603_v30  ;;  %v544_v6 = vsel %vm5497_vm15, %v5317_v51, 0.0  ;;  %v566_v57 = vadd.f32 %v565_v23, %v564_v31 }
  0x56   :  { %v6770_v3 = vsel %vm5519_vm13, 4294967295, %v6769_v3  ;;  %vm5525_vm1 = vcmp.eq.s32.totalorder %v6772_v7, 1  ;;  %v591_v4 = vmul.f32 %v538_v32, %v538_v32  ;;  %v608_v35 = vsel %vm6642_vm0, %v589_v27, 0.0 }
  0x57   :  { %6771 = vst [vmem:[#allocation30_spill] sm:$0xff] %v6770_v3  ;;  %v6774_v41 = vsel %vm5525_vm1, 4294967295, %v6773_v41  ;;  %v389_v9 = vrot.slane %v388_v33, 2  ;;  %v441_v63 = vadd.f32 %v440_v18, %v439_v50  ;;  %v569_v59 = vsel %vm6642_vm0, %v543_v49, 0.0 }
  0x58   :  { %6775 = vst [vmem:[#allocation31_spill] sm:$0xff] %v6774_v41  ;;  %v607_v36 = vadd.f32 %v606_v11, %v605_v14  ;;  %v545_v40 = vsel %vm5519_vm13, %v5335_v52, 0.0  ;;  %v568_v0 = vadd.f32 %v567_v44, %v566_v57  ;;  %v592_v2 = vmul.f32 %v539_v56, %v539_v56  ;;  %v6797_v52 = vld [vmem:[#allocation8_spill] sm:$0xff] }
  0x59   :  { %v610_v21 = vsel %vm6642_vm0, %v590_v13, 0.0  ;;  %v6776_v30 = vand.u32 7, %v5180_v37  ;;  %v6777_v23 = vmov 0  ;;  %v571_v32 = vsel %vm6642_vm0, %v544_v6, 0.0 }
  0x5a   :  { %v609_v27 = vadd.f32 %v608_v35, %v607_v36  ;;  %v546_v50 = vsel %vm5525_vm1, %v5344_v58, 0.0  ;;  %v570_v18 = vadd.f32 %v569_v59, %v568_v0  ;;  %v593_v31 = vmul.f32 %v540_v28, %v540_v28 }
  0x5b   :  { %vm5541_vm15 = vcmp.eq.s32.totalorder %v6776_v30, 1  ;;  %v612_v11 = vsel %vm6642_vm0, %v591_v4, 0.0  ;;  %v390_v56 = vadd.f32 %v389_v9, %v388_v33  ;;  %v442_v10 = vrot.slane %v441_v63, 2 }
  0x5c   :  { %v6778_v23 = vsel %vm5541_vm15, 4294967295, %v6777_v23  ;;  %v573_v13 = vsel %vm6642_vm0, %v545_v40, 0.0  ;;  %v611_v37 = vadd.f32 %v610_v21, %v609_v27  ;;  %v547_v7 = vsel %vm5541_vm15, %v5349_v12, 0.0 }
  0x5d   :  { %6779 = vst [vmem:[#allocation32_spill] sm:$0xff] %v6778_v23  ;;  %v572_v44 = vadd.f32 %v571_v32, %v570_v18  ;;  %v594_v14 = vmul.f32 %v541_v55, %v541_v55  ;;  %v614_v57 = vsel %vm6642_vm0, %v592_v2, 0.0  ;;  %v575_v35 = vsel %vm6642_vm0, %v546_v50, 0.0 }
  0x5e   :  { %v613_v36 = vadd.f32 %v612_v11, %v611_v37  ;;  %v595_v28 = vmul.f32 %v542_v26, %v542_v26  ;;  %v616_v4 = vsel %vm6642_vm0, %v593_v31, 0.0  ;;  %v391_v33 = vrot.slane %v390_v56, 1 }
  0x5f   :  { %v574_v59 = vadd.f32 %v573_v13, %v572_v44  ;;  %v443_v9 = vadd.f32 %v442_v10, %v441_v63  ;;  %v577_v0 = vsel %vm6642_vm0, %v547_v7, 0.0  ;;  %v596_v27 = vmul.f32 %v543_v49, %v543_v49 }
  0x60   :  { %v615_v21 = vadd.f32 %v614_v57, %v613_v36  ;;  %v618_v12 = vsel %vm6642_vm0, %v594_v14, 0.0  ;;  %v597_v18 = vmul.f32 %v544_v6, %v544_v6  ;;  %v620_v2 = vsel %vm6642_vm0, %v595_v28, 0.0 }
  0x61   :  { %v576_v30 = vadd.f32 %v575_v35, %v574_v59  ;;  %v392_v23 = vadd.f32 %v391_v33, %v390_v56  ;;  %v444_v11 = vrot.slane %v443_v9, 1  ;;  %v598_v37 = vmul.f32 %v545_v40, %v545_v40 }
  0x62   :  { %v617_v32 = vadd.f32 %v616_v4, %v615_v21  ;;  %v622_v31 = vsel %vm6642_vm0, %v596_v27, 0.0  ;;  %v599_v44 = vmul.f32 %v546_v50, %v546_v50  ;;  %v624_v57 = vsel %vm6642_vm0, %v597_v18, 0.0 }
  0x63   :  { %v578_v55 = vadd.f32 %v577_v0, %v576_v30  ;;  %v445_v49 = vadd.f32 %v444_v11, %v443_v9  ;;  %v5562_v35 = vmul.f32 0.0625, %v392_v23  ;;  %v600_v6 = vmul.f32 %v547_v7, %v547_v7 }
  0x64   :  { %v619_v13 = vadd.f32 %v618_v12, %v617_v32  ;;  %v626_v59 = vsel %vm6642_vm0, %v598_v37, 0.0  ;;  %v628_v12 = vsel %vm6642_vm0, %v599_v44, 0.0 }
  0x65   :  { %v579_v26 = vrot.slane %v578_v55, 4  ;;  %v448_v28 = vmul.f32 0.0625, %v445_v49  ;;  %v449_v40 = vmul.f32 %v5562_v35, %v5562_v35  ;;  %v630_v50 = vsel %vm6642_vm0, %v600_v6, 0.0 }
  0x66   :  { %v621_v63 = vadd.f32 %v620_v2, %v619_v13  ;;  %v452_v11 = vsel %vm5118_vm2, %v5562_v35, 0.0  ;;  %v6780_v13 = vlaneseq  ;;  %v454_v44 = vsel %vm5154_vm4, %v5562_v35, 0.0 }
  0x67   :  { %v580_v10 = vadd.f32 %v579_v26, %v578_v55  ;;  %v450_v9 = vsub.f32 %v448_v28, %v449_v40  ;;  %v455_v49 = vsel %vm5184_vm5, %v5562_v35, 0.0 }
  0x68   :  { %v623_v14 = vadd.f32 %v622_v31, %v621_v63  ;;  %v5577_v26 = vand.u32 127, %v6780_v13  ;;  %v453_v63 = vsel %vm5124_vm3, %v5562_v35, 0.0 }
  0x69   :  { %v581_v36 = vrot.slane %v580_v10, 2  ;;  %4788 = vrsqrt.f32 %v450_v9  ;;  %v6788_v9 = vld [vmem:[#allocation16_spill] sm:$0xff] }
  0x6a   :  { %v625_v56 = vadd.f32 %v624_v57, %v623_v14 }
  0x6b   :  { %v582_v4 = vadd.f32 %v581_v36, %v580_v10  ;;  %v456_v36 = vsel %vm5201_vm6, %v5562_v35, 0.0 }
  0x6c   :  { %v627_v33 = vadd.f32 %v626_v59, %v625_v56  ;;  %v457_v59 = vsel %vm5216_vm7, %v5562_v35, 0.0 }
  0x6d   :  { %v583_v23 = vrot.slane %v582_v4, 1 }
  0x6e   :  { %v629_v0 = vadd.f32 %v628_v12, %v627_v33  ;;  %v458_v12 = vsel %vm5239_vm8, %v5562_v35, 0.0  ;;  %v459_v33 = vsel %vm5245_vm9, %v5562_v35, 0.0 }
  0x6f   :  { %v584_v7 = vadd.f32 %v583_v23, %v582_v4  ;;  %v461_v23 = vsel %vm5266_vm11, %v5562_v35, 0.0  ;;  %vm6798_vm11 = vnez %v6797_v52 }
  0x70   :  { %v631_v21 = vadd.f32 %v630_v50, %v629_v0  ;;  %v6787_v50 = vld [vmem:[#allocation15_spill] sm:$0xff]  ;;  %v460_v0 = vsel %vm5260_vm10, %v5562_v35, 0.0  ;;  %v451_v51 = vsel %vm6798_vm11, %v5562_v35, 0.0  ;;  %vm6801_vm11 = vnez %v6732_v62 }
  0x71   :  { %v5571_v18 = vmul.f32 0.0625, %v584_v7  ;;  %v6791_v7 = vld [vmem:[#allocation18_spill] sm:$0xff]  ;;  %vm6814_vm10 = vnez %v6774_v41  ;;  %v6821_v41 = vld [vmem:[#allocation25_spill] sm:$0xff] }
  0x72   :  { %v632_v30 = vrot.slane %v631_v21, 4  ;;  %vm6792_vm15 = vnez %v6791_v7 }
  0x73   :  { %v640_v31 = vmul.f32 %v5571_v18, %v5571_v18  ;;  %v5599_v28 = vpop.eup %4788 }
  0x74   :  { %v633_v27 = vadd.f32 %v632_v30, %v631_v21  ;;  %v6789_v21 = vld [vmem:[#allocation17_spill] sm:$0xff]  ;;  %v472_v52 = vsel %vm5184_vm5, %v5599_v28, 0.0  ;;  %v473_v57 = vsel %vm5201_vm6, %v5599_v28, 0.0  ;;  %vm6805_vm5 = vnez %v6744_v8 }
  0x75   :  { %vm6790_vm0 = vnez %v6789_v21  ;;  %vm6807_vm6 = vnez %v6750_v1  ;;  %v476_v6 = vsel %vm5245_vm9, %v5599_v28, 0.0  ;;  %vm6809_vm9 = vnez %v6760_v38 }
  0x76   :  { %v634_v32 = vrot.slane %v633_v27, 2  ;;  %v462_v30 = vsel %vm6790_vm0, %v5562_v35, 0.0  ;;  %vm6800_vm0 = vnez %v6799_v45  ;;  %v5675_v14 = vsel %vm6807_vm6, %v5571_v18, %v458_v12 }
  0x77   :  { %v466_v21 = vsel %vm6800_vm0, %v5562_v35, 0.0  ;;  %v650_v12 = vsel %vm5460_vm14, %v5571_v18, %v459_v33  ;;  %v5710_v33 = vsel %vm5491_vm12, %v5571_v18, %v462_v30  ;;  %vm6827_vm0 = vnez %v6741_v47 }
  0x78   :  { %v635_v55 = vadd.f32 %v634_v32, %v633_v27  ;;  %v463_v27 = vsel %vm6792_vm15, %v5562_v35, 0.0  ;;  %v469_v32 = vsel %vm5118_vm2, %v5599_v28, 0.0  ;;  %vm6802_vm2 = vnez %v6735_v54  ;;  %6810 = vst [vmem:[#allocation9_spill] sm:$0xff] %v5710_v33 }
  0x79   :  { %v644_v19 = vsel %vm6802_vm2, %v5571_v18, %v453_v63  ;;  %v475_v63 = vsel %vm5239_vm8, %v5599_v28, 0.0  ;;  %vm6808_vm8 = vnez %v6757_v22  ;;  %v683_v30 = vsub.f32 %v5256_v46, %v650_v12  ;;  %v6822_v12 = vld [vmem:[#allocation8_spill] sm:$0xff] }
  0x7a   :  { %v636_v2 = vrot.slane %v635_v55, 1  ;;  %v5694_v4 = vsel %vm6808_vm8, %v5571_v18, %v460_v0  ;;  %vm6813_vm8 = vnez %v6770_v3  ;;  %v6824_v0 = vld [vmem:[#allocation7_spill] sm:$0xff] }
  0x7c   :  { %v637_v37 = vadd.f32 %v636_v2, %v635_v55  ;;  %v6793_v55 = vld [vmem:[#allocation19_spill] sm:$0xff] }
  0x7d   :  { %vm6794_vm1 = vnez %v6793_v55 }
  0x7e   :  { %v639_v40 = vmul.f32 0.0625, %v637_v37  ;;  %v464_v2 = vsel %vm6794_vm1, %v5562_v35, 0.0  ;;  %v6795_v37 = vld [vmem:[#allocation22_spill] sm:$0xff] }
  0x7f   :  { %vm6796_vm13 = vnez %v6795_v37 }
  0x80   :  { %v641_v13 = vsub.f32 %v639_v40, %v640_v31  ;;  %v465_v58 = vsel %vm6796_vm13, %v5562_v35, 0.0  ;;  %v470_v31 = vsel %vm5124_vm3, %v5599_v28, 0.0  ;;  %v471_v40 = vsel %vm5154_vm4, %v5599_v28, 0.0 }
  0x81   :  { %v643_v35 = vsel %vm6801_vm11, %v5571_v18, %v452_v11  ;;  %vm6803_vm3 = vnez %v6738_v17  ;;  %vm6804_vm4 = vnez %v6741_v47  ;;  %v474_v11 = vsel %vm5216_vm7, %v5599_v28, 0.0 }
  0x82   :  { %4790 = vrsqrt.f32 %v641_v13  ;;  %v645_v20 = vsel %vm6803_vm3, %v5571_v18, %v454_v44  ;;  %v646_v10 = vsel %vm6804_vm4, %v5571_v18, %v455_v49  ;;  %v5665_v44 = vsel %vm6805_vm5, %v5571_v18, %v456_v36 }
  0x83   :  { %vm6806_vm4 = vnez %v6747_v5  ;;  %v676_v56 = vsub.f32 %v5102_v15, %v643_v35  ;;  %v677_v36 = vsub.f32 %v5107_v16, %v644_v19  ;;  %v678_v13 = vsub.f32 %v5143_v25, %v645_v20 }
  0x84   :  { %v5670_v49 = vsel %vm6806_vm4, %v5571_v18, %v457_v59  ;;  %v679_v1 = vsub.f32 %v5171_v34, %v646_v10  ;;  %v5699_v35 = vsel %vm6809_vm9, %v5571_v18, %v461_v23  ;;  %v680_v19 = vsub.f32 %v5197_v43, %v5665_v44 }
  0x85   :  { %v681_v20 = vsub.f32 %v5211_v48, %v5670_v49  ;;  %v682_v10 = vsub.f32 %v5235_v61, %v5675_v14  ;;  %vm6811_vm7 = vnez %v6788_v9  ;;  %vm6812_vm9 = vnez %v6766_v39  ;;  %v6819_v14 = vld [vmem:[#allocation21_spill] sm:$0xff] }
  0x86   :  { %v5718_v23 = vsel %vm6812_vm9, %v5571_v18, %v463_v27  ;;  %v5723_v44 = vsel %vm6813_vm8, %v5571_v18, %v464_v2  ;;  %v5728_v49 = vsel %vm6814_vm10, %v5571_v18, %v465_v58  ;;  %vm6815_vm9 = vnez %v6728_v29  ;;  %v6816_v2 = vld [vmem:[#allocation17_spill] sm:$0xff]  ;;  %v6818_v58 = vld [vmem:[#allocation20_spill] sm:$0xff] }
  0x87   :  { %v5738_v27 = vsel %vm6815_vm9, %v5571_v18, %v451_v51  ;;  %vm6817_vm8 = vnez %v6816_v2  ;;  %v6820_v51 = vld [vmem:[#allocation24_spill] sm:$0xff]  ;;  %v6852_v9 = vsub.f32 %v5304_v42, %v5699_v35 }
  0x88   :  { %v6825_v29 = vld [vmem:[#allocation32_spill] sm:$0xff] }
  0x89   :  { %vm6826_vm10 = vnez %v6825_v29 }
  0x8a   :  { %v5773_v59 = vsel %vm6826_vm10, %v5571_v18, %v466_v21 }
  0x8c   :  { %v5760_v33 = vpop.eup %4790 }
  0x8d   :  { %v660_v39 = vsel %vm6801_vm11, %v5760_v33, %v469_v32  ;;  %v661_v55 = vsel %vm6802_vm2, %v5760_v33, %v470_v31  ;;  %v662_v7 = vsel %vm6803_vm3, %v5760_v33, %v471_v40  ;;  %v663_v3 = vsel %vm6827_vm0, %v5760_v33, %v472_v52 }
  0x8e   :  { %v692_v45 = vmul.f32 %v676_v56, %v660_v39  ;;  %v693_v29 = vmul.f32 %v677_v36, %v661_v55  ;;  %v694_v18 = vmul.f32 %v678_v13, %v662_v7  ;;  %v695_v21 = vmul.f32 %v679_v1, %v663_v3  ;;  %v6844_v56 = vld [vmem:[#allocation6_spill] sm:$0xff] }
  0x8f   :  { %v664_v62 = vsel %vm6805_vm5, %v5760_v33, %v473_v57  ;;  %v665_v54 = vsel %vm6806_vm4, %v5760_v33, %v474_v11  ;;  %v666_v17 = vsel %vm6807_vm6, %v5760_v33, %v475_v63  ;;  %v667_v52 = vsel %vm5460_vm14, %v5760_v33, %v476_v6 }
  0x90   :  { %vm6829_vm0 = vcmp.lt.s32.totalorder %v5577_v26, 6 }
  0x91   :  { %v713_v47 = vsel %vm6829_vm0, %v692_v45, %v5102_v15  ;;  %vm6830_vm11 = vmmov %vm6829_vm0  ;;  %v696_v15 = vmul.f32 %v680_v19, %v664_v62 }
  0x92   :  { %v714_v8 = vsel %vm6830_vm11, %v693_v29, %v5107_v16  ;;  %vm6831_vm2 = vmmov %vm6829_vm0  ;;  %v729_v39 = vand.u32 2147483647, %v713_v47  ;;  %vm761_vm4 = vcmp.ne.f32.partialorder %v713_v47, %v713_v47  ;;  %v697_v16 = vmul.f32 %v681_v20, %v665_v54  ;;  %v6854_v54 = vld [vmem:[#allocation9_spill] sm:$0xff] }
  0x93   :  { %v715_v5 = vsel %vm6831_vm2, %v694_v18, %v5143_v25  ;;  %vm6832_vm3 = vmmov %vm6829_vm0  ;;  %v730_v60 = vand.u32 2147483647, %v714_v8  ;;  %vm762_vm14 = vcmp.ne.f32.partialorder %v714_v8, %v714_v8  ;;  %v698_v29 = vmul.f32 %v682_v10, %v666_v17 }
  0x94   :  { %v716_v1 = vsel %vm6832_vm3, %v695_v21, %v5171_v34  ;;  %v731_v3 = vand.u32 2147483647, %v715_v5  ;;  %vm763_vm5 = vcmp.ne.f32.partialorder %v715_v5, %v715_v5  ;;  %vm745_vm0 = vcmp.eq.f32.partialorder %v729_v39, inf  ;;  %vm6835_vm6 = vmmov %vm6832_vm3 }
  0x95   :  { %v732_v7 = vand.u32 2147483647, %v716_v1  ;;  %vm746_vm10 = vcmp.eq.f32.partialorder %v730_v60, inf  ;;  %vm777_vm11 = vmor %vm745_vm0, %vm761_vm4  ;;  %v699_v34 = vmul.f32 %v683_v30, %v667_v52  ;;  %v717_v55 = vsel %vm6832_vm3, %v696_v15, %v5197_v43  ;;  %v6863_v60 = vld [vmem:[#allocation30_spill] sm:$0xff] }
  0x96   :  { %vm747_vm9 = vcmp.eq.f32.partialorder %v731_v3, inf  ;;  %v5815_v45 = vsel %vm777_vm11, 0.0, %v713_v47  ;;  %vm778_vm2 = vmor %vm746_vm10, %vm762_vm14  ;;  %v718_v31 = vsel %vm6835_vm6, %v697_v16, %v5211_v48  ;;  %vm6836_vm4 = vnez %v6787_v50  ;;  %v5839_v48 = vld [vmem:[%s6539_s1 + $0x10] sm:$0xff]  ;;  %s5918_s1 = sld [smem:[#allocation3 + $0x1]] }
  0x97   :  { %vm5811_vm13 = vcmp.eq.f32.partialorder %v732_v7, inf  ;;  %v6837_v40 = vsel %vm6836_vm4, %v5599_v28, 0.0  ;;  %vm6838_vm0 = vnez %v6757_v22  ;;  %vm6839_vm11 = vcmask 64512   ;;  %vm779_vm10 = vmor %vm747_vm9, %vm763_vm5 }
  0x98   :  { %v668_v57 = vsel %vm6838_vm0, %v5760_v33, %v6837_v40  ;;  %4436 = vmatprep.mubr.msk.f32.mxu0 %vm6839_vm11, %v5815_v45  ;;  %v5833_v11 = vsel %vm778_vm2, 0.0, %v714_v8  ;;  %v733_v43 = vand.u32 2147483647, %v717_v55  ;;  %vm765_vm14 = vcmp.ne.f32.partialorder %v717_v55, %v717_v55  ;;  %vm6840_vm6 = vmmov %vm6839_vm11  ;;  %v6859_v8 = vld [vmem:[#allocation29_spill] sm:$0xff] }
  0x99   :  { %v734_v63 = vand.u32 2147483647, %v718_v31  ;;  %4437 = vmatmul.mubr.msk.f32.vlgmr.msra.gmra.mrb[0].mxu0 %vm6840_vm6, %v5833_v11  ;;  %v5843_v22 = vsel %vm779_vm10, 0.0, %v715_v5  ;;  %vm6841_vm3 = vcmp.ne.f32.partialorder %v716_v1, %v716_v1  ;;  %vm766_vm4 = vcmp.ne.f32.partialorder %v718_v31, %v718_v31  ;;  %vm6845_vm0 = vmmov %vm6840_vm6 }
  0x9a   :  { %vm780_vm2 = vmor %vm5811_vm13, %vm6841_vm3  ;;  %vm6842_vm9 = vcmp.lt.s32.totalorder %v5577_v26, 6  ;;  %4458 = vmatpush3.msra.mxu0 %v6844_v56  ;;  %4439 = vmatprep.mubr.msk.f32.mxu0 %vm6845_vm0, %v5843_v22  ;;  %vm749_vm11 = vcmp.eq.f32.partialorder %v733_v43, inf  ;;  %v6847_v10 = vsel %vm6811_vm7, %v5599_v28, 0.0  ;;  %vm6851_vm7 = vcmp.lt.s32.totalorder %v5577_v26, 6 }
  0x9b   :  { %v719_v50 = vsel %vm6842_vm9, %v698_v29, %v5235_v61  ;;  %vm6843_vm5 = vmmov %vm6842_vm9  ;;  %v5857_v36 = vsel %vm780_vm2, 0.0, %v716_v1  ;;  %vm750_vm10 = vcmp.eq.f32.partialorder %v734_v63, inf  ;;  %v6846_v61 = vsub.f32 %v5289_v53, %v5694_v4  ;;  %4480 = vmatprep.subr.mxu0 %v5839_v48 }
  0x9c   :  { %v720_v6 = vsel %vm6843_vm5, %v699_v34, %v5256_v46  ;;  %v735_v13 = vand.u32 2147483647, %v719_v50  ;;  %vm781_vm13 = vmor %vm749_vm11, %vm765_vm14  ;;  %vm767_vm6 = vcmp.ne.f32.partialorder %v719_v50, %v719_v50  ;;  %vm6848_vm14 = vnez %v6760_v38 }
  0x9d   :  { %v736_v19 = vand.u32 2147483647, %v720_v6  ;;  %vm768_vm3 = vcmp.ne.f32.partialorder %v720_v6, %v720_v6  ;;  %v700_v20 = vmul.f32 %v6846_v61, %v668_v57  ;;  %v5864_v46 = vsel %vm781_vm13, 0.0, %v717_v55  ;;  %vm782_vm9 = vmor %vm750_vm10, %vm766_vm4 }
  0x9e   :  { %vm751_vm2 = vcmp.eq.f32.partialorder %v735_v13, inf  ;;  %v669_v30 = vsel %vm6848_vm14, %v5760_v33, %v6847_v10  ;;  %v6849_v4 = vsel %vm6817_vm8, %v5599_v28, 0.0  ;;  %vm6850_vm5 = vmmov %vm6845_vm0  ;;  %v5883_v21 = vsel %vm782_vm9, 0.0, %v718_v31  ;;  %v6872_v31 = vld [vmem:[#allocation31_spill] sm:$0xff]  ;;  %v6883_v13 = vld [vmem:[#allocation26_spill] sm:$0xff] }
  0x9f   :  { %v670_v18 = vsel %vm5491_vm12, %v5760_v33, %v6849_v4  ;;  %4440 = vmatmul.mubr.msk.f32.gmra.mrb[2].mxu0 %vm6850_vm5, %v5857_v36  ;;  %vm783_vm4 = vmor %vm751_vm2, %vm767_vm6  ;;  %vm752_vm0 = vcmp.eq.f32.partialorder %v736_v19, inf  ;;  %v721_v38 = vsel %vm6851_vm7, %v700_v20, %v5289_v53  ;;  %v701_v2 = vmul.f32 %v6852_v9, %v669_v30  ;;  %v6889_v10 = vld [vmem:[#allocation23_spill] sm:$0xff]  ;;  %v6892_v4 = vld [vmem:[#allocation32_spill] sm:$0xff] }
  0xa0   :  { %vm6853_vm8 = vmmov %vm6850_vm5  ;;  %v5893_v24 = vsel %vm783_vm4, 0.0, %v719_v50  ;;  %v737_v62 = vand.u32 2147483647, %v721_v38  ;;  %vm769_vm11 = vcmp.ne.f32.partialorder %v721_v38, %v721_v38  ;;  %v6855_v32 = vsub.f32 %v6818_v58, %v6854_v54 }
  0xa1   :  { %4442 = vmatprep.mubr.msk.f32.mxu0 %vm6853_vm8, %v5864_v46  ;;  %vm784_vm12 = vmor %vm752_vm0, %vm768_vm3  ;;  %v6858_v47 = vsel %vm6792_vm15, %v5599_v28, 0.0  ;;  %vm6860_vm13 = vnez %v6859_v8  ;;  %v6862_v39 = vsel %vm6794_vm1, %v5599_v28, 0.0  ;;  %vm6864_vm6 = vnez %v6863_v60 }
  0xa2   :  { %v702_v17 = vmul.f32 %v6855_v32, %v670_v18  ;;  %v5899_v52 = vsel %vm784_vm12, 0.0, %v720_v6  ;;  %vm6856_vm10 = vmmov %vm6851_vm7  ;;  %v671_v5 = vsel %vm6860_vm13, %v5760_v33, %v6858_v47  ;;  %v672_v3 = vsel %vm6864_vm6, %v5760_v33, %v6862_v39 }
  0xa3   :  { %v722_v53 = vsel %vm6856_vm10, %v701_v2, %v5304_v42  ;;  %vm753_vm3 = vcmp.eq.f32.partialorder %v737_v62, inf  ;;  %vm6865_vm15 = vmmov %vm6851_vm7  ;;  %v6867_v16 = vsub.f32 %v6819_v14, %v5718_v23  ;;  %v6868_v29 = vsub.f32 %v6820_v51, %v5723_v44  ;;  %v6876_v44 = vld [vmem:[#allocation27_spill] sm:$0xff] }
  0xa4   :  { %v738_v42 = vand.u32 2147483647, %v722_v53  ;;  %vm770_vm9 = vcmp.ne.f32.partialorder %v722_v53, %v722_v53  ;;  %v723_v7 = vsel %vm6865_vm15, %v702_v17, %v6818_v58  ;;  %vm6866_vm2 = vmmov %vm6850_vm5  ;;  %vm6870_vm0 = vnez %v6795_v37 }
  0xa5   :  { %4443 = vmatmul.mubr.msk.f32.gmra.mrb[4].mxu0 %vm6866_vm2, %v5883_v21  ;;  %vm785_vm14 = vmor %vm753_vm3, %vm769_vm11  ;;  %v739_v15 = vand.u32 2147483647, %v723_v7  ;;  %vm771_vm1 = vcmp.ne.f32.partialorder %v723_v7, %v723_v7  ;;  %v703_v25 = vmul.f32 %v6867_v16, %v671_v5  ;;  %v704_v34 = vmul.f32 %v6868_v29, %v672_v3 }
  0xa6   :  { %vm6869_vm5 = vmmov %vm6866_vm2  ;;  %v5935_v58 = vsel %vm785_vm14, 0.0, %v721_v38  ;;  %vm754_vm4 = vcmp.eq.f32.partialorder %v738_v42, inf  ;;  %v6871_v55 = vsel %vm6870_vm0, %v5599_v28, 0.0  ;;  %vm6873_vm7 = vnez %v6872_v31 }
  0xa7   :  { %4445 = vmatprep.mubr.msk.f32.mxu0 %vm6869_vm5, %v5893_v24  ;;  %v673_v40 = vsel %vm6873_vm7, %v5760_v33, %v6871_v55  ;;  %vm6874_vm8 = vnez %v6822_v12  ;;  %vm6877_vm12 = vnez %v6876_v44  ;;  %vm786_vm11 = vmor %vm754_vm4, %vm770_vm9  ;;  %vm755_vm10 = vcmp.eq.f32.partialorder %v739_v15, inf  ;;  %v4201_v15 = vld [vmem:[%s6540_s2] ss:$0 sm:$0xff] }
  0xa8   :  { %v6875_v23 = vsel %vm6874_vm8, %v5599_v28, 0.0  ;;  %vm6878_vm13 = vmmov %vm6865_vm15  ;;  %v6880_v63 = vsub.f32 %v6821_v41, %v5728_v49  ;;  %v690_v19 = vsub.f32 %v6883_v13, %v5773_v59  ;;  %v3898_v9 = vstv %s5923_s19  ;;  %s4967_s19 = smov 96  }
  0xa9   :  { %v659_v57 = vsel %vm6877_vm12, %v5760_v33, %v6875_v23  ;;  %v724_v37 = vsel %vm6878_vm13, %v703_v25, %v6819_v14  ;;  %vm6879_vm6 = vmmov %vm6878_vm13  ;;  %v5968_v14 = vsel %vm786_vm11, 0.0, %v722_v53  ;;  %vm6890_vm12 = vnez %v6889_v10 }
  0xaa   :  { %v725_v43 = vsel %vm6879_vm6, %v704_v34, %v6820_v51  ;;  %v705_v12 = vmul.f32 %v6880_v63, %v673_v40  ;;  %vm5960_vm3 = vmor %vm755_vm10, %vm771_vm1  ;;  %v740_v6 = vand.u32 2147483647, %v724_v37  ;;  %vm772_vm15 = vcmp.ne.f32.partialorder %v724_v37, %v724_v37 }
  0xab   :  { %v741_v56 = vand.u32 2147483647, %v725_v43  ;;  %vm6884_vm9 = vmmov %vm6866_vm2  ;;  %vm773_vm2 = vcmp.ne.f32.partialorder %v725_v43, %v725_v43  ;;  %v6886_v51 = vsub.f32 %v6824_v0, %v5738_v27  ;;  %v5982_v20 = vsel %vm5960_vm3, 0.0, %v723_v7 }
  0xac   :  { %4446 = vmatmul.mubr.msk.f32.gmra.mrb[6].mxu0 %vm6884_vm9, %v5899_v52  ;;  %vm6885_vm14 = vmmov %vm6879_vm6  ;;  %v6891_v30 = vsel %vm6890_vm12, %v5599_v28, 0.0  ;;  %vm6893_vm11 = vnez %v6892_v4  ;;  %v6895_v62 = vstv %s5569_s0  ;;  %v3902_v1 = vstv %s5978_s20  ;;  %s4968_s20 = smov 32  }
  0xad   :  { %v726_v49 = vsel %vm6885_vm14, %v705_v12, %v6821_v41  ;;  %v691_v61 = vmul.f32 %v6886_v51, %v659_v57  ;;  %vm6887_vm1 = vmmov %vm6869_vm5  ;;  %vm756_vm5 = vcmp.eq.f32.partialorder %v740_v6, inf  ;;  %vm757_vm4 = vcmp.eq.f32.partialorder %v741_v56, inf }
  0xae   :  { %4448 = vmatprep.mubr.msk.f32.mxu0 %vm6887_vm1, %v5935_v58  ;;  %v742_v59 = vand.u32 2147483647, %v726_v49  ;;  %vm774_vm0 = vcmp.ne.f32.partialorder %v726_v49, %v726_v49  ;;  %vm788_vm7 = vmor %vm756_vm5, %vm772_vm15  ;;  %v3894_v41 = vstv %s5918_s1  ;;  %v674_v18 = vsel %vm6893_vm11, %v5760_v33, %v6891_v30 }
  0xaf   :  { %vm6888_vm8 = vmmov %vm6879_vm6  ;;  %v804_v38 = vsel %vm788_vm7, 0.0, %v724_v37  ;;  %v706_v28 = vmul.f32 %v690_v19, %v674_v18  ;;  %v4966_v7 = vmov 0.0  }
  0xb0   :  { %v712_v27 = vsel %vm6888_vm8, %v691_v61, %v6824_v0  ;;  %vm789_vm10 = vmor %vm757_vm4, %vm773_vm2  ;;  %vm758_vm13 = vcmp.eq.f32.partialorder %v742_v59, inf  ;;  %v3891_v54 = vmul.f32 %v6895_v62, %v804_v38 }
  0xb1   :  { %v728_v2 = vand.u32 2147483647, %v712_v27  ;;  %vm6894_vm6 = vmmov %vm6887_vm1  ;;  %v805_v0 = vsel %vm789_vm10, 0.0, %v725_v43  ;;  %vm760_vm15 = vcmp.ne.f32.partialorder %v712_v27, %v712_v27 }
  0xb2   :  { %4449 = vmatmul.mubr.msk.f32.gmra.mrb[8].mxu0 %vm6894_vm6, %v5968_v14  ;;  %vm790_vm3 = vmor %vm758_vm13, %vm774_vm0  ;;  %v3895_v33 = vmul.f32 %v3894_v41, %v805_v0 }
  0xb3   :  { %vm6896_vm9 = vmmov %vm6887_vm1  ;;  %v806_v32 = vsel %vm790_vm3, 0.0, %v726_v49  ;;  %vm744_vm2 = vcmp.eq.f32.partialorder %v728_v2, inf }
  0xb4   :  { %4451 = vmatprep.mubr.msk.f32.mxu0 %vm6896_vm9, %v5982_v20  ;;  %v3899_v17 = vmul.f32 %v3898_v9, %v806_v32  ;;  %vm6897_vm14 = vmmov %vm6888_vm8  ;;  %v3896_v35 = vadd.f32 %v3895_v33, %v3891_v54  ;;  %vm808_vm8 = vcmask 48128  }
  0xb5   :  { %v727_v53 = vsel %vm6897_vm14, %v706_v28, %v6883_v13  ;;  %vm6008_vm1 = vmor %vm744_vm2, %vm760_vm15 }
  0xb6   :  { %v743_v8 = vand.u32 2147483647, %v727_v53  ;;  %vm775_vm5 = vcmp.ne.f32.partialorder %v727_v53, %v727_v53  ;;  %vm6900_vm4 = vmmov %vm6894_vm6  ;;  %v3900_v5 = vadd.f32 %v3899_v17, %v3896_v35  ;;  %v792_v39 = vsel %vm6008_vm1, 0.0, %v712_v27 }
  0xb7   :  { %4452 = vmatmul.mubr.msk.f32.gmra.mrb[10].mxu0 %vm6900_vm4, %v804_v38  ;;  %vm6901_vm0 = vmmov %vm6900_vm4 }
  0xb8   :  { %4454 = vmatprep.mubr.msk.f32.mxu0 %vm6901_vm0, %v805_v0  ;;  %vm759_vm7 = vcmp.eq.f32.partialorder %v743_v8, inf  ;;  %vm6902_vm11 = vmmov %vm6901_vm0 }
  0xb9   :  { %vm791_vm12 = vmor %vm759_vm7, %vm775_vm5 }
  0xba   :  { %v807_v26 = vsel %vm791_vm12, 0.0, %v727_v53  ;;  %vm6903_vm10 = vmmov %vm6901_vm0  ;;  %v4202_v53 = vld [vmem:[%s6543_s5] ss:$0 sm:$0xff] }
  0xbb   :  { %4455 = vmatmul.mubr.msk.f32.gmra.mrb[12].mxu0 %vm6902_vm11, %v806_v32  ;;  %809 = vst.msk [vmem:[%s6554_s16] sm:$0xff] %vm808_vm8, %v807_v26  ;;  %v3903_v60 = vmul.f32 %v3902_v1, %v807_v26  ;;  %vm6904_vm13 = vmmov %vm6901_vm0 }
  0xbc   :  { %4459 = vmatprep.mubr.msk.f32.mxu0 %vm6903_vm10, %v792_v39  ;;  %vm6905_vm6 = vmmov %vm6901_vm0 }
  0xbd   :  { %v6023_v3 = vadd.f32 %v3903_v60, %v3900_v5  ;;  %vm6906_vm3 = vmmov %vm6901_vm0 }
  0xbe   :  { %vm6907_vm15 = vmmov %vm6901_vm0 }
  0xbf   :  { %4460 = vmatmul.mubr.msk.f32.vlgmr.msra.gmra.mrb[0].mxu0 %vm6904_vm13, %v5815_v45  ;;  %vm6908_vm9 = vmmov %vm6901_vm0  ;;  %v1317_v45 = vld [vmem:[%s6541_s3] sm:$0xff] }
  0xc0   :  { %4481 = vmatpush3.msra.mxu0 %v5839_v48  ;;  %4462 = vmatprep.mubr.msk.f32.mxu0 %vm6905_vm6, %v5833_v11  ;;  %vm6909_vm2 = vmmov %vm6901_vm0 }
  0xc1   :  { %vm6910_vm14 = vmmov %vm6901_vm0 }
  0xc2   :  { %vm6911_vm1 = vmmov %vm6901_vm0 }
  0xc3   :  { %4463 = vmatmul.mubr.msk.f32.gmra.mrb[2].mxu0 %vm6906_vm3, %v5843_v22  ;;  %vm6912_vm5 = vmmov %vm6901_vm0 }
  0xc4   :  { %4465 = vmatprep.mubr.msk.f32.mxu0 %vm6907_vm15, %v5857_v36  ;;  %vm6913_vm4 = vmmov %vm6901_vm0 }
  0xc5   :  { %vm6914_vm7 = vmmov %vm6901_vm0 }
  0xc6   :  { %vm6915_vm12 = vmmov %vm6901_vm0 }
  0xc7   :  { %4466 = vmatmul.mubr.msk.f32.gmra.mrb[4].mxu0 %vm6908_vm9, %v5864_v46  ;;  %vm6916_vm11 = vmmov %vm6901_vm0 }
  0xc8   :  { %4468 = vmatprep.mubr.msk.f32.mxu0 %vm6909_vm2, %v5883_v21  ;;  %vm6917_vm10 = vmmov %vm6901_vm0 }
  0xc9   :  { %vm6918_vm13 = vmmov %vm6901_vm0 }
  0xca   :  { %vm6919_vm6 = vmmov %vm6901_vm0 }
  0xcb   :  { %4469 = vmatmul.mubr.msk.f32.gmra.mrb[6].mxu0 %vm6910_vm14, %v5893_v24  ;;  %vm6920_vm3 = vmmov %vm6901_vm0 }
  0xcc   :  { %4471 = vmatprep.mubr.msk.f32.mxu0 %vm6911_vm1, %v5899_v52  ;;  %vm6921_vm15 = vmmov %vm6901_vm0 }
  0xcd   :  { %vm6922_vm9 = vmmov %vm6901_vm0 }
  0xce   :  { %vm6923_vm2 = vmmov %vm6901_vm0 }
  0xcf   :  { %4472 = vmatmul.mubr.msk.f32.gmra.mrb[8].mxu0 %vm6912_vm5, %v5935_v58  ;;  %vm6924_vm14 = vmmov %vm6901_vm0 }
  0xd0   :  { %4474 = vmatprep.mubr.msk.f32.mxu0 %vm6913_vm4, %v5968_v14  ;;  %vm6925_vm1 = vmmov %vm6901_vm0 }
  0xd1   :  { %vm6926_vm5 = vmmov %vm6901_vm0 }
  0xd2   :  { %vm6927_vm4 = vmmov %vm6901_vm0 }
  0xd3   :  { %4475 = vmatmul.mubr.msk.f32.gmra.mrb[10].mxu0 %vm6901_vm0, %v5982_v20 }
  0xd4   :  { %4477 = vmatprep.mubr.msk.f32.mxu0 %vm6914_vm7, %v804_v38  ;;  %vm6928_vm7 = vmmov %vm6901_vm0 }
  0xd7   :  { %4478 = vmatmul.mubr.msk.f32.gmra.mrb[12].mxu0 %vm6915_vm12, %v805_v0  ;;  %vm4965_vm12 = vmmov 0  }
  0xd8   :  { %4482 = vmatprep.mubr.msk.f32.mxu0 %vm6916_vm11, %v5833_v11  ;;  %v1318_v11 = vld [vmem:[%s6541_s3 + $0x8] sm:$0xff]  ;;  %vm1326_vm11 = vcmask 130048  }
  0xd9   :  { %v4698_v48 = vpack.c.bf16 %v1318_v11, %v1317_v45 }
  0xdb   :  { %4483 = vmatmul.mubr.msk.f32.vlgmr.msra.gmra.mrb[0].mxu0 %vm6917_vm10, %v5843_v22  ;;  %4699 = vmatprep.subr.bf16.mxu1 %v4698_v48  ;;  %v1504_v22 = vld [vmem:[%s6545_s7] sm:$0xff]  ;;  %vm6929_vm10 = vmmov %vm6901_vm0 }
  0xdc   :  { %4485 = vmatprep.mubr.msk.f32.mxu0 %vm6918_vm13, %v5857_v36  ;;  %4701 = vmatpush3.bf16.msra.mxu1 %v4698_v48  ;;  %v1505_v36 = vld [vmem:[%s6545_s7 + $0x8] sm:$0xff]  ;;  %vm6930_vm13 = vmmov %vm6901_vm0 }
  0xdf   :  { %4486 = vmatmul.mubr.msk.f32.gmra.mrb[2].mxu0 %vm6919_vm6, %v5864_v46  ;;  %v4702_v46 = vpack.c.bf16 %v1505_v36, %v1504_v22  ;;  %vm6931_vm6 = vmmov %vm6901_vm0 }
  0xe0   :  { %4488 = vmatprep.mubr.msk.f32.mxu0 %vm6920_vm3, %v5883_v21  ;;  %v4964_v21 = vmov 0.0|0.0   ;;  %vm6932_vm3 = vmmov %vm6901_vm0 }
  0xe1   :  { %4703 = vmatprep.subr.bf16.mxu1 %v4702_v46  ;;  %4727 = vmatprep.subr.bf16.mxu0 %v4964_v21 }
  0xe3   :  { %4489 = vmatmul.mubr.msk.f32.gmra.mrb[4].mxu0 %vm6921_vm15, %v5893_v24  ;;  %v1646_v24 = vld [vmem:[%s6542_s4] sm:$0xff]  ;;  %vm6933_vm15 = vmmov %vm6901_vm0 }
  0xe4   :  { %4491 = vmatprep.mubr.msk.f32.mxu0 %vm6922_vm9, %v5899_v52  ;;  %v1647_v52 = vld [vmem:[%s6542_s4 + $0x8] sm:$0xff]  ;;  %vm6934_vm9 = vmmov %vm6901_vm0 }
  0xe5   :  { %v6093_v42 = vpack.c.bf16 %v1647_v52, %v1646_v24 }
  0xe7   :  { %4492 = vmatmul.mubr.msk.f32.gmra.mrb[6].mxu0 %vm6923_vm2, %v5935_v58  ;;  %vm6935_vm2 = vmmov %vm6901_vm0 }
  0xe8   :  { %4494 = vmatprep.mubr.msk.f32.mxu0 %vm6924_vm14, %v5968_v14  ;;  %4729 = vmatpush3.bf16.msra.mxu0 %v6093_v42  ;;  %vm6936_vm14 = vmmov %vm6901_vm0 }
  0xe9   :  { %4733 = vmatprep.subr.bf16.mxu0 %v4964_v21 }
  0xeb   :  { %4495 = vmatmul.mubr.msk.f32.gmra.mrb[8].mxu0 %vm6925_vm1, %v5982_v20  ;;  %vm6937_vm1 = vmmov %vm6901_vm0 }
  0xec   :  { %4497 = vmatprep.mubr.msk.f32.mxu0 %vm6926_vm5, %v804_v38  ;;  %vm6938_vm5 = vmmov %vm6901_vm0 }
  0xef   :  { %4498 = vmatmul.mubr.msk.f32.gmra.mrb[10].mxu0 %vm6927_vm4, %v805_v0  ;;  %vm6939_vm4 = vmmov %vm6901_vm0 }
  0xf0   :  { %4500 = vmatprep.mubr.msk.f32.mxu0 %vm6901_vm0, %v806_v32 }
  0xf3   :  { %4501 = vmatmul.mubr.msk.f32.gmra.mrb[12].mxu0 %vm6928_vm7, %v807_v26 }
  0xf4   :  { %4606 = vmatprep.mubr.msk.f32.mxu0 %vm4965_vm12, %v4966_v7 }
 0x1ae   :  { %v4484_v16 = vpop.f32.mrb[0].mxu0 }
 0x1af   :  { %v1290_v25 = vadd.f32 %v4484_v16, %v4201_v15  ;;  %v1199_v29 = vpop.f32.mrb[1].mxu0 }
 0x1b0   :  { %v1289_v34 = vadd.f32 %v4201_v15, %v1199_v29 }
 0x1b1   :  { %v1304_v31 = vmax.f32 %v1290_v25, 0.0 }
 0x1b2   :  { %v1303_v58 = vmax.f32 %v1289_v34, 0.0  ;;  %v4487_v55 = vpop.f32.mrb[2].mxu0 }
 0x1b3   :  { %v1292_v40 = vadd.f32 %v4487_v55, %v4201_v15  ;;  %v1209_v23 = vpop.f32.mrb[3].mxu0 }
 0x1b4   :  { %v1291_v44 = vadd.f32 %v4201_v15, %v1209_v23  ;;  %4507 = vmatprep.mubr.msk.f32.mxu1 %vm1326_vm11, %v1303_v58 }
 0x1b5   :  { %4508 = vmatmul.mubr.msk.f32.vlgmr.msra.gmra.mrb[0].mxu1 %vm1326_vm11, %v1304_v31  ;;  %v1306_v43 = vmax.f32 %v1292_v40, 0.0 }
 0x1b6   :  { %v1305_v57 = vmax.f32 %v1291_v44, 0.0  ;;  %4705 = vmatpush3.bf16.msra.mxu1 %v4702_v46  ;;  %v4490_v37 = vpop.f32.mrb[4].mxu0 }
 0x1b7   :  { %v1294_v63 = vadd.f32 %v4490_v37, %v4201_v15  ;;  %v1219_v12 = vpop.f32.mrb[5].mxu0  ;;  %4706 = vmatprep.subr.bf16.mxu1 %v4964_v21 }
 0x1b8   :  { %v1293_v50 = vadd.f32 %v4201_v15, %v1219_v12  ;;  %4510 = vmatprep.mubr.msk.f32.mxu1 %vm1326_vm11, %v1305_v57  ;;  %v6176_v12 = vld [vmem:[%s6547_s9] ss:$0 sm:$0xff] }
 0x1b9   :  { %4511 = vmatmul.mubr.msk.f32.gmra.mrb[2].mxu1 %vm1326_vm11, %v1306_v43  ;;  %v1308_v13 = vmax.f32 %v1294_v63, 0.0 }
 0x1ba   :  { %v1307_v6 = vmax.f32 %v1293_v50, 0.0  ;;  %v4493_v56 = vpop.f32.mrb[6].mxu0 }
 0x1bb   :  { %v1296_v19 = vadd.f32 %v4493_v56, %v4201_v15  ;;  %v1229_v14 = vpop.f32.mrb[7].mxu0 }
 0x1bc   :  { %v1295_v49 = vadd.f32 %v4201_v15, %v1229_v14  ;;  %4513 = vmatprep.mubr.msk.f32.mxu1 %vm1326_vm11, %v1307_v6 }
 0x1bd   :  { %4514 = vmatmul.mubr.msk.f32.gmra.mrb[4].mxu1 %vm1326_vm11, %v1308_v13  ;;  %v1310_v59 = vmax.f32 %v1296_v19, 0.0 }
 0x1be   :  { %v1309_v51 = vmax.f32 %v1295_v49, 0.0  ;;  %v4496_v61 = vpop.f32.mrb[8].mxu0 }
 0x1bf   :  { %v1298_v20 = vadd.f32 %v4496_v61, %v4201_v15  ;;  %v1239_v41 = vpop.f32.mrb[9].mxu0 }
 0x1c0   :  { %v1297_v27 = vadd.f32 %v4201_v15, %v1239_v41  ;;  %4516 = vmatprep.mubr.msk.f32.mxu1 %vm1326_vm11, %v1309_v51 }
 0x1c1   :  { %4517 = vmatmul.mubr.msk.f32.gmra.mrb[6].mxu1 %vm1326_vm11, %v1310_v59  ;;  %v1312_v4 = vmax.f32 %v1298_v20, 0.0 }
 0x1c2   :  { %v1311_v10 = vmax.f32 %v1297_v27, 0.0  ;;  %v4499_v30 = vpop.f32.mrb[10].mxu0 }
 0x1c3   :  { %v1300_v18 = vadd.f32 %v4499_v30, %v4201_v15  ;;  %v1249_v38 = vpop.f32.mrb[11].mxu0 }
 0x1c4   :  { %v1299_v9 = vadd.f32 %v4201_v15, %v1249_v38  ;;  %4519 = vmatprep.mubr.msk.f32.mxu1 %vm1326_vm11, %v1311_v10 }
 0x1c5   :  { %4520 = vmatmul.mubr.msk.f32.gmra.mrb[8].mxu1 %vm1326_vm11, %v1312_v4  ;;  %v1314_v54 = vmax.f32 %v1300_v18, 0.0 }
 0x1c6   :  { %v1313_v2 = vmax.f32 %v1299_v9, 0.0  ;;  %v4502_v62 = vpop.f32.mrb[12].mxu0 }
 0x1c7   :  { %v1302_v0 = vadd.f32 %v4502_v62, %v4201_v15  ;;  %v1259_v28 = vpop.f32.mrb[13].mxu0  ;;  %v6211_v62 = vld [vmem:[%s6544_s6] ss:$0 sm:$0xff] }
 0x1c8   :  { %v1301_v33 = vadd.f32 %v4201_v15, %v1259_v28  ;;  %4522 = vmatprep.mubr.msk.f32.mxu1 %vm1326_vm11, %v1313_v2 }
 0x1c9   :  { %4523 = vmatmul.mubr.msk.f32.gmra.mrb[10].mxu1 %vm1326_vm11, %v1314_v54  ;;  %v1316_v17 = vmax.f32 %v1302_v0, 0.0 }
 0x1ca   :  { %v1315_v32 = vmax.f32 %v1301_v33, 0.0 }
 0x1cc   :  { %4525 = vmatprep.mubr.msk.f32.mxu1 %vm1326_vm11, %v1315_v32 }
 0x1cd   :  { %4526 = vmatmul.mubr.msk.f32.gmra.mrb[12].mxu1 %vm1326_vm11, %v1316_v17 }
 0x1ce   :  { %4532 = vmatprep.mubr.msk.f32.mxu1 %vm1326_vm11, %v1303_v58 }
 0x1d1   :  { %4533 = vmatmul.mubr.msk.f32.vlgmr.msra.gmra.mrb[14].mxu1 %vm1326_vm11, %v1304_v31 }
 0x1d2   :  { %4708 = vmatpush3.bf16.msra.mxu1 %v6093_v42  ;;  %4535 = vmatprep.mubr.msk.f32.mxu1 %vm1326_vm11, %v1305_v57 }
 0x1d3   :  { %4709 = vmatprep.subr.bf16.mxu1 %v4964_v21 }
 0x1d5   :  { %4536 = vmatmul.mubr.msk.f32.gmra.mrb[16].mxu1 %vm1326_vm11, %v1306_v43 }
 0x1d6   :  { %4538 = vmatprep.mubr.msk.f32.mxu1 %vm1326_vm11, %v1307_v6 }
 0x1d9   :  { %4539 = vmatmul.mubr.msk.f32.gmra.mrb[18].mxu1 %vm1326_vm11, %v1308_v13 }
 0x1da   :  { %4541 = vmatprep.mubr.msk.f32.mxu1 %vm1326_vm11, %v1309_v51 }
 0x1dd   :  { %4542 = vmatmul.mubr.msk.f32.gmra.mrb[20].mxu1 %vm1326_vm11, %v1310_v59 }
 0x1de   :  { %4544 = vmatprep.mubr.msk.f32.mxu1 %vm1326_vm11, %v1311_v10 }
 0x1e1   :  { %4545 = vmatmul.mubr.msk.f32.gmra.mrb[22].mxu1 %vm1326_vm11, %v1312_v4 }
 0x1e2   :  { %4547 = vmatprep.mubr.msk.f32.mxu1 %vm1326_vm11, %v1313_v2 }
 0x1e5   :  { %4548 = vmatmul.mubr.msk.f32.gmra.mrb[24].mxu1 %vm1326_vm11, %v1314_v54 }
 0x1e6   :  { %4550 = vmatprep.mubr.msk.f32.mxu1 %vm1326_vm11, %v1315_v32 }
 0x1e9   :  { %4551 = vmatmul.mubr.msk.f32.gmra.mrb[26].mxu1 %vm1326_vm11, %v1316_v17 }
 0x1ea   :  { %4557 = vmatprep.mubr.msk.f32.mxu1 %vm4965_vm12, %v4966_v7 }
 0x1ed   :  { %4558 = vmatmul.mubr.f32.vlgmr.msra.gmra.mrb[28].mxu1 %v4966_v7 }
 0x1ee   :  { %4711 = vmatpush3.bf16.msra.mxu1 %v6093_v42  ;;  %4564 = vmatprep.mubr.msk.f32.mxu1 %vm4965_vm12, %v4966_v7 }
 0x1ef   :  { %4712 = vmatprep.subr.bf16.mxu1 %v4964_v21 }
 0x288   :  { %v4509_v35 = vpop.f32.mrb[0].mxu1 }
 0x289   :  { %v6143_v47 = vadd.f32 %v4509_v35, %v4202_v53  ;;  %v1435_v8 = vpop.f32.mrb[1].mxu1 }
 0x28a   :  { %v1436_v33 = vadd.f32 %v4202_v53, %v1435_v8 }
 0x28c   :  { %v4512_v5 = vpop.f32.mrb[2].mxu1 }
 0x28d   :  { %v6145_v1 = vadd.f32 %v4512_v5, %v4202_v53  ;;  %v1445_v39 = vpop.f32.mrb[3].mxu1 }
 0x28e   :  { %v6147_v26 = vadd.f32 %v4202_v53, %v1445_v39 }
 0x290   :  { %v4515_v60 = vpop.f32.mrb[4].mxu1 }
 0x291   :  { %v6149_v45 = vadd.f32 %v4515_v60, %v4202_v53  ;;  %v1455_v11 = vpop.f32.mrb[5].mxu1 }
 0x292   :  { %v6151_v48 = vadd.f32 %v4202_v53, %v1455_v11 }
 0x294   :  { %v4518_v22 = vpop.f32.mrb[6].mxu1 }
 0x295   :  { %v6153_v36 = vadd.f32 %v4518_v22, %v4202_v53  ;;  %v1465_v46 = vpop.f32.mrb[7].mxu1 }
 0x296   :  { %v6155_v24 = vadd.f32 %v4202_v53, %v1465_v46 }
 0x298   :  { %v4521_v52 = vpop.f32.mrb[8].mxu1 }
 0x299   :  { %v6157_v15 = vadd.f32 %v4521_v52, %v4202_v53  ;;  %v1475_v16 = vpop.f32.mrb[9].mxu1 }
 0x29a   :  { %v6159_v25 = vadd.f32 %v4202_v53, %v1475_v16 }
 0x29c   :  { %v4524_v29 = vpop.f32.mrb[10].mxu1 }
 0x29d   :  { %v6161_v34 = vadd.f32 %v4524_v29, %v4202_v53  ;;  %v1485_v58 = vpop.f32.mrb[11].mxu1 }
 0x29e   :  { %v6163_v55 = vadd.f32 %v4202_v53, %v1485_v58 }
 0x2a0   :  { %v4527_v31 = vpop.f32.mrb[12].mxu1 }
 0x2a1   :  { %v6165_v40 = vadd.f32 %v4527_v31, %v4202_v53  ;;  %v1495_v23 = vpop.f32.mrb[13].mxu1 }
 0x2a2   :  { %v6167_v44 = vadd.f32 %v4202_v53, %v1495_v23 }
 0x2a4   :  { %v4534_v57 = vpop.f32.mrb[14].mxu1 }
 0x2a5   :  { %v1579_v37 = vpop.f32.mrb[15].mxu1 }
 0x2a8   :  { %v6169_v43 = vpop.f32.mrb[16].mxu1 }
 0x2a9   :  { %v6171_v63 = vpop.f32.mrb[17].mxu1 }
 0x2ac   :  { %v4540_v50 = vpop.f32.mrb[18].mxu1 }
 0x2ad   :  { %v6179_v6 = vadd.f32 %v4540_v50, %v6176_v12  ;;  %v1597_v56 = vpop.f32.mrb[19].mxu1 }
 0x2ae   :  { %v6182_v13 = vadd.f32 %v6176_v12, %v1597_v56 }
 0x2b0   :  { %v4543_v19 = vpop.f32.mrb[20].mxu1 }
 0x2b1   :  { %v6185_v14 = vadd.f32 %v4543_v19, %v6176_v12  ;;  %v1607_v49 = vpop.f32.mrb[21].mxu1 }
 0x2b2   :  { %v6188_v51 = vadd.f32 %v6176_v12, %v1607_v49 }
 0x2b4   :  { %v4546_v61 = vpop.f32.mrb[22].mxu1 }
 0x2b5   :  { %v6191_v59 = vadd.f32 %v4546_v61, %v6176_v12  ;;  %v1617_v20 = vpop.f32.mrb[23].mxu1 }
 0x2b6   :  { %v6194_v41 = vadd.f32 %v6176_v12, %v1617_v20 }
 0x2b8   :  { %v4549_v27 = vpop.f32.mrb[24].mxu1 }
 0x2b9   :  { %v6197_v10 = vadd.f32 %v4549_v27, %v6176_v12  ;;  %v1627_v30 = vpop.f32.mrb[25].mxu1 }
 0x2ba   :  { %v6200_v4 = vadd.f32 %v6176_v12, %v1627_v30 }
 0x2bc   :  { %v4552_v18 = vpop.f32.mrb[26].mxu1 }
 0x2bd   :  { %v6203_v38 = vadd.f32 %v4552_v18, %v6176_v12  ;;  %v1637_v9 = vpop.f32.mrb[27].mxu1 }
 0x2be   :  { %v6206_v2 = vadd.f32 %v6176_v12, %v1637_v9 }
 0x2c0   :  { %v1726_v54 = vpop.f32.mrb[28].mxu1 }
 0x2c1   :  { %v1727_v0 = vadd.f32 %v6211_v62, %v1726_v54  ;;  %v4559_v28 = vpop.f32.mrb[29].mxu1 }
 0x2c3   :  { %1738 = vrot.lane.b32.xlu0 %v1727_v0, %s4967_s19  ;;  %v1730_v32 = vadd.f32 %v1727_v0, %v1436_v33 }
 0x2c5   :  { %v4233_v17 = vmul.f32 -1.442695, %v1730_v32 }
 0x2c7   :  { %4792 = vpow2.f32 %v4233_v17 }
 0x2d1   :  { %v4793_v35 = vpop.eup %4792 }
 0x2d2   :  { %v1734_v5 = vadd.f32 1.0, %v4793_v35 }
 0x2d4   :  { %4794 = vrcp.f32 %v1734_v5 }
 0x2de   :  { %v4795_v39 = vpop.eup %4794 }
 0x2df   :  { %v1748_v53 = vsub.f32 1.0, %v4795_v39  ;;  %v1754_v16 = vmul.f32 0.0, %v4795_v39 }
 0x335   :  { %v1739_v60 = vpop.permute.xlu0 %1738 }
 0x336   :  { %v1741_v11 = vmul.f32 %v4795_v39, %v1739_v60 }
 0x338   :  { %1743 = vrot.lane.b32.xlu0 %v1741_v11, %s4968_s20 }
 0x3aa   :  { %v1744_v22 = vpop.permute.xlu0 %1743 }
 0x3ab   :  { %v1746_v46 = vadd.f32 %v1744_v22, %v1436_v33 }
 0x3ad   :  { %4796 = vtanh.f32 %v1746_v46 }
 0x3b7   :  { %v4797_v52 = vpop.eup %4796 }
 0x3b8   :  { %1750 = vrot.lane.b32.xlu1 %v4797_v52, %s4969_s21 }
 0x42a   :  { %v1751_v8 = vpop.permute.xlu1 %1750 }
 0x42b   :  { %v1753_v29 = vmul.f32 %v1751_v8, %v1748_v53 }
 0x42d   :  { %v1755_v58 = vadd.f32 %v1754_v16, %v1753_v29 }
 0x42f   :  { %1757 = vrot.lane.b32.xlu1 %v1755_v58, %s4969_s21 }
 0x4a1   :  { %v1758_v31 = vpop.permute.xlu1 %1757 }
 0x4a2   :  { %4565 = vmatmul.mubr.msk.f32.vlgmr.msra.gmra.mrb[30].mxu1 %vm1326_vm11, %v1758_v31 }
 0x4a3   :  { %4714 = vmatpush3.bf16.msra.mxu1 %v6093_v42  ;;  %4571 = vmatprep.mubr.msk.f32.mxu1 %vm4965_vm12, %v4966_v7 }
 0x4a4   :  { %4715 = vmatprep.subr.bf16.mxu1 %v4964_v21 }
 0x575   :  { %v1827_v23 = vpop.f32.mrb[30].mxu1 }
 0x576   :  { %v1828_v57 = vadd.f32 %v6211_v62, %v1827_v23  ;;  %v4566_v37 = vpop.f32.mrb[31].mxu1 }
 0x578   :  { %1839 = vrot.lane.b32.xlu0 %v1828_v57, %s4967_s19  ;;  %v1831_v50 = vadd.f32 %v1828_v57, %v6143_v47 }
 0x57a   :  { %v4235_v56 = vmul.f32 -1.442695, %v1831_v50 }
 0x57c   :  { %4798 = vpow2.f32 %v4235_v56 }
 0x586   :  { %v4799_v19 = vpop.eup %4798 }
 0x587   :  { %v1835_v49 = vadd.f32 1.0, %v4799_v19 }
 0x589   :  { %4800 = vrcp.f32 %v1835_v49 }
 0x593   :  { %v4801_v61 = vpop.eup %4800 }
 0x594   :  { %v1849_v54 = vsub.f32 1.0, %v4801_v61  ;;  %v1855_v28 = vmul.f32 %v4801_v61, %v1755_v58 }
 0x5ea   :  { %v1840_v20 = vpop.permute.xlu0 %1839 }
 0x5eb   :  { %v1842_v27 = vmul.f32 %v4801_v61, %v1840_v20 }
 0x5ed   :  { %1844 = vrot.lane.b32.xlu1 %v1842_v27, %s4968_s20 }
 0x65f   :  { %v1845_v30 = vpop.permute.xlu1 %1844 }
 0x660   :  { %v1847_v18 = vadd.f32 %v1845_v30, %v6143_v47 }
 0x662   :  { %4802 = vtanh.f32 %v1847_v18 }
 0x66c   :  { %v4803_v9 = vpop.eup %4802 }
 0x66d   :  { %1851 = vrot.lane.b32.xlu0 %v4803_v9, %s4969_s21 }
 0x6df   :  { %v1852_v0 = vpop.permute.xlu0 %1851 }
 0x6e0   :  { %v1854_v33 = vmul.f32 %v1852_v0, %v1849_v54 }
 0x6e2   :  { %v1856_v32 = vadd.f32 %v1855_v28, %v1854_v33 }
 0x6e4   :  { %1858 = vrot.lane.b32.xlu1 %v1856_v32, %s4969_s21 }
 0x756   :  { %v1859_v17 = vpop.permute.xlu1 %1858 }
 0x757   :  { %4572 = vmatmul.mubr.msk.f32.vlgmr.msra.gmra.mrb[32].mxu1 %vm1326_vm11, %v1859_v17 }
 0x758   :  { %4717 = vmatpush3.bf16.msra.mxu1 %v6093_v42  ;;  %4578 = vmatprep.mubr.msk.f32.mxu1 %vm4965_vm12, %v4966_v7 }
 0x759   :  { %4718 = vmatprep.subr.bf16.mxu1 %v4964_v21 }
 0x82a   :  { %v1928_v47 = vpop.f32.mrb[32].mxu1 }
 0x82b   :  { %v1929_v35 = vadd.f32 %v6211_v62, %v1928_v47  ;;  %v4573_v5 = vpop.f32.mrb[33].mxu1 }
 0x82d   :  { %1940 = vrot.lane.b32.xlu0 %v1929_v35, %s4967_s19  ;;  %v1932_v39 = vadd.f32 %v1929_v35, %v6147_v26 }
 0x82f   :  { %v4237_v60 = vmul.f32 -1.442695, %v1932_v39 }
 0x831   :  { %4804 = vpow2.f32 %v4237_v60 }
 0x83b   :  { %v4805_v11 = vpop.eup %4804 }
 0x83c   :  { %v1936_v22 = vadd.f32 1.0, %v4805_v11 }
 0x83e   :  { %4806 = vrcp.f32 %v1936_v22 }
 0x848   :  { %v4807_v46 = vpop.eup %4806 }
 0x849   :  { %v1950_v58 = vsub.f32 1.0, %v4807_v46  ;;  %v1956_v23 = vmul.f32 %v4807_v46, %v1856_v32 }
 0x89f   :  { %v1941_v52 = vpop.permute.xlu0 %1940 }
 0x8a0   :  { %v1943_v53 = vmul.f32 %v4807_v46, %v1941_v52 }
 0x8a2   :  { %1945 = vrot.lane.b32.xlu1 %v1943_v53, %s4968_s20 }
 0x914   :  { %v1946_v8 = vpop.permute.xlu1 %1945 }
 0x915   :  { %v1948_v16 = vadd.f32 %v1946_v8, %v6147_v26 }
 0x917   :  { %4808 = vtanh.f32 %v1948_v16 }
 0x921   :  { %v4809_v29 = vpop.eup %4808 }
 0x922   :  { %1952 = vrot.lane.b32.xlu0 %v4809_v29, %s4969_s21 }
 0x994   :  { %v1953_v31 = vpop.permute.xlu0 %1952 }
 0x995   :  { %v1955_v57 = vmul.f32 %v1953_v31, %v1950_v58 }
 0x997   :  { %v1957_v37 = vadd.f32 %v1956_v23, %v1955_v57 }
 0x999   :  { %1959 = vrot.lane.b32.xlu1 %v1957_v37, %s4969_s21 }
 0xa0b   :  { %v1960_v50 = vpop.permute.xlu1 %1959 }
 0xa0c   :  { %4579 = vmatmul.mubr.msk.f32.vlgmr.msra.gmra.mrb[34].mxu1 %vm1326_vm11, %v1960_v50 }
 0xa0d   :  { %4720 = vmatpush3.bf16.msra.mxu1 %v6093_v42  ;;  %4585 = vmatprep.mubr.msk.f32.mxu1 %vm4965_vm12, %v4966_v7 }
 0xa0e   :  { %4721 = vmatprep.subr.bf16.mxu1 %v4964_v21 }
 0xadf   :  { %v2029_v26 = vpop.f32.mrb[34].mxu1 }
 0xae0   :  { %v2030_v56 = vadd.f32 %v6211_v62, %v2029_v26  ;;  %v4580_v19 = vpop.f32.mrb[35].mxu1 }
 0xae2   :  { %2041 = vrot.lane.b32.xlu0 %v2030_v56, %s4967_s19  ;;  %v2033_v49 = vadd.f32 %v2030_v56, %v6145_v1 }
 0xae4   :  { %v4239_v61 = vmul.f32 -1.442695, %v2033_v49 }
 0xae6   :  { %4810 = vpow2.f32 %v4239_v61 }
 0xaf0   :  { %v4811_v20 = vpop.eup %4810 }
 0xaf1   :  { %v2037_v27 = vadd.f32 1.0, %v4811_v20 }
 0xaf3   :  { %4812 = vrcp.f32 %v2037_v27 }
 0xafd   :  { %v4813_v30 = vpop.eup %4812 }
 0xafe   :  { %v2051_v33 = vsub.f32 1.0, %v4813_v30  ;;  %v2057_v17 = vmul.f32 %v4813_v30, %v1957_v37 }
 0xb54   :  { %v2042_v18 = vpop.permute.xlu0 %2041 }
 0xb55   :  { %v2044_v9 = vmul.f32 %v4813_v30, %v2042_v18 }
 0xb57   :  { %2046 = vrot.lane.b32.xlu1 %v2044_v9, %s4968_s20 }
 0xbc9   :  { %v2047_v54 = vpop.permute.xlu1 %2046 }
 0xbca   :  { %v2049_v0 = vadd.f32 %v2047_v54, %v6145_v1 }
 0xbcc   :  { %4814 = vtanh.f32 %v2049_v0 }
 0xbd6   :  { %v4815_v28 = vpop.eup %4814 }
 0xbd7   :  { %2053 = vrot.lane.b32.xlu0 %v4815_v28, %s4969_s21 }
 0xc49   :  { %v2054_v32 = vpop.permute.xlu0 %2053 }
 0xc4a   :  { %v2056_v47 = vmul.f32 %v2054_v32, %v2051_v33 }
 0xc4c   :  { %v2058_v35 = vadd.f32 %v2057_v17, %v2056_v47 }
 0xc4e   :  { %2060 = vrot.lane.b32.xlu1 %v2058_v35, %s4969_s21 }
 0xcc0   :  { %v2061_v5 = vpop.permute.xlu1 %2060 }
 0xcc1   :  { %4586 = vmatmul.mubr.msk.f32.vlgmr.msra.gmra.mrb[36].mxu1 %vm1326_vm11, %v2061_v5 }
 0xcc2   :  { %4723 = vmatpush3.bf16.msra.mxu1 %v6093_v42  ;;  %4592 = vmatprep.mubr.msk.f32.mxu1 %vm4965_vm12, %v4966_v7 }
 0xcc3   :  { %4724 = vmatprep.subr.bf16.mxu1 %v4964_v21 }
 0xd94   :  { %v2130_v1 = vpop.f32.mrb[36].mxu1 }
 0xd95   :  { %v2131_v39 = vadd.f32 %v6211_v62, %v2130_v1  ;;  %v4587_v60 = vpop.f32.mrb[37].mxu1 }
 0xd97   :  { %2142 = vrot.lane.b32.xlu0 %v2131_v39, %s4967_s19  ;;  %v2134_v11 = vadd.f32 %v2131_v39, %v6151_v48 }
 0xd99   :  { %v4241_v22 = vmul.f32 -1.442695, %v2134_v11 }
 0xd9b   :  { %4816 = vpow2.f32 %v4241_v22 }
 0xda5   :  { %v4817_v46 = vpop.eup %4816 }
 0xda6   :  { %v2138_v52 = vadd.f32 1.0, %v4817_v46 }
 0xda8   :  { %4818 = vrcp.f32 %v2138_v52 }
 0xdb2   :  { %v4819_v53 = vpop.eup %4818 }
 0xdb3   :  { %v2152_v23 = vsub.f32 1.0, %v4819_v53  ;;  %v2158_v37 = vmul.f32 %v4819_v53, %v2058_v35 }
 0xe09   :  { %v2143_v8 = vpop.permute.xlu0 %2142 }
 0xe0a   :  { %v2145_v16 = vmul.f32 %v4819_v53, %v2143_v8 }
 0xe0c   :  { %2147 = vrot.lane.b32.xlu1 %v2145_v16, %s4968_s20 }
 0xe7e   :  { %v2148_v29 = vpop.permute.xlu1 %2147 }
 0xe7f   :  { %v2150_v58 = vadd.f32 %v2148_v29, %v6151_v48 }
 0xe81   :  { %4820 = vtanh.f32 %v2150_v58 }
 0xe8b   :  { %v4821_v31 = vpop.eup %4820 }
 0xe8c   :  { %2154 = vrot.lane.b32.xlu0 %v4821_v31, %s4969_s21 }
 0xefe   :  { %v2155_v57 = vpop.permute.xlu0 %2154 }
 0xeff   :  { %v2157_v50 = vmul.f32 %v2155_v57, %v2152_v23 }
 0xf01   :  { %v2159_v26 = vadd.f32 %v2158_v37, %v2157_v50 }
 0xf03   :  { %2161 = vrot.lane.b32.xlu1 %v2159_v26, %s4969_s21 }
 0xf75   :  { %v2162_v56 = vpop.permute.xlu1 %2161 }
 0xf76   :  { %4593 = vmatmul.mubr.msk.f32.vlgmr.msra.gmra.mrb[38].mxu1 %vm1326_vm11, %v2162_v56 }
 0xf77   :  { %4726 = vmatpush3.bf16.msra.mxu1 %v6093_v42  ;;  %4599 = vmatprep.mubr.msk.f32.mxu1 %vm4965_vm12, %v4966_v7 }
 0xf78   :  { %4730 = vmatprep.subr.bf16.mxu1 %v4964_v21 }
0x1049   :  { %v2231_v48 = vpop.f32.mrb[38].mxu1 }
0x104a   :  { %v2232_v19 = vadd.f32 %v6211_v62, %v2231_v48  ;;  %v4594_v49 = vpop.f32.mrb[39].mxu1 }
0x104c   :  { %2243 = vrot.lane.b32.xlu0 %v2232_v19, %s4967_s19  ;;  %v2235_v61 = vadd.f32 %v2232_v19, %v6149_v45 }
0x104e   :  { %v4243_v20 = vmul.f32 -1.442695, %v2235_v61 }
0x1050   :  { %4822 = vpow2.f32 %v4243_v20 }
0x105a   :  { %v4823_v27 = vpop.eup %4822 }
0x105b   :  { %v2239_v30 = vadd.f32 1.0, %v4823_v27 }
0x105d   :  { %4824 = vrcp.f32 %v2239_v30 }
0x1067   :  { %v4825_v18 = vpop.eup %4824 }
0x1068   :  { %v2253_v32 = vsub.f32 1.0, %v4825_v18  ;;  %v2259_v47 = vmul.f32 %v4825_v18, %v2159_v26 }
0x10be   :  { %v2244_v9 = vpop.permute.xlu0 %2243 }
0x10bf   :  { %v2246_v54 = vmul.f32 %v4825_v18, %v2244_v9 }
0x10c1   :  { %2248 = vrot.lane.b32.xlu1 %v2246_v54, %s4968_s20 }
0x1133   :  { %v2249_v0 = vpop.permute.xlu1 %2248 }
0x1134   :  { %v2251_v28 = vadd.f32 %v2249_v0, %v6149_v45 }
0x1136   :  { %4826 = vtanh.f32 %v2251_v28 }
0x1140   :  { %v4827_v33 = vpop.eup %4826 }
0x1141   :  { %2255 = vrot.lane.b32.xlu0 %v4827_v33, %s4969_s21 }
0x11b3   :  { %v2256_v17 = vpop.permute.xlu0 %2255 }
0x11b4   :  { %v2258_v35 = vmul.f32 %v2256_v17, %v2253_v32 }
0x11b6   :  { %v2260_v5 = vadd.f32 %v2259_v47, %v2258_v35 }
0x11b8   :  { %2262 = vrot.lane.b32.xlu1 %v2260_v5, %s4969_s21 }
0x122a   :  { %v2263_v1 = vpop.permute.xlu1 %2262 }
0x122b   :  { %4600 = vmatmul.mubr.msk.f32.vlgmr.msra.gmra.mrb[40].mxu1 %vm1326_vm11, %v2263_v1 }
0x122c   :  { %4732 = vmatpush3.bf16.msra.mxu1 %v6093_v42  ;;  %4613 = vmatprep.mubr.msk.f32.mxu1 %vm4965_vm12, %v4966_v7 }
0x122d   :  { %4736 = vmatprep.subr.bf16.mxu1 %v4964_v21 }
0x12fe   :  { %v2332_v45 = vpop.f32.mrb[40].mxu1 }
0x12ff   :  { %v2333_v39 = vadd.f32 %v6211_v62, %v2332_v45  ;;  %v4601_v60 = vpop.f32.mrb[41].mxu1 }
0x1301   :  { %2344 = vrot.lane.b32.xlu0 %v2333_v39, %s4967_s19  ;;  %v2336_v11 = vadd.f32 %v2333_v39, %v6155_v24 }
0x1303   :  { %v4245_v22 = vmul.f32 -1.442695, %v2336_v11 }
0x1305   :  { %4828 = vpow2.f32 %v4245_v22 }
0x130f   :  { %v4829_v46 = vpop.eup %4828 }
0x1310   :  { %v2340_v52 = vadd.f32 1.0, %v4829_v46 }
0x1312   :  { %4830 = vrcp.f32 %v2340_v52 }
0x131c   :  { %v4831_v53 = vpop.eup %4830 }
0x131d   :  { %v2354_v23 = vsub.f32 1.0, %v4831_v53  ;;  %v2360_v37 = vmul.f32 %v4831_v53, %v2260_v5 }
0x1373   :  { %v2345_v8 = vpop.permute.xlu0 %2344 }
0x1374   :  { %v2347_v16 = vmul.f32 %v4831_v53, %v2345_v8 }
0x1376   :  { %2349 = vrot.lane.b32.xlu1 %v2347_v16, %s4968_s20 }
0x13e8   :  { %v2350_v29 = vpop.permute.xlu1 %2349 }
0x13e9   :  { %v2352_v58 = vadd.f32 %v2350_v29, %v6155_v24 }
0x13eb   :  { %4832 = vtanh.f32 %v2352_v58 }
0x13f5   :  { %v4833_v31 = vpop.eup %4832 }
0x13f6   :  { %2356 = vrot.lane.b32.xlu0 %v4833_v31, %s4969_s21 }
0x1468   :  { %v2357_v57 = vpop.permute.xlu0 %2356 }
0x1469   :  { %v2359_v50 = vmul.f32 %v2357_v57, %v2354_v23 }
0x146b   :  { %v2361_v26 = vadd.f32 %v2360_v37, %v2359_v50 }
0x146d   :  { %2363 = vrot.lane.b32.xlu1 %v2361_v26, %s4969_s21 }
0x14df   :  { %v2364_v56 = vpop.permute.xlu1 %2363 }
0x14e0   :  { %4607 = vmatmul.mubr.msk.f32.vlgmr.msra.gmra.mrb[14].mxu0 %vm1326_vm11, %v2364_v56 }
0x14e1   :  { %4735 = vmatpush3.bf16.msra.mxu0 %v6093_v42  ;;  %4620 = vmatprep.mubr.msk.f32.mxu0 %vm4965_vm12, %v4966_v7 }
0x14e2   :  { %4739 = vmatprep.subr.bf16.mxu0 %v4964_v21 }
0x15b3   :  { %v2433_v24 = vpop.f32.mrb[14].mxu0 }
0x15b4   :  { %v2434_v48 = vadd.f32 %v6211_v62, %v2433_v24  ;;  %v4608_v19 = vpop.f32.mrb[15].mxu0 }
0x15b6   :  { %2445 = vrot.lane.b32.xlu0 %v2434_v48, %s4967_s19  ;;  %v2437_v49 = vadd.f32 %v2434_v48, %v6153_v36 }
0x15b8   :  { %v4247_v61 = vmul.f32 -1.442695, %v2437_v49 }
0x15ba   :  { %4834 = vpow2.f32 %v4247_v61 }
0x15c4   :  { %v4835_v20 = vpop.eup %4834 }
0x15c5   :  { %v2441_v27 = vadd.f32 1.0, %v4835_v20 }
0x15c7   :  { %4836 = vrcp.f32 %v2441_v27 }
0x15d1   :  { %v4837_v30 = vpop.eup %4836 }
0x15d2   :  { %v2455_v33 = vsub.f32 1.0, %v4837_v30  ;;  %v2461_v17 = vmul.f32 %v4837_v30, %v2361_v26 }
0x1628   :  { %v2446_v18 = vpop.permute.xlu0 %2445 }
0x1629   :  { %v2448_v9 = vmul.f32 %v4837_v30, %v2446_v18 }
0x162b   :  { %2450 = vrot.lane.b32.xlu1 %v2448_v9, %s4968_s20 }
0x169d   :  { %v2451_v54 = vpop.permute.xlu1 %2450 }
0x169e   :  { %v2453_v0 = vadd.f32 %v2451_v54, %v6153_v36 }
0x16a0   :  { %4838 = vtanh.f32 %v2453_v0 }
0x16aa   :  { %v4839_v28 = vpop.eup %4838 }
0x16ab   :  { %2457 = vrot.lane.b32.xlu0 %v4839_v28, %s4969_s21 }
0x171d   :  { %v2458_v32 = vpop.permute.xlu0 %2457 }
0x171e   :  { %v2460_v47 = vmul.f32 %v2458_v32, %v2455_v33 }
0x1720   :  { %v2462_v35 = vadd.f32 %v2461_v17, %v2460_v47 }
0x1722   :  { %2464 = vrot.lane.b32.xlu1 %v2462_v35, %s4969_s21 }
0x1794   :  { %v2465_v5 = vpop.permute.xlu1 %2464 }
0x1795   :  { %4614 = vmatmul.mubr.msk.f32.vlgmr.msra.gmra.mrb[42].mxu1 %vm1326_vm11, %v2465_v5 }
0x1796   :  { %4738 = vmatpush3.bf16.msra.mxu1 %v6093_v42  ;;  %4627 = vmatprep.mubr.msk.f32.mxu1 %vm4965_vm12, %v4966_v7 }
0x1797   :  { %4742 = vmatprep.subr.bf16.mxu1 %v4964_v21 }
0x1868   :  { %v2534_v36 = vpop.f32.mrb[42].mxu1 }
0x1869   :  { %v2535_v1 = vadd.f32 %v6211_v62, %v2534_v36  ;;  %v4615_v45 = vpop.f32.mrb[43].mxu1 }
0x186b   :  { %2546 = vrot.lane.b32.xlu0 %v2535_v1, %s4967_s19  ;;  %v2538_v39 = vadd.f32 %v2535_v1, %v6159_v25 }
0x186d   :  { %v4249_v60 = vmul.f32 -1.442695, %v2538_v39 }
0x186f   :  { %4840 = vpow2.f32 %v4249_v60 }
0x1879   :  { %v4841_v11 = vpop.eup %4840 }
0x187a   :  { %v2542_v22 = vadd.f32 1.0, %v4841_v11 }
0x187c   :  { %4842 = vrcp.f32 %v2542_v22 }
0x1886   :  { %v4843_v46 = vpop.eup %4842 }
0x1887   :  { %v2556_v58 = vsub.f32 1.0, %v4843_v46  ;;  %v2562_v23 = vmul.f32 %v4843_v46, %v2462_v35 }
0x18dd   :  { %v2547_v52 = vpop.permute.xlu0 %2546 }
0x18de   :  { %v2549_v53 = vmul.f32 %v4843_v46, %v2547_v52 }
0x18e0   :  { %2551 = vrot.lane.b32.xlu1 %v2549_v53, %s4968_s20 }
0x1952   :  { %v2552_v8 = vpop.permute.xlu1 %2551 }
0x1953   :  { %v2554_v16 = vadd.f32 %v2552_v8, %v6159_v25 }
0x1955   :  { %4844 = vtanh.f32 %v2554_v16 }
0x195f   :  { %v4845_v29 = vpop.eup %4844 }
0x1960   :  { %2558 = vrot.lane.b32.xlu0 %v4845_v29, %s4969_s21 }
0x19d2   :  { %v2559_v31 = vpop.permute.xlu0 %2558 }
0x19d3   :  { %v2561_v57 = vmul.f32 %v2559_v31, %v2556_v58 }
0x19d5   :  { %v2563_v37 = vadd.f32 %v2562_v23, %v2561_v57 }
0x19d7   :  { %2565 = vrot.lane.b32.xlu1 %v2563_v37, %s4969_s21 }
0x1a49   :  { %v2566_v50 = vpop.permute.xlu1 %2565 }
0x1a4a   :  { %4621 = vmatmul.mubr.msk.f32.vlgmr.msra.gmra.mrb[16].mxu0 %vm1326_vm11, %v2566_v50 }
0x1a4b   :  { %4741 = vmatpush3.bf16.msra.mxu0 %v6093_v42  ;;  %4634 = vmatprep.mubr.msk.f32.mxu0 %vm4965_vm12, %v4966_v7 }
0x1a4c   :  { %4745 = vmatprep.subr.bf16.mxu0 %v4964_v21 }
0x1b1d   :  { %v2635_v25 = vpop.f32.mrb[16].mxu0 }
0x1b1e   :  { %v2636_v26 = vadd.f32 %v6211_v62, %v2635_v25  ;;  %v4622_v56 = vpop.f32.mrb[17].mxu0 }
0x1b20   :  { %2647 = vrot.lane.b32.xlu0 %v2636_v26, %s4967_s19  ;;  %v2639_v24 = vadd.f32 %v2636_v26, %v6157_v15 }
0x1b22   :  { %v4251_v48 = vmul.f32 -1.442695, %v2639_v24 }
0x1b24   :  { %4846 = vpow2.f32 %v4251_v48 }
0x1b2e   :  { %v4847_v19 = vpop.eup %4846 }
0x1b2f   :  { %v2643_v49 = vadd.f32 1.0, %v4847_v19 }
0x1b31   :  { %4848 = vrcp.f32 %v2643_v49  ;;  %v6349_v49 = vld [vmem:[%s6546_s8] sm:$0xff] }
0x1b3b   :  { %v4849_v61 = vpop.eup %4848 }
0x1b3c   :  { %v2657_v54 = vsub.f32 1.0, %v4849_v61  ;;  %v2663_v28 = vmul.f32 %v4849_v61, %v2563_v37 }
0x1b92   :  { %v2648_v20 = vpop.permute.xlu0 %2647 }
0x1b93   :  { %v2650_v27 = vmul.f32 %v4849_v61, %v2648_v20 }
0x1b95   :  { %2652 = vrot.lane.b32.xlu1 %v2650_v27, %s4968_s20 }
0x1c07   :  { %v2653_v30 = vpop.permute.xlu1 %2652 }
0x1c08   :  { %v2655_v18 = vadd.f32 %v2653_v30, %v6157_v15 }
0x1c0a   :  { %4850 = vtanh.f32 %v2655_v18 }
0x1c14   :  { %v4851_v9 = vpop.eup %4850 }
0x1c15   :  { %2659 = vrot.lane.b32.xlu0 %v4851_v9, %s4969_s21 }
0x1c87   :  { %v2660_v0 = vpop.permute.xlu0 %2659 }
0x1c88   :  { %v2662_v33 = vmul.f32 %v2660_v0, %v2657_v54 }
0x1c8a   :  { %v2664_v32 = vadd.f32 %v2663_v28, %v2662_v33  ;;  %v6369_v33 = vld [vmem:[%s6548_s10] ss:$0 sm:$0xff]  ;;  %s4970_s10 = smov 16  }
0x1c8c   :  { %2666 = vrot.lane.b32.xlu1 %v2664_v32, %s4969_s21 }
0x1cfe   :  { %v2667_v17 = vpop.permute.xlu1 %2666 }
0x1cff   :  { %4628 = vmatmul.mubr.msk.f32.vlgmr.msra.gmra.mrb[44].mxu1 %vm1326_vm11, %v2667_v17 }
0x1d00   :  { %4744 = vmatpush3.bf16.msra.mxu1 %v6093_v42  ;;  %4641 = vmatprep.mubr.msk.f32.mxu1 %vm4965_vm12, %v4966_v7 }
0x1d01   :  { %4651 = vmatprep.subr.mxu1 %v6349_v49 }
0x1dd2   :  { %v2736_v15 = vpop.f32.mrb[44].mxu1 }
0x1dd3   :  { %v2737_v47 = vadd.f32 %v6211_v62, %v2736_v15  ;;  %v4629_v35 = vpop.f32.mrb[45].mxu1 }
0x1dd4   :  { %v1593_v35 = vadd.f32 %v6169_v43, %v6176_v12 }
0x1dd5   :  { %2748 = vrot.lane.b32.xlu0 %v2737_v47, %s4967_s19  ;;  %v2740_v5 = vadd.f32 %v2737_v47, %v6163_v55 }
0x1dd7   :  { %v4253_v36 = vmul.f32 -1.442695, %v2740_v5  ;;  %v1588_v5 = vadd.f32 %v6176_v12, %v6171_v63 }
0x1dd9   :  { %4852 = vpow2.f32 %v4253_v36 }
0x1de3   :  { %v4853_v1 = vpop.eup %4852 }
0x1de4   :  { %v2744_v45 = vadd.f32 1.0, %v4853_v1 }
0x1de6   :  { %4854 = vrcp.f32 %v2744_v45 }
0x1df0   :  { %v4855_v39 = vpop.eup %4854 }
0x1df1   :  { %v2758_v53 = vsub.f32 1.0, %v4855_v39  ;;  %v2764_v16 = vmul.f32 %v4855_v39, %v2664_v32 }
0x1e47   :  { %v2749_v60 = vpop.permute.xlu0 %2748 }
0x1e48   :  { %v2751_v11 = vmul.f32 %v4855_v39, %v2749_v60 }
0x1e4a   :  { %2753 = vrot.lane.b32.xlu1 %v2751_v11, %s4968_s20 }
0x1ebc   :  { %v2754_v22 = vpop.permute.xlu1 %2753 }
0x1ebd   :  { %v2756_v46 = vadd.f32 %v2754_v22, %v6163_v55 }
0x1ebf   :  { %4856 = vtanh.f32 %v2756_v46 }
0x1ec9   :  { %v4857_v52 = vpop.eup %4856 }
0x1eca   :  { %2760 = vrot.lane.b32.xlu0 %v4857_v52, %s4969_s21 }
0x1f3c   :  { %v2761_v8 = vpop.permute.xlu0 %2760 }
0x1f3d   :  { %v2763_v29 = vmul.f32 %v2761_v8, %v2758_v53 }
0x1f3f   :  { %v2765_v58 = vadd.f32 %v2764_v16, %v2763_v29 }
0x1f41   :  { %2767 = vrot.lane.b32.xlu1 %v2765_v58, %s4969_s21 }
0x1fb3   :  { %v2768_v31 = vpop.permute.xlu1 %2767 }
0x1fb4   :  { %4635 = vmatmul.mubr.msk.f32.vlgmr.msra.gmra.mrb[18].mxu0 %vm1326_vm11, %v2768_v31 }
0x1fb5   :  { %4747 = vmatpush3.bf16.msra.mxu0 %v6093_v42  ;;  %4648 = vmatprep.mubr.msk.f32.mxu0 %vm4965_vm12, %v4966_v7 }
0x1fb6   :  { %4656 = vmatprep.subr.mxu0 %v6349_v49 }
0x2087   :  { %v2837_v55 = vpop.f32.mrb[18].mxu0 }
0x2088   :  { %v2838_v23 = vadd.f32 %v6211_v62, %v2837_v55  ;;  %v4636_v57 = vpop.f32.mrb[19].mxu0 }
0x208a   :  { %2849 = vrot.lane.b32.xlu0 %v2838_v23, %s4967_s19  ;;  %v2841_v37 = vadd.f32 %v2838_v23, %v6161_v34 }
0x208c   :  { %v4255_v50 = vmul.f32 -1.442695, %v2841_v37 }
0x208e   :  { %4858 = vpow2.f32 %v4255_v50 }
0x2098   :  { %v4859_v25 = vpop.eup %4858 }
0x2099   :  { %v2845_v26 = vadd.f32 1.0, %v4859_v25 }
0x209b   :  { %4860 = vrcp.f32 %v2845_v26 }
0x20a5   :  { %v4861_v56 = vpop.eup %4860 }
0x20a6   :  { %v2859_v20 = vsub.f32 1.0, %v4861_v56  ;;  %v2865_v30 = vmul.f32 %v4861_v56, %v2765_v58 }
0x20fc   :  { %v2850_v24 = vpop.permute.xlu0 %2849 }
0x20fd   :  { %v2852_v48 = vmul.f32 %v4861_v56, %v2850_v24 }
0x20ff   :  { %2854 = vrot.lane.b32.xlu1 %v2852_v48, %s4968_s20 }
0x2171   :  { %v2855_v42 = vpop.permute.xlu1 %2854 }
0x2172   :  { %v2857_v19 = vadd.f32 %v2855_v42, %v6161_v34 }
0x2174   :  { %4862 = vtanh.f32 %v2857_v19 }
0x217e   :  { %v4863_v61 = vpop.eup %4862 }
0x217f   :  { %2861 = vrot.lane.b32.xlu0 %v4863_v61, %s4969_s21 }
0x21f1   :  { %v2862_v27 = vpop.permute.xlu0 %2861 }
0x21f2   :  { %v2864_v18 = vmul.f32 %v2862_v27, %v2859_v20 }
0x21f4   :  { %v6354_v9 = vadd.f32 %v2865_v30, %v2864_v18 }
0x21f6   :  { %2868 = vrot.lane.b32.xlu1 %v6354_v9, %s4969_s21 }
0x2268   :  { %v2869_v34 = vpop.permute.xlu1 %2868 }
0x2269   :  { %4642 = vmatmul.mubr.msk.f32.vlgmr.msra.gmra.mrb[46].mxu1 %vm1326_vm11, %v2869_v34 }
0x226a   :  { %4652 = vmatpush3.msra.mxu1 %v6349_v49  ;;  %4653 = vmatprep.mubr.f32.mxu1 %v4966_v7 }
0x226b   :  { %4661 = vmatprep.subr.mxu1 %v6349_v49 }
0x226d   :  { %4654 = vmatmul.mubr.f32.vlgmr.msra.gmra.mrb[48].mxu1 %v4966_v7 }
0x226e   :  { %4662 = vmatpush3.msra.mxu1 %v6349_v49 }
0x226f   :  { %4671 = vmatprep.subr.mxu1 %v6349_v49 }
0x233c   :  { %v2938_v54 = vpop.f32.mrb[46].mxu1 }
0x233d   :  { %v2939_v0 = vadd.f32 %v6211_v62, %v2938_v54  ;;  %v4643_v28 = vpop.f32.mrb[47].mxu1 }
0x233f   :  { %2950 = vrot.lane.b32.xlu0 %v2939_v0, %s4967_s19  ;;  %v2942_v62 = vadd.f32 %v2939_v0, %v6167_v44 }
0x2340   :  { %v4655_v32 = vpop.f32.mrb[48].mxu1 }
0x2341   :  { %v3149_v17 = vadd.f32 %v4655_v32, %v6369_v33  ;;  %v3143_v15 = vpop.f32.mrb[49].mxu1  ;;  %v4257_v36 = vmul.f32 -1.442695, %v2942_v62 }
0x2342   :  { %v3144_v47 = vadd.f32 %v6369_v33, %v3143_v15 }
0x2343   :  { %3170 = vrot.lane.b32.xlu0 %v3149_v17, %s4969_s21  ;;  %v3153_v1 = vadd.f32 %v3149_v17, %v1593_v35  ;;  %4864 = vpow2.f32 %v4257_v36 }
0x2344   :  { %3168 = vrot.lane.b32.xlu1 %v3144_v47, %s4969_s21  ;;  %v3152_v45 = vadd.f32 %v3144_v47, %v1588_v5 }
0x2345   :  { %v4262_v39 = vmul.f32 -1.442695, %v3153_v1 }
0x2346   :  { %v4261_v60 = vmul.f32 -1.442695, %v3152_v45 }
0x2347   :  { %4866 = vpow2.f32 %v4262_v39 }
0x2348   :  { %4868 = vpow2.f32 %v4261_v60 }
0x234d   :  { %v4865_v11 = vpop.eup %4864 }
0x234e   :  { %v2946_v22 = vadd.f32 1.0, %v4865_v11 }
0x2350   :  { %4870 = vrcp.f32 %v2946_v22 }
0x2351   :  { %v4867_v46 = vpop.eup %4866 }
0x2352   :  { %v4869_v52 = vpop.eup %4868  ;;  %v3161_v53 = vadd.f32 1.0, %v4867_v46 }
0x2353   :  { %v3160_v8 = vadd.f32 1.0, %v4869_v52 }
0x2354   :  { %4872 = vrcp.f32 %v3161_v53 }
0x2355   :  { %4874 = vrcp.f32 %v3160_v8 }
0x235a   :  { %v4871_v43 = vpop.eup %4870 }
0x235b   :  { %v2960_v19 = vsub.f32 1.0, %v4871_v43 }
0x235e   :  { %v4873_v12 = vpop.eup %4872 }
0x235f   :  { %v4875_v58 = vpop.eup %4874  ;;  %v3189_v30 = vsub.f32 1.0, %v4873_v12  ;;  %v3201_v54 = vmul.f32 0.0, %v4873_v12 }
0x2360   :  { %v3188_v34 = vsub.f32 1.0, %v4875_v58  ;;  %v3200_v32 = vmul.f32 0.0, %v4875_v58 }
0x23b1   :  { %v2951_v16 = vpop.permute.xlu0 %2950 }
0x23b2   :  { %v2953_v63 = vmul.f32 %v4871_v43, %v2951_v16 }
0x23b4   :  { %2955 = vrot.lane.b32.xlu1 %v2953_v63, %s4968_s20 }
0x23b5   :  { %v3171_v29 = vpop.permute.xlu0 %3170 }
0x23b6   :  { %v3175_v31 = vmul.f32 %v4873_v12, %v3171_v29  ;;  %v3169_v55 = vpop.permute.xlu1 %3168 }
0x23b7   :  { %v3174_v23 = vmul.f32 %v4875_v58, %v3169_v55 }
0x23b8   :  { %3180 = vrot.lane.b32.xlu1 %v3175_v31, %s4970_s10 }
0x23b9   :  { %3178 = vrot.lane.b32.xlu0 %v3174_v23, %s4970_s10 }
0x2426   :  { %v2956_v57 = vpop.permute.xlu1 %2955 }
0x2427   :  { %v2958_v37 = vadd.f32 %v2956_v57, %v6167_v44  ;;  %v2966_v44 = vmul.f32 %v4871_v43, %v6354_v9 }
0x2429   :  { %4876 = vtanh.f32 %v2958_v37 }
0x242a   :  { %v3181_v50 = vpop.permute.xlu1 %3180 }
0x242b   :  { %v3185_v25 = vadd.f32 %v3181_v50, %v1593_v35  ;;  %v3179_v26 = vpop.permute.xlu0 %3178 }
0x242c   :  { %v3184_v56 = vadd.f32 %v3179_v26, %v1588_v5 }
0x242d   :  { %4878 = vtanh.f32 %v3185_v25 }
0x242e   :  { %4880 = vtanh.f32 %v3184_v56 }
0x2433   :  { %v4877_v24 = vpop.eup %4876 }
0x2434   :  { %2962 = vrot.lane.b32.xlu0 %v4877_v24, %s4969_s21 }
0x2437   :  { %v4879_v48 = vpop.eup %4878 }
0x2438   :  { %v4881_v42 = vpop.eup %4880  ;;  %3194 = vrot.lane.b32.xlu0 %v4879_v48, %s4971_s24 }
0x2439   :  { %3192 = vrot.lane.b32.xlu1 %v4881_v42, %s4971_s24 }
0x24a6   :  { %v2963_v61 = vpop.permute.xlu0 %2962 }
0x24a7   :  { %v2965_v20 = vmul.f32 %v2963_v61, %v2960_v19 }
0x24a9   :  { %v6389_v27 = vadd.f32 %v2966_v44, %v2965_v20 }
0x24aa   :  { %v3195_v18 = vpop.permute.xlu0 %3194 }
0x24ab   :  { %v3199_v0 = vmul.f32 %v3195_v18, %v3189_v30  ;;  %2969 = vrot.lane.b32.xlu1 %v6389_v27, %s4969_s21  ;;  %v3193_v28 = vpop.permute.xlu1 %3192 }
0x24ac   :  { %v3198_v17 = vmul.f32 %v3193_v28, %v3188_v34 }
0x24ad   :  { %v3203_v15 = vadd.f32 %v3201_v54, %v3199_v0 }
0x24ae   :  { %v3202_v47 = vadd.f32 %v3200_v32, %v3198_v17 }
0x24af   :  { %3208 = vrot.lane.b32.xlu1 %v3203_v15, %s4971_s24 }
0x24b0   :  { %3206 = vrot.lane.b32.xlu0 %v3202_v47, %s4971_s24 }
0x251d   :  { %v2970_v9 = vpop.permute.xlu1 %2969 }
0x251e   :  { %4649 = vmatmul.mubr.msk.f32.vlgmr.msra.gmra.mrb[20].mxu0 %vm1326_vm11, %v2970_v9 }
0x251f   :  { %4657 = vmatpush3.msra.mxu0 %v6349_v49 }
0x2520   :  { %4666 = vmatprep.subr.mxu0 %v6349_v49 }
0x2521   :  { %v3209_v35 = vpop.permute.xlu1 %3208 }
0x2522   :  { %v3207_v62 = vpop.permute.xlu0 %3206 }
0x2523   :  { %4658 = vmatprep.mubr.msk.f32.mxu0 %vm6929_vm10, %v3207_v62 }
0x2524   :  { %4659 = vmatmul.mubr.msk.f32.vlgmr.msra.gmra.mrb[22].mxu0 %vm6930_vm13, %v3209_v35 }
0x2525   :  { %4667 = vmatpush3.msra.mxu0 %v6349_v49 }
0x2526   :  { %4676 = vmatprep.subr.mxu0 %v6349_v49 }
0x25f1   :  { %v6402_v5 = vpop.f32.mrb[20].mxu0 }
0x25f2   :  { %v4650_v36 = vpop.f32.mrb[21].mxu0 }
0x25f7   :  { %v4660_v1 = vpop.f32.mrb[22].mxu0 }
0x25f8   :  { %v3286_v45 = vadd.f32 %v4660_v1, %v6369_v33  ;;  %v3280_v39 = vpop.f32.mrb[23].mxu0 }
0x25f9   :  { %v3281_v60 = vadd.f32 %v6369_v33, %v3280_v39 }
0x25fa   :  { %3307 = vrot.lane.b32.xlu1 %v3286_v45, %s4969_s21  ;;  %v3290_v11 = vadd.f32 %v3286_v45, %v6179_v6 }
0x25fb   :  { %3305 = vrot.lane.b32.xlu0 %v3281_v60, %s4969_s21  ;;  %v3289_v22 = vadd.f32 %v3281_v60, %v6182_v13 }
0x25fc   :  { %v4266_v46 = vmul.f32 -1.442695, %v3290_v11 }
0x25fd   :  { %v4265_v52 = vmul.f32 -1.442695, %v3289_v22 }
0x25fe   :  { %4882 = vpow2.f32 %v4266_v46 }
0x25ff   :  { %4884 = vpow2.f32 %v4265_v52 }
0x2608   :  { %v4883_v53 = vpop.eup %4882 }
0x2609   :  { %v4885_v8 = vpop.eup %4884  ;;  %v3298_v43 = vadd.f32 1.0, %v4883_v53 }
0x260a   :  { %v3297_v16 = vadd.f32 1.0, %v4885_v8 }
0x260b   :  { %4886 = vrcp.f32 %v3298_v43 }
0x260c   :  { %4888 = vrcp.f32 %v3297_v16 }
0x2615   :  { %v4887_v63 = vpop.eup %4886 }
0x2616   :  { %v4889_v29 = vpop.eup %4888  ;;  %v3326_v56 = vsub.f32 1.0, %v4887_v63  ;;  %v3338_v42 = vmul.f32 %v4887_v63, %v3203_v15 }
0x2617   :  { %v3325_v48 = vsub.f32 1.0, %v4889_v29  ;;  %v3337_v44 = vmul.f32 %v4889_v29, %v3202_v47 }
0x266c   :  { %v3308_v12 = vpop.permute.xlu1 %3307 }
0x266d   :  { %v3312_v58 = vmul.f32 %v4887_v63, %v3308_v12  ;;  %v3306_v31 = vpop.permute.xlu0 %3305 }
0x266e   :  { %v3311_v55 = vmul.f32 %v4889_v29, %v3306_v31 }
0x266f   :  { %3317 = vrot.lane.b32.xlu1 %v3312_v58, %s4970_s10 }
0x2670   :  { %3315 = vrot.lane.b32.xlu0 %v3311_v55, %s4970_s10 }
0x26e1   :  { %v3318_v23 = vpop.permute.xlu1 %3317 }
0x26e2   :  { %v3322_v57 = vadd.f32 %v3318_v23, %v6179_v6  ;;  %v3316_v37 = vpop.permute.xlu0 %3315 }
0x26e3   :  { %v3321_v50 = vadd.f32 %v3316_v37, %v6182_v13 }
0x26e4   :  { %4890 = vtanh.f32 %v3322_v57 }
0x26e5   :  { %4892 = vtanh.f32 %v3321_v50 }
0x26ee   :  { %v4891_v25 = vpop.eup %4890 }
0x26ef   :  { %v4893_v26 = vpop.eup %4892  ;;  %3331 = vrot.lane.b32.xlu1 %v4891_v25, %s4971_s24 }
0x26f0   :  { %3329 = vrot.lane.b32.xlu0 %v4893_v26, %s4971_s24 }
0x2761   :  { %v3332_v24 = vpop.permute.xlu1 %3331 }
0x2762   :  { %v3336_v19 = vmul.f32 %v3332_v24, %v3326_v56  ;;  %v3330_v61 = vpop.permute.xlu0 %3329 }
0x2763   :  { %v3335_v20 = vmul.f32 %v3330_v61, %v3325_v48 }
0x2764   :  { %v3340_v6 = vadd.f32 %v3338_v42, %v3336_v19 }
0x2765   :  { %v3339_v30 = vadd.f32 %v3337_v44, %v3335_v20 }
0x2766   :  { %3345 = vrot.lane.b32.xlu1 %v3340_v6, %s4971_s24 }
0x2767   :  { %3343 = vrot.lane.b32.xlu0 %v3339_v30, %s4971_s24 }
0x27d8   :  { %v3346_v18 = vpop.permute.xlu1 %3345 }
0x27d9   :  { %v3344_v13 = vpop.permute.xlu0 %3343 }
0x27da   :  { %4663 = vmatprep.mubr.msk.f32.mxu1 %vm6931_vm6, %v3344_v13 }
0x27db   :  { %4664 = vmatmul.mubr.msk.f32.vlgmr.msra.gmra.mrb[50].mxu1 %vm6932_vm3, %v3346_v18 }
0x27dc   :  { %4672 = vmatpush3.msra.mxu1 %v6349_v49 }
0x27dd   :  { %4681 = vmatprep.subr.mxu1 %v4966_v7 }
0x28ae   :  { %v4665_v34 = vpop.f32.mrb[50].mxu1 }
0x28af   :  { %v3423_v54 = vadd.f32 %v4665_v34, %v6369_v33  ;;  %v3417_v0 = vpop.f32.mrb[51].mxu1 }
0x28b0   :  { %v3418_v28 = vadd.f32 %v6369_v33, %v3417_v0 }
0x28b1   :  { %3444 = vrot.lane.b32.xlu1 %v3423_v54, %s4969_s21  ;;  %v3427_v32 = vadd.f32 %v3423_v54, %v6185_v14 }
0x28b2   :  { %3442 = vrot.lane.b32.xlu0 %v3418_v28, %s4969_s21  ;;  %v3426_v17 = vadd.f32 %v3418_v28, %v6188_v51 }
0x28b3   :  { %v4270_v15 = vmul.f32 -1.442695, %v3427_v32 }
0x28b4   :  { %v4269_v47 = vmul.f32 -1.442695, %v3426_v17 }
0x28b5   :  { %4894 = vpow2.f32 %v4270_v15 }
0x28b6   :  { %4896 = vpow2.f32 %v4269_v47 }
0x28bf   :  { %v4895_v9 = vpop.eup %4894 }
0x28c0   :  { %v4897_v62 = vpop.eup %4896  ;;  %v3435_v35 = vadd.f32 1.0, %v4895_v9 }
0x28c1   :  { %v3434_v36 = vadd.f32 1.0, %v4897_v62 }
0x28c2   :  { %4898 = vrcp.f32 %v3435_v35 }
0x28c3   :  { %4900 = vrcp.f32 %v3434_v36 }
0x28cc   :  { %v4899_v1 = vpop.eup %4898 }
0x28cd   :  { %v4901_v39 = vpop.eup %4900  ;;  %v3463_v63 = vsub.f32 1.0, %v4899_v1  ;;  %v3475_v58 = vmul.f32 %v4899_v1, %v3340_v6 }
0x28ce   :  { %v3462_v29 = vsub.f32 1.0, %v4901_v39  ;;  %v3474_v23 = vmul.f32 %v4901_v39, %v3339_v30 }
0x2923   :  { %v3445_v45 = vpop.permute.xlu1 %3444 }
0x2924   :  { %v3449_v60 = vmul.f32 %v4899_v1, %v3445_v45  ;;  %v3443_v11 = vpop.permute.xlu0 %3442 }
0x2925   :  { %v3448_v22 = vmul.f32 %v4901_v39, %v3443_v11 }
0x2926   :  { %3454 = vrot.lane.b32.xlu1 %v3449_v60, %s4970_s10 }
0x2927   :  { %3452 = vrot.lane.b32.xlu0 %v3448_v22, %s4970_s10 }
0x2998   :  { %v3455_v46 = vpop.permute.xlu1 %3454 }
0x2999   :  { %v3459_v52 = vadd.f32 %v3455_v46, %v6185_v14  ;;  %v3453_v53 = vpop.permute.xlu0 %3452 }
0x299a   :  { %v3458_v8 = vadd.f32 %v3453_v53, %v6188_v51 }
0x299b   :  { %4902 = vtanh.f32 %v3459_v52 }
0x299c   :  { %4904 = vtanh.f32 %v3458_v8 }
0x29a5   :  { %v4903_v43 = vpop.eup %4902 }
0x29a6   :  { %v4905_v16 = vpop.eup %4904  ;;  %3468 = vrot.lane.b32.xlu1 %v4903_v43, %s4971_s24 }
0x29a7   :  { %3466 = vrot.lane.b32.xlu0 %v4905_v16, %s4971_s24 }
0x2a18   :  { %v3469_v12 = vpop.permute.xlu1 %3468 }
0x2a19   :  { %v3473_v31 = vmul.f32 %v3469_v12, %v3463_v63  ;;  %v3467_v55 = vpop.permute.xlu0 %3466 }
0x2a1a   :  { %v3472_v57 = vmul.f32 %v3467_v55, %v3462_v29 }
0x2a1b   :  { %v3477_v14 = vadd.f32 %v3475_v58, %v3473_v31 }
0x2a1c   :  { %v3476_v37 = vadd.f32 %v3474_v23, %v3472_v57 }
0x2a1d   :  { %3482 = vrot.lane.b32.xlu1 %v3477_v14, %s4971_s24 }
0x2a1e   :  { %3480 = vrot.lane.b32.xlu0 %v3476_v37, %s4971_s24 }
0x2a8f   :  { %v3483_v50 = vpop.permute.xlu1 %3482 }
0x2a90   :  { %v3481_v51 = vpop.permute.xlu0 %3480 }
0x2a91   :  { %4668 = vmatprep.mubr.msk.f32.mxu0 %vm6933_vm15, %v3481_v51 }
0x2a92   :  { %4669 = vmatmul.mubr.msk.f32.vlgmr.msra.gmra.mrb[24].mxu0 %vm6934_vm9, %v3483_v50 }
0x2a93   :  { %4677 = vmatpush3.msra.mxu0 %v6349_v49 }
0x2a94   :  { %4748 = vmatprep.subr.bf16.mxu0 %v4964_v21 }
0x2b65   :  { %v4670_v25 = vpop.f32.mrb[24].mxu0 }
0x2b66   :  { %v3560_v26 = vadd.f32 %v4670_v25, %v6369_v33  ;;  %v3554_v56 = vpop.f32.mrb[25].mxu0 }
0x2b67   :  { %v3555_v24 = vadd.f32 %v6369_v33, %v3554_v56 }
0x2b68   :  { %3581 = vrot.lane.b32.xlu1 %v3560_v26, %s4969_s21  ;;  %v3564_v48 = vadd.f32 %v3560_v26, %v6191_v59 }
0x2b69   :  { %3579 = vrot.lane.b32.xlu0 %v3555_v24, %s4969_s21  ;;  %v3563_v42 = vadd.f32 %v3555_v24, %v6194_v41 }
0x2b6a   :  { %v4274_v19 = vmul.f32 -1.442695, %v3564_v48 }
0x2b6b   :  { %v4273_v61 = vmul.f32 -1.442695, %v3563_v42 }
0x2b6c   :  { %4906 = vpow2.f32 %v4274_v19 }
0x2b6d   :  { %4908 = vpow2.f32 %v4273_v61 }
0x2b76   :  { %v4907_v49 = vpop.eup %4906 }
0x2b77   :  { %v4909_v21 = vpop.eup %4908  ;;  %v3572_v44 = vadd.f32 1.0, %v4907_v49 }
0x2b78   :  { %v3571_v20 = vadd.f32 1.0, %v4909_v21 }
0x2b79   :  { %4910 = vrcp.f32 %v3572_v44 }
0x2b7a   :  { %4912 = vrcp.f32 %v3571_v20 }
0x2b83   :  { %v4911_v6 = vpop.eup %4910 }
0x2b84   :  { %v4913_v13 = vpop.eup %4912  ;;  %v3600_v9 = vsub.f32 1.0, %v4911_v6  ;;  %v3612_v36 = vmul.f32 %v4911_v6, %v3477_v14 }
0x2b85   :  { %v3599_v35 = vsub.f32 1.0, %v4913_v13  ;;  %v3611_v39 = vmul.f32 %v4913_v13, %v3476_v37 }
0x2bda   :  { %v3582_v30 = vpop.permute.xlu1 %3581 }
0x2bdb   :  { %v3586_v18 = vmul.f32 %v4911_v6, %v3582_v30  ;;  %v3580_v34 = vpop.permute.xlu0 %3579 }
0x2bdc   :  { %v3585_v54 = vmul.f32 %v4913_v13, %v3580_v34 }
0x2bdd   :  { %3591 = vrot.lane.b32.xlu1 %v3586_v18, %s4970_s10 }
0x2bde   :  { %3589 = vrot.lane.b32.xlu0 %v3585_v54, %s4970_s10 }
0x2c4f   :  { %v3592_v0 = vpop.permute.xlu1 %3591 }
0x2c50   :  { %v3596_v28 = vadd.f32 %v3592_v0, %v6191_v59  ;;  %v3590_v32 = vpop.permute.xlu0 %3589 }
0x2c51   :  { %v3595_v17 = vadd.f32 %v3590_v32, %v6194_v41 }
0x2c52   :  { %4914 = vtanh.f32 %v3596_v28 }
0x2c53   :  { %4916 = vtanh.f32 %v3595_v17 }
0x2c5c   :  { %v4915_v15 = vpop.eup %4914 }
0x2c5d   :  { %v4917_v47 = vpop.eup %4916  ;;  %3605 = vrot.lane.b32.xlu1 %v4915_v15, %s4971_s24 }
0x2c5e   :  { %3603 = vrot.lane.b32.xlu0 %v4917_v47, %s4971_s24 }
0x2ccf   :  { %v3606_v62 = vpop.permute.xlu1 %3605 }
0x2cd0   :  { %v3610_v1 = vmul.f32 %v3606_v62, %v3600_v9  ;;  %v3604_v45 = vpop.permute.xlu0 %3603 }
0x2cd1   :  { %v3609_v60 = vmul.f32 %v3604_v45, %v3599_v35 }
0x2cd2   :  { %v3614_v59 = vadd.f32 %v3612_v36, %v3610_v1 }
0x2cd3   :  { %v3613_v11 = vadd.f32 %v3611_v39, %v3609_v60 }
0x2cd4   :  { %3619 = vrot.lane.b32.xlu1 %v3614_v59, %s4971_s24 }
0x2cd5   :  { %3617 = vrot.lane.b32.xlu0 %v3613_v11, %s4971_s24 }
0x2d46   :  { %v3620_v22 = vpop.permute.xlu1 %3619 }
0x2d47   :  { %v3618_v41 = vpop.permute.xlu0 %3617 }
0x2d48   :  { %4673 = vmatprep.mubr.msk.f32.mxu1 %vm6935_vm2, %v3618_v41 }
0x2d49   :  { %4674 = vmatmul.mubr.msk.f32.vlgmr.msra.gmra.mrb[52].mxu1 %vm6936_vm14, %v3620_v22 }
0x2d4a   :  { %4683 = vmatprep.mubr.msk.f32.mxu1 %vm4965_vm12, %v4966_v7 }
0x2e1c   :  { %v4675_v46 = vpop.f32.mrb[52].mxu1 }
0x2e1d   :  { %v3697_v52 = vadd.f32 %v4675_v46, %v6369_v33  ;;  %v3691_v53 = vpop.f32.mrb[53].mxu1 }
0x2e1e   :  { %v3692_v8 = vadd.f32 %v6369_v33, %v3691_v53 }
0x2e1f   :  { %3718 = vrot.lane.b32.xlu1 %v3697_v52, %s4969_s21  ;;  %v3701_v43 = vadd.f32 %v3697_v52, %v6197_v10 }
0x2e20   :  { %3716 = vrot.lane.b32.xlu0 %v3692_v8, %s4969_s21  ;;  %v3700_v16 = vadd.f32 %v3692_v8, %v6200_v4 }
0x2e21   :  { %v4278_v63 = vmul.f32 -1.442695, %v3701_v43 }
0x2e22   :  { %v4277_v12 = vmul.f32 -1.442695, %v3700_v16 }
0x2e23   :  { %4918 = vpow2.f32 %v4278_v63 }
0x2e24   :  { %4920 = vpow2.f32 %v4277_v12 }
0x2e2d   :  { %v4919_v29 = vpop.eup %4918 }
0x2e2e   :  { %v4921_v58 = vpop.eup %4920  ;;  %v3709_v31 = vadd.f32 1.0, %v4919_v29 }
0x2e2f   :  { %v3708_v55 = vadd.f32 1.0, %v4921_v58 }
0x2e30   :  { %4922 = vrcp.f32 %v3709_v31 }
0x2e31   :  { %4924 = vrcp.f32 %v3708_v55 }
0x2e3a   :  { %v4923_v23 = vpop.eup %4922 }
0x2e3b   :  { %v4925_v14 = vpop.eup %4924  ;;  %v3737_v19 = vsub.f32 1.0, %v4923_v23  ;;  %v3749_v21 = vmul.f32 %v4923_v23, %v3614_v59 }
0x2e3c   :  { %v3736_v49 = vsub.f32 1.0, %v4925_v14  ;;  %v3748_v6 = vmul.f32 %v4925_v14, %v3613_v11 }
0x2e91   :  { %v3719_v57 = vpop.permute.xlu1 %3718 }
0x2e92   :  { %v3723_v37 = vmul.f32 %v4923_v23, %v3719_v57  ;;  %v3717_v51 = vpop.permute.xlu0 %3716  ;;  %v3905_v23 = vld [vmem:[%s6549_s11] sm:$0xff]  ;;  %v3906_v57 = vld [vmem:[%s6549_s11 + $0x8] sm:$0xff] }
0x2e93   :  { %v3722_v50 = vmul.f32 %v4925_v14, %v3717_v51  ;;  %v3907_v14 = vld [vmem:[%s6549_s11 + $0x10] sm:$0xff] }
0x2e94   :  { %3728 = vrot.lane.b32.xlu1 %v3723_v37, %s4970_s10  ;;  %4682 = vmatpush3.msra.mxu1 %v3907_v14 }
0x2e95   :  { %3726 = vrot.lane.b32.xlu0 %v3722_v50, %s4970_s10  ;;  %4693 = vmatprep.subr.mxu1 %v4966_v7 }
0x2f06   :  { %v3729_v25 = vpop.permute.xlu1 %3728 }
0x2f07   :  { %v3733_v26 = vadd.f32 %v3729_v25, %v6197_v10  ;;  %v3727_v56 = vpop.permute.xlu0 %3726 }
0x2f08   :  { %v3732_v24 = vadd.f32 %v3727_v56, %v6200_v4  ;;  %v4948_v4 = vld [vmem:[%s6544_s6] ss:$0 sm:$0xff] }
0x2f09   :  { %4926 = vtanh.f32 %v3733_v26  ;;  %v3040_v18 = vadd.f32 %v4948_v4, %v6402_v5 }
0x2f0a   :  { %4928 = vtanh.f32 %v3732_v24 }
0x2f0b   :  { %v3043_v0 = vadd.f32 %v3040_v18, %v6165_v40 }
0x2f0d   :  { %v4259_v28 = vmul.f32 -1.442695, %v3043_v0  ;;  %v4144_v0 = vstv %s6552_s14 }
0x2f0f   :  { %4930 = vpow2.f32 %v4259_v28 }
0x2f13   :  { %v4927_v48 = vpop.eup %4926 }
0x2f14   :  { %v4929_v42 = vpop.eup %4928  ;;  %3742 = vrot.lane.b32.xlu1 %v4927_v48, %s4971_s24 }
0x2f15   :  { %3740 = vrot.lane.b32.xlu0 %v4929_v42, %s4971_s24 }
0x2f19   :  { %v4931_v32 = vpop.eup %4930 }
0x2f1a   :  { %v3047_v17 = vadd.f32 1.0, %v4931_v32  ;;  %v4289_v32 = vld [vmem:[%s6550_s12] ss:$0 sm:$0xff] }
0x2f1c   :  { %4932 = vrcp.f32 %v3047_v17 }
0x2f26   :  { %v4933_v35 = vpop.eup %4932 }
0x2f27   :  { %v3061_v37 = vsub.f32 1.0, %v4933_v35  ;;  %v3067_v50 = vmul.f32 %v4933_v35, %v6389_v27 }
0x2f86   :  { %v3743_v61 = vpop.permute.xlu1 %3742 }
0x2f87   :  { %v3747_v44 = vmul.f32 %v3743_v61, %v3737_v19  ;;  %v3741_v20 = vpop.permute.xlu0 %3740 }
0x2f88   :  { %v3746_v30 = vmul.f32 %v3741_v20, %v3736_v49 }
0x2f89   :  { %v6470_v10 = vadd.f32 %v3749_v21, %v3747_v44 }
0x2f8a   :  { %v6472_v13 = vadd.f32 %v3748_v6, %v3746_v30  ;;  %v3908_v6 = vld [vmem:[%s6549_s11 + $0x18] sm:$0xff] }
0x2f8b   :  { %3756 = vrot.lane.b32.xlu1 %v6470_v10, %s4971_s24 }
0x2f8c   :  { %3754 = vrot.lane.b32.xlu0 %v6472_v13, %s4971_s24 }
0x2f8f   :  { %3051 = vrot.lane.b32.xlu1 %v3040_v18, %s4967_s19 }
0x2ffd   :  { %v3757_v54 = vpop.permute.xlu1 %3756 }
0x2ffe   :  { %v3755_v34 = vpop.permute.xlu0 %3754 }
0x2fff   :  { %4678 = vmatprep.mubr.msk.f32.mxu0 %vm6937_vm1, %v3755_v34 }
0x3000   :  { %4679 = vmatmul.mubr.msk.f32.vlgmr.msra.gmra.mrb[26].mxu0 %vm6938_vm5, %v3757_v54 }
0x3001   :  { %4690 = vmatprep.mubr.msk.f32.mxu0 %vm4965_vm12, %v4966_v7  ;;  %v3052_v62 = vpop.permute.xlu1 %3051 }
0x3002   :  { %v3054_v36 = vmul.f32 %v4933_v35, %v3052_v62 }
0x30d3   :  { %v4680_v15 = vpop.f32.mrb[26].mxu0 }
0x30d4   :  { %v3828_v5 = vpop.f32.mrb[27].mxu0  ;;  %v3834_v9 = vadd.f32 %v4680_v15, %v6369_v33 }
0x30d5   :  { %v3829_v47 = vadd.f32 %v6369_v33, %v3828_v5 }
0x30d6   :  { %v3838_v45 = vadd.f32 %v3834_v9, %v6203_v38 }
0x30d7   :  { %3853 = vrot.lane.b32.xlu0 %v3829_v47, %s4969_s21  ;;  %v3837_v1 = vadd.f32 %v3829_v47, %v6206_v2 }
0x30d8   :  { %v4282_v60 = vmul.f32 -1.442695, %v3838_v45 }
0x30d9   :  { %v4281_v39 = vmul.f32 -1.442695, %v3837_v1 }
0x30db   :  { %3855 = vrot.lane.b32.xlu0 %v3834_v9, %s4969_s21  ;;  %4934 = vpow2.f32 %v4281_v39 }
0x30dc   :  { %4936 = vpow2.f32 %v4282_v60 }
0x30df   :  { %3056 = vrot.lane.b32.xlu0 %v3054_v36, %s4968_s20 }
0x30e5   :  { %v4935_v59 = vpop.eup %4934 }
0x30e6   :  { %v3845_v11 = vadd.f32 1.0, %v4935_v59  ;;  %v4937_v41 = vpop.eup %4936 }
0x30e7   :  { %v3846_v22 = vadd.f32 1.0, %v4937_v41 }
0x30e8   :  { %4938 = vrcp.f32 %v3845_v11 }
0x30e9   :  { %4940 = vrcp.f32 %v3846_v22 }
0x30f2   :  { %v4939_v33 = vpop.eup %4938 }
0x30f3   :  { %v4941_v53 = vpop.eup %4940  ;;  %v3873_v56 = vsub.f32 1.0, %v4939_v33  ;;  %v3885_v48 = vmul.f32 %v4939_v33, %v6472_v13 }
0x30f4   :  { %v3874_v61 = vsub.f32 1.0, %v4941_v53  ;;  %v3886_v21 = vmul.f32 %v4941_v53, %v6470_v10 }
0x3149   :  { %v3854_v46 = vpop.permute.xlu0 %3853 }
0x314a   :  { %v3859_v52 = vmul.f32 %v4939_v33, %v3854_v46 }
0x314c   :  { %3863 = vrot.lane.b32.xlu1 %v3859_v52, %s4970_s10 }
0x314d   :  { %v3856_v8 = vpop.permute.xlu0 %3855 }
0x314e   :  { %v3860_v43 = vmul.f32 %v4941_v53, %v3856_v8 }
0x3150   :  { %3865 = vrot.lane.b32.xlu1 %v3860_v43, %s4970_s10 }
0x3151   :  { %v3057_v16 = vpop.permute.xlu0 %3056 }
0x3152   :  { %v3059_v63 = vadd.f32 %v3057_v16, %v6165_v40  ;;  %v4749_v40 = vpack.c.bf16 %v3906_v57, %v3905_v23 }
0x3154   :  { %4942 = vtanh.f32 %v3059_v63  ;;  %4750 = vmatpush3.bf16.msra.mxu0 %v4749_v40 }
0x315e   :  { %v4943_v12 = vpop.eup %4942 }
0x315f   :  { %3063 = vrot.lane.b32.xlu1 %v4943_v12, %s4969_s21 }
0x31be   :  { %v3864_v29 = vpop.permute.xlu1 %3863 }
0x31bf   :  { %v3869_v58 = vadd.f32 %v3864_v29, %v6206_v2 }
0x31c1   :  { %4944 = vtanh.f32 %v3869_v58 }
0x31c2   :  { %v3866_v31 = vpop.permute.xlu1 %3865 }
0x31c3   :  { %v3870_v55 = vadd.f32 %v3866_v31, %v6203_v38 }
0x31c5   :  { %4946 = vtanh.f32 %v3870_v55 }
0x31cb   :  { %v4945_v2 = vpop.eup %4944 }
0x31cc   :  { %3877 = vrot.lane.b32.xlu0 %v4945_v2, %s4971_s24 }
0x31cf   :  { %v4947_v38 = vpop.eup %4946 }
0x31d0   :  { %3879 = vrot.lane.b32.xlu0 %v4947_v38, %s4971_s24 }
0x31d1   :  { %v3064_v51 = vpop.permute.xlu1 %3063 }
0x31d2   :  { %v3066_v25 = vmul.f32 %v3064_v51, %v3061_v37 }
0x31d4   :  { %v3068_v26 = vadd.f32 %v3067_v50, %v3066_v25 }
0x31d6   :  { %3985 = vrot.lane.b32.xlu0 %v3068_v26, %s4969_s21 }
0x323e   :  { %v3878_v24 = vpop.permute.xlu0 %3877 }
0x323f   :  { %v3883_v42 = vmul.f32 %v3878_v24, %v3873_v56 }
0x3241   :  { %v3887_v19 = vadd.f32 %v3885_v48, %v3883_v42 }
0x3242   :  { %v3880_v49 = vpop.permute.xlu0 %3879 }
0x3243   :  { %v3884_v44 = vmul.f32 %v3880_v49, %v3874_v61  ;;  %3910 = vrot.lane.b32.xlu1 %v3887_v19, %s4971_s24 }
0x3245   :  { %v3888_v20 = vadd.f32 %v3886_v21, %v3884_v44 }
0x3247   :  { %4060 = vrot.lane.b32.xlu1 %v3888_v20, %s4971_s24 }
0x3248   :  { %v3986_v27 = vpop.permute.xlu0 %3985 }
0x3249   :  { %4691 = vmatmul.mubr.msk.f32.vlgmr.msra.gmra.mrb[28].mxu0 %vm1326_vm11, %v3986_v27 }
0x32b5   :  { %v3911_v30 = vpop.permute.xlu1 %3910 }
0x32b6   :  { %4684 = vmatmul.mubr.msk.f32.vlgmr.msra.gmra.mrb[54].mxu1 %vm6939_vm4, %v3911_v30 }
0x32b7   :  { %4694 = vmatpush3.msra.mxu1 %v3908_v6  ;;  %4695 = vmatprep.mubr.msk.f32.mxu1 %vm4965_vm12, %v4966_v7  ;;  %v4145_v7 = vadd.f32 %v4144_v0, %v6023_v3 }
0x32b9   :  { %v4061_v10 = vpop.permute.xlu1 %4060 }
0x32ba   :  { %4696 = vmatmul.mubr.msk.f32.vlgmr.msra.gmra.mrb[56].mxu1 %vm6901_vm0, %v4061_v10 }
0x331c   :  { %v4055_v13 = vpop.f32.mrb[28].mxu0 }
0x331d   :  { %v4692_v4 = vpop.f32.mrb[29].mxu0 }
0x3389   :  { %v3980_v18 = vpop.f32.mrb[54].mxu1 }
0x338a   :  { %v4056_v34 = vadd.f32 %v4055_v13, %v3980_v18  ;;  %v4685_v54 = vpop.f32.mrb[55].mxu1 }
0x338d   :  { %v4130_v28 = vpop.f32.mrb[56].mxu1 }
0x338e   :  { %v4134_v17 = vadd.f32 %v4130_v28, %v4056_v34  ;;  %v4697_v15 = vpop.f32.mrb[57].mxu1 }
0x3390   :  { %v4142_v5 = vadd.f32 %v4289_v32, %v4134_v17 }
0x3392   :  { %v4146_v47 = vadd.f32 %v4145_v7, %v4142_v5 }
0x3394   :  { %4147 = vst.msk [vmem:[%s6553_s15] sm:$0xff] %vm808_vm8, %v4146_v47 }
0x3395   :  { %4156 = vsyncpa [#allocation4], 1 }

</bundles_post_ra>
